<compile_context>
chip_gen: v7x
topology: tpu7x:2x2x1
jax: 0.10.0
libtpu: 0.0.40
codegen_flags: <defaults>
</compile_context>

<pallas_src>
import jax
import jax.numpy as jnp
from jax.experimental import pallas as pl
from jax.experimental.pallas import tpu as pltpu

_LANE = 128
_SUBLANE = 8
_POS_PAD = 8                 # padded lane width of the 2-D position features
_BIG = 1e30                  # additive mask magnitude (self loops guarantee >=1 valid source)
_BN_EPS = 1e-5
_MM_DTYPE = jnp.bfloat16     # MXU operand dtype (accumulation stays float32)


def _round_up(v, m):
    return (v + m - 1) // m * m


def _vmem_limit_bytes():
    """Per-generation VMEM request with headroom for compiler temporaries (v7x has 64 MiB)."""
    cap = 128 * 1024 * 1024
    try:
        info = pltpu.get_tpu_info()
        cap = int(getattr(info, "vmem_capacity_bytes", cap))
    except Exception:
        pass
    return max(16 * 1024 * 1024, min(int(cap * 0.75), 100 * 1024 * 1024))


def _make_fused_head_kernel(n_real, n_pad, c_pad):
    """Whole PointNetHead forward in one kernel body (all activations stay in VMEM)."""
    inv_n = 1.0 / float(n_real)
    c1, c2, c3 = c_pad, 2 * c_pad, 3 * c_pad

    def kernel(x_ref, pos_ref, adj_ref,
               wx1_ref, wx23_ref, wxh_ref, wp_ref,
               wg1_ref, wg23_ref, wgh_ref,
               gam_ref, bet_ref, bhead_ref,
               head_ref,
               nb_scr, a_scr):
        # ---------------- one-time prep, hoisted out of all conv passes ----------------
        # additive neighbor mask: 0 where edge src->tgt, -1e30 otherwise (built once, reused 3x)
        nb_scr[...] = (adj_ref[...].astype(jnp.float32) - 1.0) * _BIG
        # all six pos@Wp products in a single K=8 matmul: columns [c1|c2|c3|reg|cls|obj]
        pos_b = pos_ref[...].astype(_MM_DTYPE)
        b_all = jnp.dot(pos_b, wp_ref[...], preferred_element_type=jnp.float32)  # [Np, 6*Cp]
        # valid-row mask: padded rows are excluded from BatchNorm statistics
        row_ids = jax.lax.broadcasted_iota(jnp.int32, (n_pad, 1), 0)
        row_valid = (row_ids < n_real).astype(jnp.float32)

        def masked_max(a, w):
            """out[i, :] = max over sources j of (a[j, :] + bias[j, i]); a is [Np(src), w]."""
            a_scr[:, pl.ds(0, w)] = a
            def chunk(jb, m):
                j0 = pl.multiple_of(jb * _SUBLANE, _SUBLANE)
                a_blk = a_scr[pl.ds(j0, _SUBLANE), pl.ds(0, w)]        # [8, w]
                nb_cols = nb_scr[pl.ds(j0, _SUBLANE), :][:, :, None]   # [8, Np, 1]
                # 8 successive full-width 2-D add/max steps (no [8, Np, w] temporary)
                for dj in range(_SUBLANE):
                    m = jnp.maximum(m, nb_cols[dj] + a_blk[dj:dj + 1, :])
                return m
            m0 = jnp.full((n_pad, w), -_BIG, dtype=jnp.float32)
            return jax.lax.fori_loop(0, n_pad // _SUBLANE, chunk, m0, unroll=2)

        def bn_relu(y, gamma, beta):
            # training-mode BatchNorm with centered (cancellation-safe) variance, fused ReLU
            yv = y * row_valid
            mu = jnp.sum(yv, axis=0, keepdims=True) * inv_n
            d = (y - mu) * row_valid
            var = jnp.sum(d * d, axis=0, keepdims=True) * inv_n
            out = (y - mu) * jax.lax.rsqrt(var + _BN_EPS) * gamma + beta
            return jnp.maximum(out, 0.0)

        # ---------------- conv1 -> BN -> ReLU ----------------
        b1 = b_all[:, 0:c1]
        a1 = jnp.dot(x_ref[...].astype(_MM_DTYPE), wx1_ref[...],
                     preferred_element_type=jnp.float32) + b1
        agg1 = masked_max(a1, c1) - b1
        y1 = jnp.dot(agg1.astype(_MM_DTYPE), wg1_ref[...], preferred_element_type=jnp.float32)
        x1 = bn_relu(y1, gam_ref[:, 0:c1], bet_ref[:, 0:c1])

        # ---------------- conv2 + conv3 batched (both consume x1) ----------------
        b23 = b_all[:, c1:c3]
        a23 = jnp.dot(x1.astype(_MM_DTYPE), wx23_ref[...],
                      preferred_element_type=jnp.float32) + b23
        agg23 = masked_max(a23, c2) - b23
        y23 = jnp.dot(agg23.astype(_MM_DTYPE), wg23_ref[...],     # block-diag [Wg2, Wg3]
                      preferred_element_type=jnp.float32)
        x23 = bn_relu(y23, gam_ref[:, c1:c3], bet_ref[:, c1:c3])  # cols [x2 | x3]

        # ---------------- reg(x2) + cls(x3) + obj(x3) heads batched ----------------
        bheads = b_all[:, c3:2 * c3]
        ah = jnp.dot(x23.astype(_MM_DTYPE), wxh_ref[...],          # block-structured local W
                     preferred_element_type=jnp.float32) + bheads
        aggh = masked_max(ah, c3) - bheads
        # single lane-dense packed output store: cols [reg(4) | cls | obj | pad]
        head_ref[...] = (jnp.dot(aggh.astype(_MM_DTYPE), wgh_ref[...],
                                 preferred_element_type=jnp.float32) + bhead_ref[...])

    return kernel


# ----------------------------- parameter initialization -----------------------------

def _init_linear(key, fan_in, fan_out, with_bias):
    """torch.nn.Linear-style init; weight returned transposed as [in, out]."""
    kw, kb = jax.random.split(key)
    bound = 1.0 / float(fan_in) ** 0.5
    w = jax.random.uniform(kw, (fan_in, fan_out), minval=-bound, maxval=bound,
                           dtype=jnp.float32)
    if with_bias:
        b = jax.random.uniform(kb, (1, fan_out), minval=-bound, maxval=bound,
                               dtype=jnp.float32)
    else:
        b = jnp.zeros((1, fan_out), dtype=jnp.float32)
    return w, b


def init_pointnet_head_params(key, in_channels, num_classes):
    c = in_channels
    keys = jax.random.split(key, 12)
    p = {}
    for idx in range(3):  # backbone convs (local + global, both bias-free) + BatchNorm
        wl, _ = _init_linear(keys[2 * idx], c + 2, c, with_bias=False)
        wg, _ = _init_linear(keys[2 * idx + 1], c, c, with_bias=False)
        p[f"wl{idx + 1}"] = wl
        p[f"wg{idx + 1}"] = wg
        p[f"gamma{idx + 1}"] = jnp.ones((1, c), dtype=jnp.float32)
        p[f"beta{idx + 1}"] = jnp.zeros((1, c), dtype=jnp.float32)
    p["wl_reg"], _ = _init_linear(keys[6], c + 2, c, with_bias=False)
    p["wg_reg"], p["bg_reg"] = _init_linear(keys[7], c, 4, with_bias=True)
    p["wl_cls"], _ = _init_linear(keys[8], c + 2, c, with_bias=False)
    p["wg_cls"], p["bg_cls"] = _init_linear(keys[9], c, num_classes, with_bias=True)
    p["wl_obj"], _ = _init_linear(keys[10], c + 2, c, with_bias=False)
    p["wg_obj"], p["bg_obj"] = _init_linear(keys[11], c, 1, with_bias=True)
    return p


# ----------------------------------- forward pass -----------------------------------

def pointnet_head_forward(params, x, pos, edge_index):
    n, c = x.shape
    ncls = params["wg_cls"].shape[1]
    n_pad = _round_up(max(n, _SUBLANE), _SUBLANE)
    c_pad = _round_up(c, _LANE)
    h_pad = _round_up(5 + ncls, _LANE)   # packed head slab: [reg(4) | cls(ncls) | obj(1) | pad]

    # --- glue (plain JAX): pad inputs, build the dense source-major int8 adjacency mask ---
    x_p = jnp.zeros((n_pad, c_pad), jnp.float32).at[:n, :c].set(x.astype(jnp.float32))
    pos_p = jnp.zeros((n_pad, _POS_PAD), jnp.float32).at[:n, :2].set(
        pos[:, :2].astype(jnp.float32))
    src, tgt = edge_index[0], edge_index[1]
    adj = jnp.zeros((n_pad, n_pad), jnp.int8)
    adj = adj.at[src, tgt].set(1)                       # adj[j, i] = 1 iff edge j -> i
    diag = jnp.arange(n_pad)
    adj = adj.at[diag, diag].set(1)                     # self loops (incl. padded rows)

    def pad2(a, rows, cols):
        out = jnp.zeros((rows, cols), jnp.float32)
        return out.at[:a.shape[0], :a.shape[1]].set(a)

    # split local weights into feature (Wx) / position (Wp) parts and batch same-input convs
    wx1 = pad2(params["wl1"][:c], c_pad, c_pad)
    wx23 = jnp.concatenate([pad2(params["wl2"][:c], c_pad, c_pad),
                            pad2(params["wl3"][:c], c_pad, c_pad)], axis=1)     # [Cp, 2Cp]
    wxh = jnp.zeros((2 * c_pad, 3 * c_pad), jnp.float32)                         # x2->reg, x3->cls/obj
    wxh = wxh.at[:c, 0:c].set(params["wl_reg"][:c])
    wxh = wxh.at[c_pad:c_pad + c, c_pad:c_pad + c].set(params["wl_cls"][:c])
    wxh = wxh.at[c_pad:c_pad + c, 2 * c_pad:2 * c_pad + c].set(params["wl_obj"][:c])

    wp_parts = [params["wl1"][c:], params["wl2"][c:], params["wl3"][c:],
                params["wl_reg"][c:], params["wl_cls"][c:], params["wl_obj"][c:]]
    wp_all = jnp.concatenate([pad2(w, _POS_PAD, c_pad) for w in wp_parts], axis=1)  # [8, 6Cp]

    wg1 = pad2(params["wg1"], c_pad, c_pad)
    wg23 = jnp.zeros((2 * c_pad, 2 * c_pad), jnp.float32)                        # block-diag
    wg23 = wg23.at[:c, :c].set(params["wg2"])
    wg23 = wg23.at[c_pad:c_pad + c, c_pad:c_pad + c].set(params["wg3"])
    wgh = jnp.zeros((3 * c_pad, h_pad), jnp.float32)                             # packed head W
    wgh = wgh.at[:c, 0:4].set(params["wg_reg"])
    wgh = wgh.at[c_pad:c_pad + c, 4:4 + ncls].set(params["wg_cls"])
    wgh = wgh.at[2 * c_pad:2 * c_pad + c, 4 + ncls:5 + ncls].set(params["wg_obj"])

    gam = jnp.concatenate([pad2(params[f"gamma{i}"], 1, c_pad) for i in (1, 2, 3)], axis=1)
    bet = jnp.concatenate([pad2(params[f"beta{i}"], 1, c_pad) for i in (1, 2, 3)], axis=1)
    bhead = jnp.zeros((1, h_pad), jnp.float32)
    bhead = bhead.at[:, 0:4].set(params["bg_reg"])
    bhead = bhead.at[:, 4:4 + ncls].set(params["bg_cls"])
    bhead = bhead.at[:, 4 + ncls:5 + ncls].set(params["bg_obj"])

    # MXU operands in bf16 (f32 accumulation in-kernel); mask / BN / bias math stays f32
    wx1, wx23, wxh, wp_all = (w.astype(_MM_DTYPE) for w in (wx1, wx23, wxh, wp_all))
    wg1, wg23, wgh = (w.astype(_MM_DTYPE) for w in (wg1, wg23, wgh))

    inputs = (x_p, pos_p, adj, wx1, wx23, wxh, wp_all, wg1, wg23, wgh, gam, bet, bhead)
    kernel = _make_fused_head_kernel(n, n_pad, c_pad)
    vmem = pl.BlockSpec(memory_space=pltpu.MemorySpace.VMEM)

    # honest cost estimate: the masked max (add+max over all source/target pairs) dominates
    mm_flops = 2 * n_pad * (_POS_PAD * 6 * c_pad
                            + c_pad * c_pad + c_pad * 2 * c_pad + 2 * c_pad * 3 * c_pad
                            + c_pad * c_pad + 2 * c_pad * 2 * c_pad + 3 * c_pad * h_pad)
    mask_flops = 2 * n_pad * n_pad * 6 * c_pad
    bytes_accessed = (sum(int(a.size) * a.dtype.itemsize for a in inputs)
                      + n_pad * h_pad * 4)

    head = pl.pallas_call(
        kernel,
        out_shape=jax.ShapeDtypeStruct((n_pad, h_pad), jnp.float32),
        in_specs=[vmem] * len(inputs),
        out_specs=vmem,
        scratch_shapes=[pltpu.VMEM((n_pad, n_pad), jnp.float32),        # additive mask
                        pltpu.VMEM((n_pad, 3 * c_pad), jnp.float32)],   # per-pass message staging
        compiler_params=pltpu.CompilerParams(vmem_limit_bytes=_vmem_limit_bytes()),
        cost_estimate=pl.CostEstimate(flops=int(mm_flops + mask_flops),
                                      transcendentals=int(3 * c_pad),
                                      bytes_accessed=int(bytes_accessed)),
    )(*inputs)

    cls = head[:n, 4:4 + ncls]
    reg = head[:n, 0:4]
    obj = head[:n, 4 + ncls:5 + ncls]
    return cls, reg, obj


# TODO(synk): BatchNorm running-statistics update (training-time side effect) is not tracked;
# forward uses batch statistics, matching torch BatchNorm1d in train() mode.

if __name__ == "__main__":
    key = jax.random.PRNGKey(0)
    k_x, k_pos, k_src, k_tgt, k_params = jax.random.split(key, 5)

    in_channels = 32       # small stand-in for 64
    num_classes = 16       # small stand-in for 101
    num_nodes = 16
    num_edges = 48

    x = jax.random.normal(k_x, (num_nodes, in_channels), dtype=jnp.float32)
    pos = jax.random.normal(k_pos, (num_nodes, 3), dtype=jnp.float32)
    src = jax.random.randint(k_src, (num_edges,), 0, num_nodes)
    tgt = jax.random.randint(k_tgt, (num_edges,), 0, num_nodes)
    edge_index = jnp.stack([src, tgt], axis=0)

    params = init_pointnet_head_params(k_params, in_channels, num_classes)

    cls, reg, obj = pointnet_head_forward(params, x, pos, edge_index)
    jax.block_until_ready((cls, reg, obj))

    assert cls.shape == (num_nodes, num_classes)
    assert reg.shape == (num_nodes, 4)
    assert obj.shape == (num_nodes, 1)
    assert jnp.all(jnp.isfinite(cls)) and jnp.all(jnp.isfinite(reg)) and jnp.all(jnp.isfinite(obj))

    print("KERNEL_OK")
</pallas_src>

<mosaic_0001>
module attributes {stable_mosaic.version = 11 : i64} {
  func.func @kernel(%arg0: memref<16x128xf32, #tpu.memory_space<vmem>>, %arg1: memref<16x8xf32, #tpu.memory_space<vmem>>, %arg2: memref<16x16xi8, #tpu.memory_space<vmem>>, %arg3: memref<128x128xbf16, #tpu.memory_space<vmem>>, %arg4: memref<128x256xbf16, #tpu.memory_space<vmem>>, %arg5: memref<256x384xbf16, #tpu.memory_space<vmem>>, %arg6: memref<8x768xbf16, #tpu.memory_space<vmem>>, %arg7: memref<128x128xbf16, #tpu.memory_space<vmem>>, %arg8: memref<256x256xbf16, #tpu.memory_space<vmem>>, %arg9: memref<384x128xbf16, #tpu.memory_space<vmem>>, %arg10: memref<1x384xf32, #tpu.memory_space<vmem>>, %arg11: memref<1x384xf32, #tpu.memory_space<vmem>>, %arg12: memref<1x128xf32, #tpu.memory_space<vmem>>, %arg13: memref<16x128xf32, #tpu.memory_space<vmem>>, %arg14: memref<16x16xf32, #tpu.memory_space<vmem>>, %arg15: memref<16x384xf32, #tpu.memory_space<vmem>>) attributes {dimension_semantics = [], scalar_prefetch = 0 : i64, scratch_operands = 2 : i64, tpu.core_type = #tpu.core_type<tc>} {
    %c0 = arith.constant 0 : index
    %c0_0 = arith.constant 0 : index
    %0 = vector.load %arg2[%c0, %c0_0] : memref<16x16xi8, #tpu.memory_space<vmem>>, vector<16x16xi8>
    %1 = arith.sitofp %0 : vector<16x16xi8> to vector<16x16xf32>
    %cst = arith.constant 1.000000e+00 : f32
    %2 = vector.broadcast %cst : f32 to vector<16x16xf32>
    %3 = arith.subf %1, %2 : vector<16x16xf32>
    %cst_1 = arith.constant 1.000000e+30 : f32
    %4 = vector.broadcast %cst_1 : f32 to vector<16x16xf32>
    %5 = arith.mulf %3, %4 : vector<16x16xf32>
    %c0_2 = arith.constant 0 : index
    %c0_3 = arith.constant 0 : index
    %6 = vector.load %arg14[%c0_2, %c0_3] : memref<16x16xf32, #tpu.memory_space<vmem>>, vector<16x16xf32>
    tpu.vector_store %arg14[%c0_2, %c0_3], %5 {strides = array<i32>} : memref<16x16xf32, #tpu.memory_space<vmem>>, vector<16x16xf32>,
    %c0_4 = arith.constant 0 : index
    %c0_5 = arith.constant 0 : index
    %7 = vector.load %arg1[%c0_4, %c0_5] : memref<16x8xf32, #tpu.memory_space<vmem>>, vector<16x8xf32>
    %8 = arith.truncf %7 : vector<16x8xf32> to vector<16x8xbf16>
    %c0_6 = arith.constant 0 : index
    %c0_7 = arith.constant 0 : index
    %9 = vector.load %arg6[%c0_6, %c0_7] : memref<8x768xbf16, #tpu.memory_space<vmem>>, vector<8x768xbf16>
    %cst_8 = arith.constant dense<0.000000e+00> : vector<16x768xf32>
    %10 = tpu.matmul %8, %9, %cst_8 {dimension_numbers = #tpu.dot_dimension_numbers<[1], [0], [0], [1], [0, 0, 1, 1], [], []>} : vector<16x8xbf16>, vector<8x768xbf16>, vector<16x768xf32> -> vector<16x768xf32>
    %11 = tpu.iota {dimensions = array<i32: 0>} : vector<16x1xi32>
    %c16_i32 = arith.constant 16 : i32
    %12 = vector.broadcast %c16_i32 : i32 to vector<16x1xi32>
    %13 = arith.cmpi slt, %11, %12 : vector<16x1xi32>
    %14 = arith.extui %13 : vector<16x1xi1> to vector<16x1xi32>
    %15 = arith.sitofp %14 : vector<16x1xi32> to vector<16x1xf32>
    %16 = vector.extract_strided_slice %10 {offsets = [0, 0], sizes = [16, 128], strides = [1, 1]} : vector<16x768xf32> to vector<16x128xf32>
    %c0_9 = arith.constant 0 : index
    %c0_10 = arith.constant 0 : index
    %17 = vector.load %arg0[%c0_9, %c0_10] : memref<16x128xf32, #tpu.memory_space<vmem>>, vector<16x128xf32>
    %18 = arith.truncf %17 : vector<16x128xf32> to vector<16x128xbf16>
    %c0_11 = arith.constant 0 : index
    %c0_12 = arith.constant 0 : index
    %19 = vector.load %arg3[%c0_11, %c0_12] : memref<128x128xbf16, #tpu.memory_space<vmem>>, vector<128x128xbf16>
    %cst_13 = arith.constant dense<0.000000e+00> : vector<16x128xf32>
    %20 = tpu.matmul %18, %19, %cst_13 {dimension_numbers = #tpu.dot_dimension_numbers<[1], [0], [0], [1], [0, 0, 1, 1], [], []>} : vector<16x128xbf16>, vector<128x128xbf16>, vector<16x128xf32> -> vector<16x128xf32>
    %21 = arith.addf %20, %16 : vector<16x128xf32>
    %c0_14 = arith.constant 0 : index
    %c0_15 = arith.constant 0 : index
    %22 = vector.load %arg15[%c0_14, %c0_15] : memref<16x384xf32, #tpu.memory_space<vmem>>, vector<16x128xf32>
    tpu.vector_store %arg15[%c0_14, %c0_15], %21 {strides = array<i32>} : memref<16x384xf32, #tpu.memory_space<vmem>>, vector<16x128xf32>,
    %cst_16 = arith.constant -1.000000e+30 : f32
    %23 = vector.broadcast %cst_16 : f32 to vector<16x128xf32>
    %c0_i32 = arith.constant 0 : i32
    %c8_i32 = arith.constant 8 : i32
    %24 = arith.muli %c0_i32, %c8_i32 : i32
    %25 = tpu.assume_multiple %24, 8 : i32
    %26 = arith.index_cast %25 : i32 to index
    %c0_17 = arith.constant 0 : index
    %27 = vector.load %arg15[%26, %c0_17] : memref<16x384xf32, #tpu.memory_space<vmem>>, vector<8x128xf32>
    %28 = arith.index_cast %25 : i32 to index
    %c0_18 = arith.constant 0 : index
    %29 = vector.load %arg14[%28, %c0_18] : memref<16x16xf32, #tpu.memory_space<vmem>>, vector<8x16xf32>
    %30 = vector.shape_cast %29 : vector<8x16xf32> to vector<8x16x1xf32>
    %31 = vector.extract_strided_slice %30 {offsets = [0, 0, 0], sizes = [1, 16, 1], strides = [1, 1, 1]} : vector<8x16x1xf32> to vector<1x16x1xf32>
    %32 = vector.shape_cast %31 : vector<1x16x1xf32> to vector<16x1xf32>
    %33 = vector.extract_strided_slice %27 {offsets = [0, 0], sizes = [1, 128], strides = [1, 1]} : vector<8x128xf32> to vector<1x128xf32>
    %34 = vector.broadcast %32 : vector<16x1xf32> to vector<16x128xf32>
    %35 = vector.broadcast %33 : vector<1x128xf32> to vector<16x128xf32>
    %36 = arith.addf %34, %35 : vector<16x128xf32>
    %37 = arith.maximumf %23, %36 : vector<16x128xf32>
    %38 = vector.extract_strided_slice %30 {offsets = [1, 0, 0], sizes = [1, 16, 1], strides = [1, 1, 1]} : vector<8x16x1xf32> to vector<1x16x1xf32>
    %39 = vector.shape_cast %38 : vector<1x16x1xf32> to vector<16x1xf32>
    %40 = vector.extract_strided_slice %27 {offsets = [1, 0], sizes = [1, 128], strides = [1, 1]} : vector<8x128xf32> to vector<1x128xf32>
    %41 = vector.broadcast %39 : vector<16x1xf32> to vector<16x128xf32>
    %42 = vector.broadcast %40 : vector<1x128xf32> to vector<16x128xf32>
    %43 = arith.addf %41, %42 : vector<16x128xf32>
    %44 = arith.maximumf %37, %43 : vector<16x128xf32>
    %45 = vector.extract_strided_slice %30 {offsets = [2, 0, 0], sizes = [1, 16, 1], strides = [1, 1, 1]} : vector<8x16x1xf32> to vector<1x16x1xf32>
    %46 = vector.shape_cast %45 : vector<1x16x1xf32> to vector<16x1xf32>
    %47 = vector.extract_strided_slice %27 {offsets = [2, 0], sizes = [1, 128], strides = [1, 1]} : vector<8x128xf32> to vector<1x128xf32>
    %48 = vector.broadcast %46 : vector<16x1xf32> to vector<16x128xf32>
    %49 = vector.broadcast %47 : vector<1x128xf32> to vector<16x128xf32>
    %50 = arith.addf %48, %49 : vector<16x128xf32>
    %51 = arith.maximumf %44, %50 : vector<16x128xf32>
    %52 = vector.extract_strided_slice %30 {offsets = [3, 0, 0], sizes = [1, 16, 1], strides = [1, 1, 1]} : vector<8x16x1xf32> to vector<1x16x1xf32>
    %53 = vector.shape_cast %52 : vector<1x16x1xf32> to vector<16x1xf32>
    %54 = vector.extract_strided_slice %27 {offsets = [3, 0], sizes = [1, 128], strides = [1, 1]} : vector<8x128xf32> to vector<1x128xf32>
    %55 = vector.broadcast %53 : vector<16x1xf32> to vector<16x128xf32>
    %56 = vector.broadcast %54 : vector<1x128xf32> to vector<16x128xf32>
    %57 = arith.addf %55, %56 : vector<16x128xf32>
    %58 = arith.maximumf %51, %57 : vector<16x128xf32>
    %59 = vector.extract_strided_slice %30 {offsets = [4, 0, 0], sizes = [1, 16, 1], strides = [1, 1, 1]} : vector<8x16x1xf32> to vector<1x16x1xf32>
    %60 = vector.shape_cast %59 : vector<1x16x1xf32> to vector<16x1xf32>
    %61 = vector.extract_strided_slice %27 {offsets = [4, 0], sizes = [1, 128], strides = [1, 1]} : vector<8x128xf32> to vector<1x128xf32>
    %62 = vector.broadcast %60 : vector<16x1xf32> to vector<16x128xf32>
    %63 = vector.broadcast %61 : vector<1x128xf32> to vector<16x128xf32>
    %64 = arith.addf %62, %63 : vector<16x128xf32>
    %65 = arith.maximumf %58, %64 : vector<16x128xf32>
    %66 = vector.extract_strided_slice %30 {offsets = [5, 0, 0], sizes = [1, 16, 1], strides = [1, 1, 1]} : vector<8x16x1xf32> to vector<1x16x1xf32>
    %67 = vector.shape_cast %66 : vector<1x16x1xf32> to vector<16x1xf32>
    %68 = vector.extract_strided_slice %27 {offsets = [5, 0], sizes = [1, 128], strides = [1, 1]} : vector<8x128xf32> to vector<1x128xf32>
    %69 = vector.broadcast %67 : vector<16x1xf32> to vector<16x128xf32>
    %70 = vector.broadcast %68 : vector<1x128xf32> to vector<16x128xf32>
    %71 = arith.addf %69, %70 : vector<16x128xf32>
    %72 = arith.maximumf %65, %71 : vector<16x128xf32>
    %73 = vector.extract_strided_slice %30 {offsets = [6, 0, 0], sizes = [1, 16, 1], strides = [1, 1, 1]} : vector<8x16x1xf32> to vector<1x16x1xf32>
    %74 = vector.shape_cast %73 : vector<1x16x1xf32> to vector<16x1xf32>
    %75 = vector.extract_strided_slice %27 {offsets = [6, 0], sizes = [1, 128], strides = [1, 1]} : vector<8x128xf32> to vector<1x128xf32>
    %76 = vector.broadcast %74 : vector<16x1xf32> to vector<16x128xf32>
    %77 = vector.broadcast %75 : vector<1x128xf32> to vector<16x128xf32>
    %78 = arith.addf %76, %77 : vector<16x128xf32>
    %79 = arith.maximumf %72, %78 : vector<16x128xf32>
    %80 = vector.extract_strided_slice %30 {offsets = [7, 0, 0], sizes = [1, 16, 1], strides = [1, 1, 1]} : vector<8x16x1xf32> to vector<1x16x1xf32>
    %81 = vector.shape_cast %80 : vector<1x16x1xf32> to vector<16x1xf32>
    %82 = vector.extract_strided_slice %27 {offsets = [7, 0], sizes = [1, 128], strides = [1, 1]} : vector<8x128xf32> to vector<1x128xf32>
    %83 = vector.broadcast %81 : vector<16x1xf32> to vector<16x128xf32>
    %84 = vector.broadcast %82 : vector<1x128xf32> to vector<16x128xf32>
    %85 = arith.addf %83, %84 : vector<16x128xf32>
    %86 = arith.maximumf %79, %85 : vector<16x128xf32>
    %c1_i32 = arith.constant 1 : i32
    %c8_i32_19 = arith.constant 8 : i32
    %87 = arith.muli %c1_i32, %c8_i32_19 : i32
    %88 = tpu.assume_multiple %87, 8 : i32
    %89 = arith.index_cast %88 : i32 to index
    %c0_20 = arith.constant 0 : index
    %90 = vector.load %arg15[%89, %c0_20] : memref<16x384xf32, #tpu.memory_space<vmem>>, vector<8x128xf32>
    %91 = arith.index_cast %88 : i32 to index
    %c0_21 = arith.constant 0 : index
    %92 = vector.load %arg14[%91, %c0_21] : memref<16x16xf32, #tpu.memory_space<vmem>>, vector<8x16xf32>
    %93 = vector.shape_cast %92 : vector<8x16xf32> to vector<8x16x1xf32>
    %94 = vector.extract_strided_slice %93 {offsets = [0, 0, 0], sizes = [1, 16, 1], strides = [1, 1, 1]} : vector<8x16x1xf32> to vector<1x16x1xf32>
    %95 = vector.shape_cast %94 : vector<1x16x1xf32> to vector<16x1xf32>
    %96 = vector.extract_strided_slice %90 {offsets = [0, 0], sizes = [1, 128], strides = [1, 1]} : vector<8x128xf32> to vector<1x128xf32>
    %97 = vector.broadcast %95 : vector<16x1xf32> to vector<16x128xf32>
    %98 = vector.broadcast %96 : vector<1x128xf32> to vector<16x128xf32>
    %99 = arith.addf %97, %98 : vector<16x128xf32>
    %100 = arith.maximumf %86, %99 : vector<16x128xf32>
    %101 = vector.extract_strided_slice %93 {offsets = [1, 0, 0], sizes = [1, 16, 1], strides = [1, 1, 1]} : vector<8x16x1xf32> to vector<1x16x1xf32>
    %102 = vector.shape_cast %101 : vector<1x16x1xf32> to vector<16x1xf32>
    %103 = vector.extract_strided_slice %90 {offsets = [1, 0], sizes = [1, 128], strides = [1, 1]} : vector<8x128xf32> to vector<1x128xf32>
    %104 = vector.broadcast %102 : vector<16x1xf32> to vector<16x128xf32>
    %105 = vector.broadcast %103 : vector<1x128xf32> to vector<16x128xf32>
    %106 = arith.addf %104, %105 : vector<16x128xf32>
    %107 = arith.maximumf %100, %106 : vector<16x128xf32>
    %108 = vector.extract_strided_slice %93 {offsets = [2, 0, 0], sizes = [1, 16, 1], strides = [1, 1, 1]} : vector<8x16x1xf32> to vector<1x16x1xf32>
    %109 = vector.shape_cast %108 : vector<1x16x1xf32> to vector<16x1xf32>
    %110 = vector.extract_strided_slice %90 {offsets = [2, 0], sizes = [1, 128], strides = [1, 1]} : vector<8x128xf32> to vector<1x128xf32>
    %111 = vector.broadcast %109 : vector<16x1xf32> to vector<16x128xf32>
    %112 = vector.broadcast %110 : vector<1x128xf32> to vector<16x128xf32>
    %113 = arith.addf %111, %112 : vector<16x128xf32>
    %114 = arith.maximumf %107, %113 : vector<16x128xf32>
    %115 = vector.extract_strided_slice %93 {offsets = [3, 0, 0], sizes = [1, 16, 1], strides = [1, 1, 1]} : vector<8x16x1xf32> to vector<1x16x1xf32>
    %116 = vector.shape_cast %115 : vector<1x16x1xf32> to vector<16x1xf32>
    %117 = vector.extract_strided_slice %90 {offsets = [3, 0], sizes = [1, 128], strides = [1, 1]} : vector<8x128xf32> to vector<1x128xf32>
    %118 = vector.broadcast %116 : vector<16x1xf32> to vector<16x128xf32>
    %119 = vector.broadcast %117 : vector<1x128xf32> to vector<16x128xf32>
    %120 = arith.addf %118, %119 : vector<16x128xf32>
    %121 = arith.maximumf %114, %120 : vector<16x128xf32>
    %122 = vector.extract_strided_slice %93 {offsets = [4, 0, 0], sizes = [1, 16, 1], strides = [1, 1, 1]} : vector<8x16x1xf32> to vector<1x16x1xf32>
    %123 = vector.shape_cast %122 : vector<1x16x1xf32> to vector<16x1xf32>
    %124 = vector.extract_strided_slice %90 {offsets = [4, 0], sizes = [1, 128], strides = [1, 1]} : vector<8x128xf32> to vector<1x128xf32>
    %125 = vector.broadcast %123 : vector<16x1xf32> to vector<16x128xf32>
    %126 = vector.broadcast %124 : vector<1x128xf32> to vector<16x128xf32>
    %127 = arith.addf %125, %126 : vector<16x128xf32>
    %128 = arith.maximumf %121, %127 : vector<16x128xf32>
    %129 = vector.extract_strided_slice %93 {offsets = [5, 0, 0], sizes = [1, 16, 1], strides = [1, 1, 1]} : vector<8x16x1xf32> to vector<1x16x1xf32>
    %130 = vector.shape_cast %129 : vector<1x16x1xf32> to vector<16x1xf32>
    %131 = vector.extract_strided_slice %90 {offsets = [5, 0], sizes = [1, 128], strides = [1, 1]} : vector<8x128xf32> to vector<1x128xf32>
    %132 = vector.broadcast %130 : vector<16x1xf32> to vector<16x128xf32>
    %133 = vector.broadcast %131 : vector<1x128xf32> to vector<16x128xf32>
    %134 = arith.addf %132, %133 : vector<16x128xf32>
    %135 = arith.maximumf %128, %134 : vector<16x128xf32>
    %136 = vector.extract_strided_slice %93 {offsets = [6, 0, 0], sizes = [1, 16, 1], strides = [1, 1, 1]} : vector<8x16x1xf32> to vector<1x16x1xf32>
    %137 = vector.shape_cast %136 : vector<1x16x1xf32> to vector<16x1xf32>
    %138 = vector.extract_strided_slice %90 {offsets = [6, 0], sizes = [1, 128], strides = [1, 1]} : vector<8x128xf32> to vector<1x128xf32>
    %139 = vector.broadcast %137 : vector<16x1xf32> to vector<16x128xf32>
    %140 = vector.broadcast %138 : vector<1x128xf32> to vector<16x128xf32>
    %141 = arith.addf %139, %140 : vector<16x128xf32>
    %142 = arith.maximumf %135, %141 : vector<16x128xf32>
    %143 = vector.extract_strided_slice %93 {offsets = [7, 0, 0], sizes = [1, 16, 1], strides = [1, 1, 1]} : vector<8x16x1xf32> to vector<1x16x1xf32>
    %144 = vector.shape_cast %143 : vector<1x16x1xf32> to vector<16x1xf32>
    %145 = vector.extract_strided_slice %90 {offsets = [7, 0], sizes = [1, 128], strides = [1, 1]} : vector<8x128xf32> to vector<1x128xf32>
    %146 = vector.broadcast %144 : vector<16x1xf32> to vector<16x128xf32>
    %147 = vector.broadcast %145 : vector<1x128xf32> to vector<16x128xf32>
    %148 = arith.addf %146, %147 : vector<16x128xf32>
    %149 = arith.maximumf %142, %148 : vector<16x128xf32>
    %c2_i32 = arith.constant 2 : i32
    %150 = arith.subf %149, %16 : vector<16x128xf32>
    %151 = arith.truncf %150 : vector<16x128xf32> to vector<16x128xbf16>
    %c0_22 = arith.constant 0 : index
    %c0_23 = arith.constant 0 : index
    %152 = vector.load %arg7[%c0_22, %c0_23] : memref<128x128xbf16, #tpu.memory_space<vmem>>, vector<128x128xbf16>
    %cst_24 = arith.constant dense<0.000000e+00> : vector<16x128xf32>
    %153 = tpu.matmul %151, %152, %cst_24 {dimension_numbers = #tpu.dot_dimension_numbers<[1], [0], [0], [1], [0, 0, 1, 1], [], []>} : vector<16x128xbf16>, vector<128x128xbf16>, vector<16x128xf32> -> vector<16x128xf32>
    %c0_25 = arith.constant 0 : index
    %c0_26 = arith.constant 0 : index
    %154 = vector.load %arg10[%c0_25, %c0_26] : memref<1x384xf32, #tpu.memory_space<vmem>>, vector<1x128xf32>
    %c0_27 = arith.constant 0 : index
    %c0_28 = arith.constant 0 : index
    %155 = vector.load %arg11[%c0_27, %c0_28] : memref<1x384xf32, #tpu.memory_space<vmem>>, vector<1x128xf32>
    %156 = vector.broadcast %15 : vector<16x1xf32> to vector<16x128xf32>
    %157 = arith.mulf %153, %156 : vector<16x128xf32>
    %cst_29 = arith.constant dense<0.000000e+00> : vector<128xf32>
    %158 = vector.multi_reduction <add>, %157, %cst_29 [0] : vector<16x128xf32> to vector<128xf32>
    %159 = vector.shape_cast %158 : vector<128xf32> to vector<1x128xf32>
    %cst_30 = arith.constant 6.250000e-02 : f32
    %160 = vector.broadcast %cst_30 : f32 to vector<1x128xf32>
    %161 = arith.mulf %159, %160 : vector<1x128xf32>
    %162 = vector.broadcast %161 : vector<1x128xf32> to vector<16x128xf32>
    %163 = arith.subf %153, %162 : vector<16x128xf32>
    %164 = vector.broadcast %15 : vector<16x1xf32> to vector<16x128xf32>
    %165 = arith.mulf %163, %164 : vector<16x128xf32>
    %166 = arith.mulf %165, %165 : vector<16x128xf32>
    %cst_31 = arith.constant dense<0.000000e+00> : vector<128xf32>
    %167 = vector.multi_reduction <add>, %166, %cst_31 [0] : vector<16x128xf32> to vector<128xf32>
    %168 = vector.shape_cast %167 : vector<128xf32> to vector<1x128xf32>
    %cst_32 = arith.constant 6.250000e-02 : f32
    %169 = vector.broadcast %cst_32 : f32 to vector<1x128xf32>
    %170 = arith.mulf %168, %169 : vector<1x128xf32>
    %171 = vector.broadcast %161 : vector<1x128xf32> to vector<16x128xf32>
    %172 = arith.subf %153, %171 : vector<16x128xf32>
    %cst_33 = arith.constant 9.99999974E-6 : f32
    %173 = vector.broadcast %cst_33 : f32 to vector<1x128xf32>
    %174 = arith.addf %170, %173 : vector<1x128xf32>
    %175 = math.rsqrt %174 : vector<1x128xf32>
    %176 = vector.broadcast %175 : vector<1x128xf32> to vector<16x128xf32>
    %177 = arith.mulf %172, %176 : vector<16x128xf32>
    %178 = vector.broadcast %154 : vector<1x128xf32> to vector<16x128xf32>
    %179 = arith.mulf %177, %178 : vector<16x128xf32>
    %180 = vector.broadcast %155 : vector<1x128xf32> to vector<16x128xf32>
    %181 = arith.addf %179, %180 : vector<16x128xf32>
    %cst_34 = arith.constant 0.000000e+00 : f32
    %182 = vector.broadcast %cst_34 : f32 to vector<16x128xf32>
    %183 = arith.maximumf %181, %182 : vector<16x128xf32>
    %184 = vector.extract_strided_slice %10 {offsets = [0, 128], sizes = [16, 256], strides = [1, 1]} : vector<16x768xf32> to vector<16x256xf32>
    %185 = arith.truncf %183 : vector<16x128xf32> to vector<16x128xbf16>
    %c0_35 = arith.constant 0 : index
    %c0_36 = arith.constant 0 : index
    %186 = vector.load %arg4[%c0_35, %c0_36] : memref<128x256xbf16, #tpu.memory_space<vmem>>, vector<128x256xbf16>
    %cst_37 = arith.constant dense<0.000000e+00> : vector<16x256xf32>
    %187 = tpu.matmul %185, %186, %cst_37 {dimension_numbers = #tpu.dot_dimension_numbers<[1], [0], [0], [1], [0, 0, 1, 1], [], []>} : vector<16x128xbf16>, vector<128x256xbf16>, vector<16x256xf32> -> vector<16x256xf32>
    %188 = arith.addf %187, %184 : vector<16x256xf32>
    %c0_38 = arith.constant 0 : index
    %c0_39 = arith.constant 0 : index
    %189 = vector.load %arg15[%c0_38, %c0_39] : memref<16x384xf32, #tpu.memory_space<vmem>>, vector<16x256xf32>
    tpu.vector_store %arg15[%c0_38, %c0_39], %188 {strides = array<i32>} : memref<16x384xf32, #tpu.memory_space<vmem>>, vector<16x256xf32>,
    %cst_40 = arith.constant -1.000000e+30 : f32
    %190 = vector.broadcast %cst_40 : f32 to vector<16x256xf32>
    %c0_i32_41 = arith.constant 0 : i32
    %c8_i32_42 = arith.constant 8 : i32
    %191 = arith.muli %c0_i32_41, %c8_i32_42 : i32
    %192 = tpu.assume_multiple %191, 8 : i32
    %193 = arith.index_cast %192 : i32 to index
    %c0_43 = arith.constant 0 : index
    %194 = vector.load %arg15[%193, %c0_43] : memref<16x384xf32, #tpu.memory_space<vmem>>, vector<8x256xf32>
    %195 = arith.index_cast %192 : i32 to index
    %c0_44 = arith.constant 0 : index
    %196 = vector.load %arg14[%195, %c0_44] : memref<16x16xf32, #tpu.memory_space<vmem>>, vector<8x16xf32>
    %197 = vector.shape_cast %196 : vector<8x16xf32> to vector<8x16x1xf32>
    %198 = vector.extract_strided_slice %197 {offsets = [0, 0, 0], sizes = [1, 16, 1], strides = [1, 1, 1]} : vector<8x16x1xf32> to vector<1x16x1xf32>
    %199 = vector.shape_cast %198 : vector<1x16x1xf32> to vector<16x1xf32>
    %200 = vector.extract_strided_slice %194 {offsets = [0, 0], sizes = [1, 256], strides = [1, 1]} : vector<8x256xf32> to vector<1x256xf32>
    %201 = vector.broadcast %199 : vector<16x1xf32> to vector<16x256xf32>
    %202 = vector.broadcast %200 : vector<1x256xf32> to vector<16x256xf32>
    %203 = arith.addf %201, %202 : vector<16x256xf32>
    %204 = arith.maximumf %190, %203 : vector<16x256xf32>
    %205 = vector.extract_strided_slice %197 {offsets = [1, 0, 0], sizes = [1, 16, 1], strides = [1, 1, 1]} : vector<8x16x1xf32> to vector<1x16x1xf32>
    %206 = vector.shape_cast %205 : vector<1x16x1xf32> to vector<16x1xf32>
    %207 = vector.extract_strided_slice %194 {offsets = [1, 0], sizes = [1, 256], strides = [1, 1]} : vector<8x256xf32> to vector<1x256xf32>
    %208 = vector.broadcast %206 : vector<16x1xf32> to vector<16x256xf32>
    %209 = vector.broadcast %207 : vector<1x256xf32> to vector<16x256xf32>
    %210 = arith.addf %208, %209 : vector<16x256xf32>
    %211 = arith.maximumf %204, %210 : vector<16x256xf32>
    %212 = vector.extract_strided_slice %197 {offsets = [2, 0, 0], sizes = [1, 16, 1], strides = [1, 1, 1]} : vector<8x16x1xf32> to vector<1x16x1xf32>
    %213 = vector.shape_cast %212 : vector<1x16x1xf32> to vector<16x1xf32>
    %214 = vector.extract_strided_slice %194 {offsets = [2, 0], sizes = [1, 256], strides = [1, 1]} : vector<8x256xf32> to vector<1x256xf32>
    %215 = vector.broadcast %213 : vector<16x1xf32> to vector<16x256xf32>
    %216 = vector.broadcast %214 : vector<1x256xf32> to vector<16x256xf32>
    %217 = arith.addf %215, %216 : vector<16x256xf32>
    %218 = arith.maximumf %211, %217 : vector<16x256xf32>
    %219 = vector.extract_strided_slice %197 {offsets = [3, 0, 0], sizes = [1, 16, 1], strides = [1, 1, 1]} : vector<8x16x1xf32> to vector<1x16x1xf32>
    %220 = vector.shape_cast %219 : vector<1x16x1xf32> to vector<16x1xf32>
    %221 = vector.extract_strided_slice %194 {offsets = [3, 0], sizes = [1, 256], strides = [1, 1]} : vector<8x256xf32> to vector<1x256xf32>
    %222 = vector.broadcast %220 : vector<16x1xf32> to vector<16x256xf32>
    %223 = vector.broadcast %221 : vector<1x256xf32> to vector<16x256xf32>
    %224 = arith.addf %222, %223 : vector<16x256xf32>
    %225 = arith.maximumf %218, %224 : vector<16x256xf32>
    %226 = vector.extract_strided_slice %197 {offsets = [4, 0, 0], sizes = [1, 16, 1], strides = [1, 1, 1]} : vector<8x16x1xf32> to vector<1x16x1xf32>
    %227 = vector.shape_cast %226 : vector<1x16x1xf32> to vector<16x1xf32>
    %228 = vector.extract_strided_slice %194 {offsets = [4, 0], sizes = [1, 256], strides = [1, 1]} : vector<8x256xf32> to vector<1x256xf32>
    %229 = vector.broadcast %227 : vector<16x1xf32> to vector<16x256xf32>
    %230 = vector.broadcast %228 : vector<1x256xf32> to vector<16x256xf32>
    %231 = arith.addf %229, %230 : vector<16x256xf32>
    %232 = arith.maximumf %225, %231 : vector<16x256xf32>
    %233 = vector.extract_strided_slice %197 {offsets = [5, 0, 0], sizes = [1, 16, 1], strides = [1, 1, 1]} : vector<8x16x1xf32> to vector<1x16x1xf32>
    %234 = vector.shape_cast %233 : vector<1x16x1xf32> to vector<16x1xf32>
    %235 = vector.extract_strided_slice %194 {offsets = [5, 0], sizes = [1, 256], strides = [1, 1]} : vector<8x256xf32> to vector<1x256xf32>
    %236 = vector.broadcast %234 : vector<16x1xf32> to vector<16x256xf32>
    %237 = vector.broadcast %235 : vector<1x256xf32> to vector<16x256xf32>
    %238 = arith.addf %236, %237 : vector<16x256xf32>
    %239 = arith.maximumf %232, %238 : vector<16x256xf32>
    %240 = vector.extract_strided_slice %197 {offsets = [6, 0, 0], sizes = [1, 16, 1], strides = [1, 1, 1]} : vector<8x16x1xf32> to vector<1x16x1xf32>
    %241 = vector.shape_cast %240 : vector<1x16x1xf32> to vector<16x1xf32>
    %242 = vector.extract_strided_slice %194 {offsets = [6, 0], sizes = [1, 256], strides = [1, 1]} : vector<8x256xf32> to vector<1x256xf32>
    %243 = vector.broadcast %241 : vector<16x1xf32> to vector<16x256xf32>
    %244 = vector.broadcast %242 : vector<1x256xf32> to vector<16x256xf32>
    %245 = arith.addf %243, %244 : vector<16x256xf32>
    %246 = arith.maximumf %239, %245 : vector<16x256xf32>
    %247 = vector.extract_strided_slice %197 {offsets = [7, 0, 0], sizes = [1, 16, 1], strides = [1, 1, 1]} : vector<8x16x1xf32> to vector<1x16x1xf32>
    %248 = vector.shape_cast %247 : vector<1x16x1xf32> to vector<16x1xf32>
    %249 = vector.extract_strided_slice %194 {offsets = [7, 0], sizes = [1, 256], strides = [1, 1]} : vector<8x256xf32> to vector<1x256xf32>
    %250 = vector.broadcast %248 : vector<16x1xf32> to vector<16x256xf32>
    %251 = vector.broadcast %249 : vector<1x256xf32> to vector<16x256xf32>
    %252 = arith.addf %250, %251 : vector<16x256xf32>
    %253 = arith.maximumf %246, %252 : vector<16x256xf32>
    %c1_i32_45 = arith.constant 1 : i32
    %c8_i32_46 = arith.constant 8 : i32
    %254 = arith.muli %c1_i32_45, %c8_i32_46 : i32
    %255 = tpu.assume_multiple %254, 8 : i32
    %256 = arith.index_cast %255 : i32 to index
    %c0_47 = arith.constant 0 : index
    %257 = vector.load %arg15[%256, %c0_47] : memref<16x384xf32, #tpu.memory_space<vmem>>, vector<8x256xf32>
    %258 = arith.index_cast %255 : i32 to index
    %c0_48 = arith.constant 0 : index
    %259 = vector.load %arg14[%258, %c0_48] : memref<16x16xf32, #tpu.memory_space<vmem>>, vector<8x16xf32>
    %260 = vector.shape_cast %259 : vector<8x16xf32> to vector<8x16x1xf32>
    %261 = vector.extract_strided_slice %260 {offsets = [0, 0, 0], sizes = [1, 16, 1], strides = [1, 1, 1]} : vector<8x16x1xf32> to vector<1x16x1xf32>
    %262 = vector.shape_cast %261 : vector<1x16x1xf32> to vector<16x1xf32>
    %263 = vector.extract_strided_slice %257 {offsets = [0, 0], sizes = [1, 256], strides = [1, 1]} : vector<8x256xf32> to vector<1x256xf32>
    %264 = vector.broadcast %262 : vector<16x1xf32> to vector<16x256xf32>
    %265 = vector.broadcast %263 : vector<1x256xf32> to vector<16x256xf32>
    %266 = arith.addf %264, %265 : vector<16x256xf32>
    %267 = arith.maximumf %253, %266 : vector<16x256xf32>
    %268 = vector.extract_strided_slice %260 {offsets = [1, 0, 0], sizes = [1, 16, 1], strides = [1, 1, 1]} : vector<8x16x1xf32> to vector<1x16x1xf32>
    %269 = vector.shape_cast %268 : vector<1x16x1xf32> to vector<16x1xf32>
    %270 = vector.extract_strided_slice %257 {offsets = [1, 0], sizes = [1, 256], strides = [1, 1]} : vector<8x256xf32> to vector<1x256xf32>
    %271 = vector.broadcast %269 : vector<16x1xf32> to vector<16x256xf32>
    %272 = vector.broadcast %270 : vector<1x256xf32> to vector<16x256xf32>
    %273 = arith.addf %271, %272 : vector<16x256xf32>
    %274 = arith.maximumf %267, %273 : vector<16x256xf32>
    %275 = vector.extract_strided_slice %260 {offsets = [2, 0, 0], sizes = [1, 16, 1], strides = [1, 1, 1]} : vector<8x16x1xf32> to vector<1x16x1xf32>
    %276 = vector.shape_cast %275 : vector<1x16x1xf32> to vector<16x1xf32>
    %277 = vector.extract_strided_slice %257 {offsets = [2, 0], sizes = [1, 256], strides = [1, 1]} : vector<8x256xf32> to vector<1x256xf32>
    %278 = vector.broadcast %276 : vector<16x1xf32> to vector<16x256xf32>
    %279 = vector.broadcast %277 : vector<1x256xf32> to vector<16x256xf32>
    %280 = arith.addf %278, %279 : vector<16x256xf32>
    %281 = arith.maximumf %274, %280 : vector<16x256xf32>
    %282 = vector.extract_strided_slice %260 {offsets = [3, 0, 0], sizes = [1, 16, 1], strides = [1, 1, 1]} : vector<8x16x1xf32> to vector<1x16x1xf32>
    %283 = vector.shape_cast %282 : vector<1x16x1xf32> to vector<16x1xf32>
    %284 = vector.extract_strided_slice %257 {offsets = [3, 0], sizes = [1, 256], strides = [1, 1]} : vector<8x256xf32> to vector<1x256xf32>
    %285 = vector.broadcast %283 : vector<16x1xf32> to vector<16x256xf32>
    %286 = vector.broadcast %284 : vector<1x256xf32> to vector<16x256xf32>
    %287 = arith.addf %285, %286 : vector<16x256xf32>
    %288 = arith.maximumf %281, %287 : vector<16x256xf32>
    %289 = vector.extract_strided_slice %260 {offsets = [4, 0, 0], sizes = [1, 16, 1], strides = [1, 1, 1]} : vector<8x16x1xf32> to vector<1x16x1xf32>
    %290 = vector.shape_cast %289 : vector<1x16x1xf32> to vector<16x1xf32>
    %291 = vector.extract_strided_slice %257 {offsets = [4, 0], sizes = [1, 256], strides = [1, 1]} : vector<8x256xf32> to vector<1x256xf32>
    %292 = vector.broadcast %290 : vector<16x1xf32> to vector<16x256xf32>
    %293 = vector.broadcast %291 : vector<1x256xf32> to vector<16x256xf32>
    %294 = arith.addf %292, %293 : vector<16x256xf32>
    %295 = arith.maximumf %288, %294 : vector<16x256xf32>
    %296 = vector.extract_strided_slice %260 {offsets = [5, 0, 0], sizes = [1, 16, 1], strides = [1, 1, 1]} : vector<8x16x1xf32> to vector<1x16x1xf32>
    %297 = vector.shape_cast %296 : vector<1x16x1xf32> to vector<16x1xf32>
    %298 = vector.extract_strided_slice %257 {offsets = [5, 0], sizes = [1, 256], strides = [1, 1]} : vector<8x256xf32> to vector<1x256xf32>
    %299 = vector.broadcast %297 : vector<16x1xf32> to vector<16x256xf32>
    %300 = vector.broadcast %298 : vector<1x256xf32> to vector<16x256xf32>
    %301 = arith.addf %299, %300 : vector<16x256xf32>
    %302 = arith.maximumf %295, %301 : vector<16x256xf32>
    %303 = vector.extract_strided_slice %260 {offsets = [6, 0, 0], sizes = [1, 16, 1], strides = [1, 1, 1]} : vector<8x16x1xf32> to vector<1x16x1xf32>
    %304 = vector.shape_cast %303 : vector<1x16x1xf32> to vector<16x1xf32>
    %305 = vector.extract_strided_slice %257 {offsets = [6, 0], sizes = [1, 256], strides = [1, 1]} : vector<8x256xf32> to vector<1x256xf32>
    %306 = vector.broadcast %304 : vector<16x1xf32> to vector<16x256xf32>
    %307 = vector.broadcast %305 : vector<1x256xf32> to vector<16x256xf32>
    %308 = arith.addf %306, %307 : vector<16x256xf32>
    %309 = arith.maximumf %302, %308 : vector<16x256xf32>
    %310 = vector.extract_strided_slice %260 {offsets = [7, 0, 0], sizes = [1, 16, 1], strides = [1, 1, 1]} : vector<8x16x1xf32> to vector<1x16x1xf32>
    %311 = vector.shape_cast %310 : vector<1x16x1xf32> to vector<16x1xf32>
    %312 = vector.extract_strided_slice %257 {offsets = [7, 0], sizes = [1, 256], strides = [1, 1]} : vector<8x256xf32> to vector<1x256xf32>
    %313 = vector.broadcast %311 : vector<16x1xf32> to vector<16x256xf32>
    %314 = vector.broadcast %312 : vector<1x256xf32> to vector<16x256xf32>
    %315 = arith.addf %313, %314 : vector<16x256xf32>
    %316 = arith.maximumf %309, %315 : vector<16x256xf32>
    %c2_i32_49 = arith.constant 2 : i32
    %317 = arith.subf %316, %184 : vector<16x256xf32>
    %318 = arith.truncf %317 : vector<16x256xf32> to vector<16x256xbf16>
    %c0_50 = arith.constant 0 : index
    %c0_51 = arith.constant 0 : index
    %319 = vector.load %arg8[%c0_50, %c0_51] : memref<256x256xbf16, #tpu.memory_space<vmem>>, vector<256x256xbf16>
    %cst_52 = arith.constant dense<0.000000e+00> : vector<16x256xf32>
    %320 = tpu.matmul %318, %319, %cst_52 {dimension_numbers = #tpu.dot_dimension_numbers<[1], [0], [0], [1], [0, 0, 1, 1], [], []>} : vector<16x256xbf16>, vector<256x256xbf16>, vector<16x256xf32> -> vector<16x256xf32>
    %c0_53 = arith.constant 0 : index
    %c128 = arith.constant 128 : index
    %321 = vector.load %arg10[%c0_53, %c128] : memref<1x384xf32, #tpu.memory_space<vmem>>, vector<1x256xf32>
    %c0_54 = arith.constant 0 : index
    %c128_55 = arith.constant 128 : index
    %322 = vector.load %arg11[%c0_54, %c128_55] : memref<1x384xf32, #tpu.memory_space<vmem>>, vector<1x256xf32>
    %323 = vector.broadcast %15 : vector<16x1xf32> to vector<16x256xf32>
    %324 = arith.mulf %320, %323 : vector<16x256xf32>
    %cst_56 = arith.constant dense<0.000000e+00> : vector<256xf32>
    %325 = vector.multi_reduction <add>, %324, %cst_56 [0] : vector<16x256xf32> to vector<256xf32>
    %326 = vector.shape_cast %325 : vector<256xf32> to vector<1x256xf32>
    %cst_57 = arith.constant 6.250000e-02 : f32
    %327 = vector.broadcast %cst_57 : f32 to vector<1x256xf32>
    %328 = arith.mulf %326, %327 : vector<1x256xf32>
    %329 = vector.broadcast %328 : vector<1x256xf32> to vector<16x256xf32>
    %330 = arith.subf %320, %329 : vector<16x256xf32>
    %331 = vector.broadcast %15 : vector<16x1xf32> to vector<16x256xf32>
    %332 = arith.mulf %330, %331 : vector<16x256xf32>
    %333 = arith.mulf %332, %332 : vector<16x256xf32>
    %cst_58 = arith.constant dense<0.000000e+00> : vector<256xf32>
    %334 = vector.multi_reduction <add>, %333, %cst_58 [0] : vector<16x256xf32> to vector<256xf32>
    %335 = vector.shape_cast %334 : vector<256xf32> to vector<1x256xf32>
    %cst_59 = arith.constant 6.250000e-02 : f32
    %336 = vector.broadcast %cst_59 : f32 to vector<1x256xf32>
    %337 = arith.mulf %335, %336 : vector<1x256xf32>
    %338 = vector.broadcast %328 : vector<1x256xf32> to vector<16x256xf32>
    %339 = arith.subf %320, %338 : vector<16x256xf32>
    %cst_60 = arith.constant 9.99999974E-6 : f32
    %340 = vector.broadcast %cst_60 : f32 to vector<1x256xf32>
    %341 = arith.addf %337, %340 : vector<1x256xf32>
    %342 = math.rsqrt %341 : vector<1x256xf32>
    %343 = vector.broadcast %342 : vector<1x256xf32> to vector<16x256xf32>
    %344 = arith.mulf %339, %343 : vector<16x256xf32>
    %345 = vector.broadcast %321 : vector<1x256xf32> to vector<16x256xf32>
    %346 = arith.mulf %344, %345 : vector<16x256xf32>
    %347 = vector.broadcast %322 : vector<1x256xf32> to vector<16x256xf32>
    %348 = arith.addf %346, %347 : vector<16x256xf32>
    %cst_61 = arith.constant 0.000000e+00 : f32
    %349 = vector.broadcast %cst_61 : f32 to vector<16x256xf32>
    %350 = arith.maximumf %348, %349 : vector<16x256xf32>
    %351 = vector.extract_strided_slice %10 {offsets = [0, 384], sizes = [16, 384], strides = [1, 1]} : vector<16x768xf32> to vector<16x384xf32>
    %352 = arith.truncf %350 : vector<16x256xf32> to vector<16x256xbf16>
    %c0_62 = arith.constant 0 : index
    %c0_63 = arith.constant 0 : index
    %353 = vector.load %arg5[%c0_62, %c0_63] : memref<256x384xbf16, #tpu.memory_space<vmem>>, vector<256x384xbf16>
    %cst_64 = arith.constant dense<0.000000e+00> : vector<16x384xf32>
    %354 = tpu.matmul %352, %353, %cst_64 {dimension_numbers = #tpu.dot_dimension_numbers<[1], [0], [0], [1], [0, 0, 1, 1], [], []>} : vector<16x256xbf16>, vector<256x384xbf16>, vector<16x384xf32> -> vector<16x384xf32>
    %355 = arith.addf %354, %351 : vector<16x384xf32>
    %c0_65 = arith.constant 0 : index
    %c0_66 = arith.constant 0 : index
    %356 = vector.load %arg15[%c0_65, %c0_66] : memref<16x384xf32, #tpu.memory_space<vmem>>, vector<16x384xf32>
    tpu.vector_store %arg15[%c0_65, %c0_66], %355 {strides = array<i32>} : memref<16x384xf32, #tpu.memory_space<vmem>>, vector<16x384xf32>,
    %cst_67 = arith.constant -1.000000e+30 : f32
    %357 = vector.broadcast %cst_67 : f32 to vector<16x384xf32>
    %c0_i32_68 = arith.constant 0 : i32
    %c8_i32_69 = arith.constant 8 : i32
    %358 = arith.muli %c0_i32_68, %c8_i32_69 : i32
    %359 = tpu.assume_multiple %358, 8 : i32
    %360 = arith.index_cast %359 : i32 to index
    %c0_70 = arith.constant 0 : index
    %361 = vector.load %arg15[%360, %c0_70] : memref<16x384xf32, #tpu.memory_space<vmem>>, vector<8x384xf32>
    %362 = arith.index_cast %359 : i32 to index
    %c0_71 = arith.constant 0 : index
    %363 = vector.load %arg14[%362, %c0_71] : memref<16x16xf32, #tpu.memory_space<vmem>>, vector<8x16xf32>
    %364 = vector.shape_cast %363 : vector<8x16xf32> to vector<8x16x1xf32>
    %365 = vector.extract_strided_slice %364 {offsets = [0, 0, 0], sizes = [1, 16, 1], strides = [1, 1, 1]} : vector<8x16x1xf32> to vector<1x16x1xf32>
    %366 = vector.shape_cast %365 : vector<1x16x1xf32> to vector<16x1xf32>
    %367 = vector.extract_strided_slice %361 {offsets = [0, 0], sizes = [1, 384], strides = [1, 1]} : vector<8x384xf32> to vector<1x384xf32>
    %368 = vector.broadcast %366 : vector<16x1xf32> to vector<16x384xf32>
    %369 = vector.broadcast %367 : vector<1x384xf32> to vector<16x384xf32>
    %370 = arith.addf %368, %369 : vector<16x384xf32>
    %371 = arith.maximumf %357, %370 : vector<16x384xf32>
    %372 = vector.extract_strided_slice %364 {offsets = [1, 0, 0], sizes = [1, 16, 1], strides = [1, 1, 1]} : vector<8x16x1xf32> to vector<1x16x1xf32>
    %373 = vector.shape_cast %372 : vector<1x16x1xf32> to vector<16x1xf32>
    %374 = vector.extract_strided_slice %361 {offsets = [1, 0], sizes = [1, 384], strides = [1, 1]} : vector<8x384xf32> to vector<1x384xf32>
    %375 = vector.broadcast %373 : vector<16x1xf32> to vector<16x384xf32>
    %376 = vector.broadcast %374 : vector<1x384xf32> to vector<16x384xf32>
    %377 = arith.addf %375, %376 : vector<16x384xf32>
    %378 = arith.maximumf %371, %377 : vector<16x384xf32>
    %379 = vector.extract_strided_slice %364 {offsets = [2, 0, 0], sizes = [1, 16, 1], strides = [1, 1, 1]} : vector<8x16x1xf32> to vector<1x16x1xf32>
    %380 = vector.shape_cast %379 : vector<1x16x1xf32> to vector<16x1xf32>
    %381 = vector.extract_strided_slice %361 {offsets = [2, 0], sizes = [1, 384], strides = [1, 1]} : vector<8x384xf32> to vector<1x384xf32>
    %382 = vector.broadcast %380 : vector<16x1xf32> to vector<16x384xf32>
    %383 = vector.broadcast %381 : vector<1x384xf32> to vector<16x384xf32>
    %384 = arith.addf %382, %383 : vector<16x384xf32>
    %385 = arith.maximumf %378, %384 : vector<16x384xf32>
    %386 = vector.extract_strided_slice %364 {offsets = [3, 0, 0], sizes = [1, 16, 1], strides = [1, 1, 1]} : vector<8x16x1xf32> to vector<1x16x1xf32>
    %387 = vector.shape_cast %386 : vector<1x16x1xf32> to vector<16x1xf32>
    %388 = vector.extract_strided_slice %361 {offsets = [3, 0], sizes = [1, 384], strides = [1, 1]} : vector<8x384xf32> to vector<1x384xf32>
    %389 = vector.broadcast %387 : vector<16x1xf32> to vector<16x384xf32>
    %390 = vector.broadcast %388 : vector<1x384xf32> to vector<16x384xf32>
    %391 = arith.addf %389, %390 : vector<16x384xf32>
    %392 = arith.maximumf %385, %391 : vector<16x384xf32>
    %393 = vector.extract_strided_slice %364 {offsets = [4, 0, 0], sizes = [1, 16, 1], strides = [1, 1, 1]} : vector<8x16x1xf32> to vector<1x16x1xf32>
    %394 = vector.shape_cast %393 : vector<1x16x1xf32> to vector<16x1xf32>
    %395 = vector.extract_strided_slice %361 {offsets = [4, 0], sizes = [1, 384], strides = [1, 1]} : vector<8x384xf32> to vector<1x384xf32>
    %396 = vector.broadcast %394 : vector<16x1xf32> to vector<16x384xf32>
    %397 = vector.broadcast %395 : vector<1x384xf32> to vector<16x384xf32>
    %398 = arith.addf %396, %397 : vector<16x384xf32>
    %399 = arith.maximumf %392, %398 : vector<16x384xf32>
    %400 = vector.extract_strided_slice %364 {offsets = [5, 0, 0], sizes = [1, 16, 1], strides = [1, 1, 1]} : vector<8x16x1xf32> to vector<1x16x1xf32>
    %401 = vector.shape_cast %400 : vector<1x16x1xf32> to vector<16x1xf32>
    %402 = vector.extract_strided_slice %361 {offsets = [5, 0], sizes = [1, 384], strides = [1, 1]} : vector<8x384xf32> to vector<1x384xf32>
    %403 = vector.broadcast %401 : vector<16x1xf32> to vector<16x384xf32>
    %404 = vector.broadcast %402 : vector<1x384xf32> to vector<16x384xf32>
    %405 = arith.addf %403, %404 : vector<16x384xf32>
    %406 = arith.maximumf %399, %405 : vector<16x384xf32>
    %407 = vector.extract_strided_slice %364 {offsets = [6, 0, 0], sizes = [1, 16, 1], strides = [1, 1, 1]} : vector<8x16x1xf32> to vector<1x16x1xf32>
    %408 = vector.shape_cast %407 : vector<1x16x1xf32> to vector<16x1xf32>
    %409 = vector.extract_strided_slice %361 {offsets = [6, 0], sizes = [1, 384], strides = [1, 1]} : vector<8x384xf32> to vector<1x384xf32>
    %410 = vector.broadcast %408 : vector<16x1xf32> to vector<16x384xf32>
    %411 = vector.broadcast %409 : vector<1x384xf32> to vector<16x384xf32>
    %412 = arith.addf %410, %411 : vector<16x384xf32>
    %413 = arith.maximumf %406, %412 : vector<16x384xf32>
    %414 = vector.extract_strided_slice %364 {offsets = [7, 0, 0], sizes = [1, 16, 1], strides = [1, 1, 1]} : vector<8x16x1xf32> to vector<1x16x1xf32>
    %415 = vector.shape_cast %414 : vector<1x16x1xf32> to vector<16x1xf32>
    %416 = vector.extract_strided_slice %361 {offsets = [7, 0], sizes = [1, 384], strides = [1, 1]} : vector<8x384xf32> to vector<1x384xf32>
    %417 = vector.broadcast %415 : vector<16x1xf32> to vector<16x384xf32>
    %418 = vector.broadcast %416 : vector<1x384xf32> to vector<16x384xf32>
    %419 = arith.addf %417, %418 : vector<16x384xf32>
    %420 = arith.maximumf %413, %419 : vector<16x384xf32>
    %c1_i32_72 = arith.constant 1 : i32
    %c8_i32_73 = arith.constant 8 : i32
    %421 = arith.muli %c1_i32_72, %c8_i32_73 : i32
    %422 = tpu.assume_multiple %421, 8 : i32
    %423 = arith.index_cast %422 : i32 to index
    %c0_74 = arith.constant 0 : index
    %424 = vector.load %arg15[%423, %c0_74] : memref<16x384xf32, #tpu.memory_space<vmem>>, vector<8x384xf32>
    %425 = arith.index_cast %422 : i32 to index
    %c0_75 = arith.constant 0 : index
    %426 = vector.load %arg14[%425, %c0_75] : memref<16x16xf32, #tpu.memory_space<vmem>>, vector<8x16xf32>
    %427 = vector.shape_cast %426 : vector<8x16xf32> to vector<8x16x1xf32>
    %428 = vector.extract_strided_slice %427 {offsets = [0, 0, 0], sizes = [1, 16, 1], strides = [1, 1, 1]} : vector<8x16x1xf32> to vector<1x16x1xf32>
    %429 = vector.shape_cast %428 : vector<1x16x1xf32> to vector<16x1xf32>
    %430 = vector.extract_strided_slice %424 {offsets = [0, 0], sizes = [1, 384], strides = [1, 1]} : vector<8x384xf32> to vector<1x384xf32>
    %431 = vector.broadcast %429 : vector<16x1xf32> to vector<16x384xf32>
    %432 = vector.broadcast %430 : vector<1x384xf32> to vector<16x384xf32>
    %433 = arith.addf %431, %432 : vector<16x384xf32>
    %434 = arith.maximumf %420, %433 : vector<16x384xf32>
    %435 = vector.extract_strided_slice %427 {offsets = [1, 0, 0], sizes = [1, 16, 1], strides = [1, 1, 1]} : vector<8x16x1xf32> to vector<1x16x1xf32>
    %436 = vector.shape_cast %435 : vector<1x16x1xf32> to vector<16x1xf32>
    %437 = vector.extract_strided_slice %424 {offsets = [1, 0], sizes = [1, 384], strides = [1, 1]} : vector<8x384xf32> to vector<1x384xf32>
    %438 = vector.broadcast %436 : vector<16x1xf32> to vector<16x384xf32>
    %439 = vector.broadcast %437 : vector<1x384xf32> to vector<16x384xf32>
    %440 = arith.addf %438, %439 : vector<16x384xf32>
    %441 = arith.maximumf %434, %440 : vector<16x384xf32>
    %442 = vector.extract_strided_slice %427 {offsets = [2, 0, 0], sizes = [1, 16, 1], strides = [1, 1, 1]} : vector<8x16x1xf32> to vector<1x16x1xf32>
    %443 = vector.shape_cast %442 : vector<1x16x1xf32> to vector<16x1xf32>
    %444 = vector.extract_strided_slice %424 {offsets = [2, 0], sizes = [1, 384], strides = [1, 1]} : vector<8x384xf32> to vector<1x384xf32>
    %445 = vector.broadcast %443 : vector<16x1xf32> to vector<16x384xf32>
    %446 = vector.broadcast %444 : vector<1x384xf32> to vector<16x384xf32>
    %447 = arith.addf %445, %446 : vector<16x384xf32>
    %448 = arith.maximumf %441, %447 : vector<16x384xf32>
    %449 = vector.extract_strided_slice %427 {offsets = [3, 0, 0], sizes = [1, 16, 1], strides = [1, 1, 1]} : vector<8x16x1xf32> to vector<1x16x1xf32>
    %450 = vector.shape_cast %449 : vector<1x16x1xf32> to vector<16x1xf32>
    %451 = vector.extract_strided_slice %424 {offsets = [3, 0], sizes = [1, 384], strides = [1, 1]} : vector<8x384xf32> to vector<1x384xf32>
    %452 = vector.broadcast %450 : vector<16x1xf32> to vector<16x384xf32>
    %453 = vector.broadcast %451 : vector<1x384xf32> to vector<16x384xf32>
    %454 = arith.addf %452, %453 : vector<16x384xf32>
    %455 = arith.maximumf %448, %454 : vector<16x384xf32>
    %456 = vector.extract_strided_slice %427 {offsets = [4, 0, 0], sizes = [1, 16, 1], strides = [1, 1, 1]} : vector<8x16x1xf32> to vector<1x16x1xf32>
    %457 = vector.shape_cast %456 : vector<1x16x1xf32> to vector<16x1xf32>
    %458 = vector.extract_strided_slice %424 {offsets = [4, 0], sizes = [1, 384], strides = [1, 1]} : vector<8x384xf32> to vector<1x384xf32>
    %459 = vector.broadcast %457 : vector<16x1xf32> to vector<16x384xf32>
    %460 = vector.broadcast %458 : vector<1x384xf32> to vector<16x384xf32>
    %461 = arith.addf %459, %460 : vector<16x384xf32>
    %462 = arith.maximumf %455, %461 : vector<16x384xf32>
    %463 = vector.extract_strided_slice %427 {offsets = [5, 0, 0], sizes = [1, 16, 1], strides = [1, 1, 1]} : vector<8x16x1xf32> to vector<1x16x1xf32>
    %464 = vector.shape_cast %463 : vector<1x16x1xf32> to vector<16x1xf32>
    %465 = vector.extract_strided_slice %424 {offsets = [5, 0], sizes = [1, 384], strides = [1, 1]} : vector<8x384xf32> to vector<1x384xf32>
    %466 = vector.broadcast %464 : vector<16x1xf32> to vector<16x384xf32>
    %467 = vector.broadcast %465 : vector<1x384xf32> to vector<16x384xf32>
    %468 = arith.addf %466, %467 : vector<16x384xf32>
    %469 = arith.maximumf %462, %468 : vector<16x384xf32>
    %470 = vector.extract_strided_slice %427 {offsets = [6, 0, 0], sizes = [1, 16, 1], strides = [1, 1, 1]} : vector<8x16x1xf32> to vector<1x16x1xf32>
    %471 = vector.shape_cast %470 : vector<1x16x1xf32> to vector<16x1xf32>
    %472 = vector.extract_strided_slice %424 {offsets = [6, 0], sizes = [1, 384], strides = [1, 1]} : vector<8x384xf32> to vector<1x384xf32>
    %473 = vector.broadcast %471 : vector<16x1xf32> to vector<16x384xf32>
    %474 = vector.broadcast %472 : vector<1x384xf32> to vector<16x384xf32>
    %475 = arith.addf %473, %474 : vector<16x384xf32>
    %476 = arith.maximumf %469, %475 : vector<16x384xf32>
    %477 = vector.extract_strided_slice %427 {offsets = [7, 0, 0], sizes = [1, 16, 1], strides = [1, 1, 1]} : vector<8x16x1xf32> to vector<1x16x1xf32>
    %478 = vector.shape_cast %477 : vector<1x16x1xf32> to vector<16x1xf32>
    %479 = vector.extract_strided_slice %424 {offsets = [7, 0], sizes = [1, 384], strides = [1, 1]} : vector<8x384xf32> to vector<1x384xf32>
    %480 = vector.broadcast %478 : vector<16x1xf32> to vector<16x384xf32>
    %481 = vector.broadcast %479 : vector<1x384xf32> to vector<16x384xf32>
    %482 = arith.addf %480, %481 : vector<16x384xf32>
    %483 = arith.maximumf %476, %482 : vector<16x384xf32>
    %c2_i32_76 = arith.constant 2 : i32
    %484 = arith.subf %483, %351 : vector<16x384xf32>
    %485 = arith.truncf %484 : vector<16x384xf32> to vector<16x384xbf16>
    %c0_77 = arith.constant 0 : index
    %c0_78 = arith.constant 0 : index
    %486 = vector.load %arg9[%c0_77, %c0_78] : memref<384x128xbf16, #tpu.memory_space<vmem>>, vector<384x128xbf16>
    %cst_79 = arith.constant dense<0.000000e+00> : vector<16x128xf32>
    %487 = tpu.matmul %485, %486, %cst_79 {dimension_numbers = #tpu.dot_dimension_numbers<[1], [0], [0], [1], [0, 0, 1, 1], [], []>} : vector<16x384xbf16>, vector<384x128xbf16>, vector<16x128xf32> -> vector<16x128xf32>
    %c0_80 = arith.constant 0 : index
    %c0_81 = arith.constant 0 : index
    %488 = vector.load %arg12[%c0_80, %c0_81] : memref<1x128xf32, #tpu.memory_space<vmem>>, vector<1x128xf32>
    %489 = vector.broadcast %488 : vector<1x128xf32> to vector<16x128xf32>
    %490 = arith.addf %487, %489 : vector<16x128xf32>
    %c0_82 = arith.constant 0 : index
    %c0_83 = arith.constant 0 : index
    %491 = vector.load %arg13[%c0_82, %c0_83] : memref<16x128xf32, #tpu.memory_space<vmem>>, vector<16x128xf32>
    tpu.vector_store %arg13[%c0_82, %c0_83], %490 {strides = array<i32>} : memref<16x128xf32, #tpu.memory_space<vmem>>, vector<16x128xf32>,
    return
  }
}

</mosaic_0001>

<bundles_post_ra>
// kernel: tpu_custom_call.1
= control target key start
LH: loop header
LB: loop body
LE: loop exit
PB: predicated region body
PF: predicated region fallthrough
CT: control target
= control target key end

     0   :  { %18 = vsyncpa [#allocation5], 0  ;;  %s5190_s0 = inlined_call_operand.hbm [shape: f32[16,128], index: 0, kind: input, shape index: {}]   ;;  %s5191_s1 = inlined_call_operand.hbm [shape: f32[16,8], index: 1, kind: input, shape index: {}]   ;;  %s5192_s2 = inlined_call_operand.hbm [shape: s8[16,16], index: 2, kind: input, shape index: {}]   ;;  %s5193_s3 = inlined_call_operand.hbm [shape: bf16[128,128], index: 3, kind: input, shape index: {}]   ;;  %s5194_s4 = inlined_call_operand.hbm [shape: bf16[128,256], index: 4, kind: input, shape index: {}]   ;;  %s5195_s5 = inlined_call_operand.hbm [shape: bf16[256,384], index: 5, kind: input, shape index: {}]   ;;  %s5196_s6 = inlined_call_operand.hbm [shape: bf16[8,768], index: 6, kind: input, shape index: {}]   ;;  %s5197_s7 = inlined_call_operand.hbm [shape: bf16[128,128], index: 7, kind: input, shape index: {}]   ;;  %s5198_s8 = inlined_call_operand.hbm [shape: bf16[256,256], index: 8, kind: input, shape index: {}]   ;;  %s5199_s9 = inlined_call_operand.hbm [shape: bf16[384,128], index: 9, kind: input, shape index: {}]   ;;  %s5200_s10 = inlined_call_operand.hbm [shape: f32[1,384], index: 10, kind: input, shape index: {}]   ;;  %s5201_s11 = inlined_call_operand.hbm [shape: f32[1,384], index: 11, kind: input, shape index: {}]   ;;  %s5202_s12 = inlined_call_operand.hbm [shape: f32[1,128], index: 12, kind: input, shape index: {}]   ;;  %s5203_s13 = inlined_call_operand.hbm [shape: f32[16,128], index: 13, kind: output, shape index: {}]  }
   0x1   :  { %19 = vsyncpa [#allocation8], 0 }
   0x2   :  { %20 = vsyncpa [#allocation11], 0 }
   0x3   :  { %21 = vsyncpa [#allocation14], 0 }
   0x4   :  { %22 = vsyncpa [#allocation17], 0 }
   0x5   :  { %23 = vsyncpa [#allocation20], 0 }
   0x6   :  { %24 = vsyncpa [#allocation23], 0 }
   0x7   :  { %25 = vsyncpa [#allocation6], 0  ;;  %s4026_s25 = smov [#allocation7]   ;;  %s4027_s27 = smov [#allocation10]  }
   0x8   :  { %s43_s26 = sshll.u32 %s4026_s25, 4  ;;  %s67_s28 = sshll.u32 %s4027_s27, 4  ;;  %s44_s26 = int_to_ptr.vmem [resolvable:$true] %s43_s26  ;;  %s4121_s28 = int_to_ptr.vmem [resolvable:$true] %s67_s28 }
   0x9   :  { %s3702_s14 = scalar_lea.hbm %s5191_s1, 256 }
   0xa   :  { %p3703_p0 = scmp.ne.s32.totalorder %s5191_s1, %s3702_s14  ;;  %p3706_p1 = scmp.lt.u32.totalorder %s3702_s14, %s5191_s1 }
   0xc   :  { %p3708_p2 = pnand %p3706_p1, %p3703_p0 }
   0xe   :  { %3711 = shalt.err (!%p3708_p2)
}
   0xf   :  { %s3712_s19 = scalar_lea.vmem %s44_s26, 256  ;;  %p3717_p4 = scmp.lt.s32.totalorder %s44_s26, %s44_s26 }
  0x10   :  { %p3713_p3 = scmp.ne.s32.totalorder %s44_s26, %s3712_s19  ;;  %p3718_p5 = scmp.lt.s32.totalorder %s3712_s19, %s3712_s19 }
  0x12   :  { %p3719_p6 = por %p3718_p5, %p3717_p4 }
  0x14   :  { %p3720_p7 = pnand %p3719_p6, %p3713_p3 }
  0x16   :  { %3723 = shalt.err (!%p3720_p7)
}
  0x17   :  { %s5204_s20 = smov 128   ;;  %s4029_s21 = smov 8  }
  0x18   :  { %49 = dma.hbm_to_vmem [thread:$0]  %s5191_s1, 256, %s44_s26, [#allocation8], %s5204_s20, %s5204_s20, %s4029_s21  }
  0x19   :  { %s3724_s27 = scalar_lea.hbm %s5193_s3, 1024 }
  0x1a   :  { %p3725_p8 = scmp.ne.s32.totalorder %s5193_s3, %s3724_s27  ;;  %p3728_p9 = scmp.lt.u32.totalorder %s3724_s27, %s5193_s3 }
  0x1c   :  { %p3730_p10 = pnand %p3728_p9, %p3725_p8 }
  0x1e   :  { %3733 = shalt.err (!%p3730_p10)
}
  0x1f   :  { %s3734_s16 = scalar_lea.vmem %s4121_s28, 1024  ;;  %p3739_p12 = scmp.lt.s32.totalorder %s4121_s28, %s4121_s28 }
  0x20   :  { %p3735_p11 = scmp.ne.s32.totalorder %s4121_s28, %s3734_s16  ;;  %p3740_p13 = scmp.lt.s32.totalorder %s3734_s16, %s3734_s16 }
  0x22   :  { %p3741_p0 = por %p3740_p13, %p3739_p12 }
  0x24   :  { %p3742_p1 = pnand %p3741_p0, %p3735_p11 }
  0x26   :  { %3745 = shalt.err (!%p3742_p1)
}
  0x27   :  { %s4030_s1 = smov 64   ;;  %s4031_s26 = smov 4  }
  0x28   :  { %73 = dma.hbm_to_vmem [thread:$0]  %s5193_s3, 1024, %s4121_s28, [#allocation11], %s4030_s1, %s4030_s1, %s4031_s26  }
  0x29   :  { %s4032_s19 = smov [#allocation13]   ;;  %s3746_s25 = scalar_lea.hbm %s5195_s5, 6144 }
  0x2a   :  { %s91_s22 = sshll.u32 %s4032_s19, 4  ;;  %p3747_p2 = scmp.ne.s32.totalorder %s5195_s5, %s3746_s25  ;;  %s92_s22 = int_to_ptr.vmem [resolvable:$true] %s91_s22 }
  0x2b   :  { %p3750_p3 = scmp.lt.u32.totalorder %s3746_s25, %s5195_s5 }
  0x2d   :  { %p3752_p4 = pnand %p3750_p3, %p3747_p2 }
  0x2f   :  { %3755 = shalt.err (!%p3752_p4)
}
  0x30   :  { %s3756_s15 = scalar_lea.vmem %s92_s22, 6144  ;;  %p3761_p6 = scmp.lt.s32.totalorder %s92_s22, %s92_s22 }
  0x31   :  { %p3757_p5 = scmp.ne.s32.totalorder %s92_s22, %s3756_s15  ;;  %p3762_p7 = scmp.lt.s32.totalorder %s3756_s15, %s3756_s15 }
  0x33   :  { %p3763_p8 = por %p3762_p7, %p3761_p6 }
  0x35   :  { %p3764_p9 = pnand %p3763_p8, %p3757_p5 }
  0x37   :  { %3767 = shalt.err (!%p3764_p9)
}
  0x38   :  { %s4033_s3 = smov 192   ;;  %s4034_s28 = smov 12  }
  0x39   :  { %97 = dma.hbm_to_vmem [thread:$0]  %s5195_s5, 6144, %s92_s22, [#allocation14], %s4033_s3, %s4033_s3, %s4034_s28  }
  0x3a   :  { %s4035_s18 = smov [#allocation16]   ;;  %s4036_s23 = smov [#allocation19]  }
  0x3b   :  { %s113_s19 = sshll.u32 %s4035_s18, 4  ;;  %s137_s24 = sshll.u32 %s4036_s23, 4  ;;  %s114_s19 = int_to_ptr.vmem [resolvable:$true] %s113_s19  ;;  %s138_s24 = int_to_ptr.vmem [resolvable:$true] %s137_s24 }
  0x3c   :  { %s3768_s29 = scalar_lea.hbm %s5197_s7, 1024 }
  0x3d   :  { %p3769_p10 = scmp.ne.s32.totalorder %s5197_s7, %s3768_s29  ;;  %p3772_p11 = scmp.lt.u32.totalorder %s3768_s29, %s5197_s7 }
  0x3f   :  { %p3774_p12 = pnand %p3772_p11, %p3769_p10 }
  0x41   :  { %3777 = shalt.err (!%p3774_p12)
}
  0x42   :  { %s3778_s5 = scalar_lea.vmem %s114_s19, 1024  ;;  %p3783_p0 = scmp.lt.s32.totalorder %s114_s19, %s114_s19 }
  0x43   :  { %p3779_p13 = scmp.ne.s32.totalorder %s114_s19, %s3778_s5  ;;  %p3784_p1 = scmp.lt.s32.totalorder %s3778_s5, %s3778_s5 }
  0x45   :  { %p3785_p2 = por %p3784_p1, %p3783_p0 }
  0x47   :  { %p3786_p3 = pnand %p3785_p2, %p3779_p13 }
  0x49   :  { %3789 = shalt.err (!%p3786_p3)
}
  0x4a   :  { %119 = dma.hbm_to_vmem [thread:$0]  %s5197_s7, 1024, %s114_s19, [#allocation17], %s4030_s1, %s4030_s1, %s4031_s26  }
  0x4b   :  { %s3790_s16 = scalar_lea.hbm %s5199_s9, 3072 }
  0x4c   :  { %p3791_p4 = scmp.ne.s32.totalorder %s5199_s9, %s3790_s16  ;;  %p3794_p5 = scmp.lt.u32.totalorder %s3790_s16, %s5199_s9 }
  0x4e   :  { %p3796_p6 = pnand %p3794_p5, %p3791_p4 }
  0x50   :  { %3799 = shalt.err (!%p3796_p6)
}
  0x51   :  { %s3800_s27 = scalar_lea.vmem %s138_s24, 3072  ;;  %p3805_p8 = scmp.lt.s32.totalorder %s138_s24, %s138_s24 }
  0x52   :  { %p3801_p7 = scmp.ne.s32.totalorder %s138_s24, %s3800_s27  ;;  %p3806_p9 = scmp.lt.s32.totalorder %s3800_s27, %s3800_s27 }
  0x54   :  { %p3807_p10 = por %p3806_p9, %p3805_p8 }
  0x56   :  { %p3808_p11 = pnand %p3807_p10, %p3801_p7 }
  0x58   :  { %3811 = shalt.err (!%p3808_p11)
}
  0x59   :  { %143 = dma.hbm_to_vmem [thread:$0]  %s5199_s9, 3072, %s138_s24, [#allocation20], %s4030_s1, %s4030_s1, %s4031_s26  }
  0x5a   :  { %s4037_s29 = smov [#allocation22]   ;;  %s4038_s14 = smov [#allocation4]  }
  0x5b   :  { %s160_s30 = sshll.u32 %s4037_s29, 4  ;;  %s31_s15 = sshll.u32 %s4038_s14, 4  ;;  %s161_s30 = int_to_ptr.vmem [resolvable:$true] %s160_s30  ;;  %s32_s15 = int_to_ptr.vmem [resolvable:$true] %s31_s15 }
  0x5c   :  { %s3812_s3 = scalar_lea.hbm %s5201_s11, 48 }
  0x5d   :  { %p3813_p12 = scmp.ne.s32.totalorder %s5201_s11, %s3812_s3  ;;  %p3816_p13 = scmp.lt.u32.totalorder %s3812_s3, %s5201_s11 }
  0x5f   :  { %p3818_p0 = pnand %p3816_p13, %p3813_p12 }
  0x61   :  { %3821 = shalt.err (!%p3818_p0)
}
  0x62   :  { %s3822_s9 = scalar_lea.vmem %s161_s30, 48  ;;  %s3826_s1 = scalar_lea.vmem %s161_s30, 64 }
  0x63   :  { %p3823_p1 = scmp.ne.s32.totalorder %s161_s30, %s3822_s9  ;;  %p3827_p2 = scmp.lt.s32.totalorder %s161_s30, %s161_s30 }
  0x64   :  { %p3828_p3 = scmp.lt.s32.totalorder %s3826_s1, %s3822_s9 }
  0x66   :  { %p3829_p4 = por %p3828_p3, %p3827_p2 }
  0x68   :  { %p3830_p5 = pnand %p3829_p4, %p3823_p1 }
  0x6a   :  { %3833 = shalt.err (!%p3830_p5)
}
  0x6b   :  { %163 = dma.hbm_to_vmem [thread:$0]  %s5201_s11, 48, %s161_s30, [#allocation23]  }
  0x6c   :  { %s3834_s25 = scalar_lea.hbm %s5190_s0, 256 }
  0x6d   :  { %p3835_p6 = scmp.ne.s32.totalorder %s5190_s0, %s3834_s25  ;;  %p3838_p7 = scmp.lt.u32.totalorder %s3834_s25, %s5190_s0 }
  0x6f   :  { %p3840_p8 = pnand %p3838_p7, %p3835_p6 }
  0x71   :  { %3843 = shalt.err (!%p3840_p8)
}
  0x72   :  { %s3844_s14 = scalar_lea.vmem %s32_s15, 256  ;;  %p3849_p10 = scmp.lt.s32.totalorder %s32_s15, %s32_s15 }
  0x73   :  { %p3845_p9 = scmp.ne.s32.totalorder %s32_s15, %s3844_s14  ;;  %p3850_p11 = scmp.lt.s32.totalorder %s3844_s14, %s3844_s14 }
  0x75   :  { %p3851_p12 = por %p3850_p11, %p3849_p10 }
  0x77   :  { %p3852_p13 = pnand %p3851_p12, %p3845_p9 }
  0x79   :  { %3855 = shalt.err (!%p3852_p13)
}
  0x7a   :  { %s5264_s11 = smov 128   ;;  %s4039_s22 = smov [#allocation9]  }
  0x7b   :  { %37 = dma.hbm_to_vmem [thread:$0]  %s5190_s0, 256, %s32_s15, [#allocation5], %s5264_s11, %s5264_s11, %s4029_s21  }
  0x7c   :  { %s55_s3 = sshll.u32 %s4039_s22, 4  ;;  %s3856_s16 = scalar_lea.hbm %s5192_s2, 64  ;;  %s56_s3 = int_to_ptr.vmem [resolvable:$true] %s55_s3 }
  0x7d   :  { %p3857_p0 = scmp.ne.s32.totalorder %s5192_s2, %s3856_s16  ;;  %p3860_p1 = scmp.lt.u32.totalorder %s3856_s16, %s5192_s2 }
  0x7f   :  { %p3862_p2 = pnand %p3860_p1, %p3857_p0 }
  0x81   :  { %3865 = shalt.err (!%p3862_p2)
}
  0x82   :  { %s3866_s24 = scalar_lea.vmem %s56_s3, 64  ;;  %p3871_p4 = scmp.lt.s32.totalorder %s56_s3, %s56_s3 }
  0x83   :  { %p3867_p3 = scmp.ne.s32.totalorder %s56_s3, %s3866_s24  ;;  %p3872_p5 = scmp.lt.s32.totalorder %s3866_s24, %s3866_s24 }
  0x85   :  { %p3873_p6 = por %p3872_p5, %p3871_p4 }
  0x87   :  { %p3874_p7 = pnand %p3873_p6, %p3867_p3 }
  0x89   :  { %3877 = shalt.err (!%p3874_p7)
}
  0x8a   :  { %s4040_s0 = smov 32   ;;  %s4041_s15 = smov 2  }
  0x8b   :  { %61 = dma.hbm_to_vmem [thread:$0]  %s5192_s2, 64, %s56_s3, [#allocation8], %s4040_s0, %s4040_s0, %s4041_s15  }
  0x8c   :  { %s4042_s25 = smov [#allocation12]   ;;  %s4043_s7 = smov [#allocation15]  }
  0x8d   :  { %s79_s27 = sshll.u32 %s4042_s25, 4  ;;  %s104_s19 = sshll.u32 %s4043_s7, 4  ;;  %s80_s27 = int_to_ptr.vmem [resolvable:$true] %s79_s27  ;;  %s105_s19 = int_to_ptr.vmem [resolvable:$true] %s104_s19 }
  0x8e   :  { %s3878_s30 = scalar_lea.hbm %s5194_s4, 2048 }
  0x8f   :  { %p3879_p8 = scmp.ne.s32.totalorder %s5194_s4, %s3878_s30  ;;  %p3882_p9 = scmp.lt.u32.totalorder %s3878_s30, %s5194_s4 }
  0x91   :  { %p3884_p10 = pnand %p3882_p9, %p3879_p8 }
  0x93   :  { %3887 = shalt.err (!%p3884_p10)
}
  0x94   :  { %s3888_s2 = scalar_lea.vmem %s80_s27, 2048  ;;  %p3893_p12 = scmp.lt.s32.totalorder %s80_s27, %s80_s27 }
  0x95   :  { %p3889_p11 = scmp.ne.s32.totalorder %s80_s27, %s3888_s2  ;;  %p3894_p13 = scmp.lt.s32.totalorder %s3888_s2, %s3888_s2 }
  0x97   :  { %p3895_p0 = por %p3894_p13, %p3893_p12 }
  0x99   :  { %p3896_p1 = pnand %p3895_p0, %p3889_p11 }
  0x9b   :  { %3899 = shalt.err (!%p3896_p1)
}
  0x9c   :  { %85 = dma.hbm_to_vmem [thread:$0]  %s5194_s4, 2048, %s80_s27, [#allocation11], %s5264_s11, %s5264_s11, %s4029_s21  }
  0x9d   :  { %s3900_s1 = scalar_lea.hbm %s5196_s6, 384 }
  0x9e   :  { %p3901_p2 = scmp.ne.s32.totalorder %s5196_s6, %s3900_s1  ;;  %p3904_p3 = scmp.lt.u32.totalorder %s3900_s1, %s5196_s6 }
  0xa0   :  { %p3906_p4 = pnand %p3904_p3, %p3901_p2 }
  0xa2   :  { %3909 = shalt.err (!%p3906_p4)
}
  0xa3   :  { %s3910_s18 = scalar_lea.vmem %s105_s19, 384  ;;  %p3915_p6 = scmp.lt.s32.totalorder %s105_s19, %s105_s19 }
  0xa4   :  { %p3911_p5 = scmp.ne.s32.totalorder %s105_s19, %s3910_s18  ;;  %p3916_p7 = scmp.lt.s32.totalorder %s3910_s18, %s3910_s18 }
  0xa6   :  { %p3917_p8 = por %p3916_p7, %p3915_p6 }
  0xa8   :  { %p3918_p9 = pnand %p3917_p8, %p3911_p5 }
  0xaa   :  { %3921 = shalt.err (!%p3918_p9)
}
  0xab   :  { %107 = dma.hbm_to_vmem [thread:$0]  %s5196_s6, 384, %s105_s19, [#allocation14]  }
  0xac   :  { %s4044_s25 = smov [#allocation18]   ;;  %s4045_s7 = smov [#allocation21]  }
  0xad   :  { %s125_s27 = sshll.u32 %s4044_s25, 4  ;;  %s150_s29 = sshll.u32 %s4045_s7, 4  ;;  %s126_s27 = int_to_ptr.vmem [resolvable:$true] %s125_s27  ;;  %s151_s29 = int_to_ptr.vmem [resolvable:$true] %s150_s29 }
  0xae   :  { %s3922_s5 = scalar_lea.hbm %s5198_s8, 4096 }
  0xaf   :  { %p3923_p10 = scmp.ne.s32.totalorder %s5198_s8, %s3922_s5  ;;  %p3926_p11 = scmp.lt.u32.totalorder %s3922_s5, %s5198_s8 }
  0xb1   :  { %p3928_p12 = pnand %p3926_p11, %p3923_p10 }
  0xb3   :  { %3931 = shalt.err (!%p3928_p12)
}
  0xb4   :  { %s3932_s6 = scalar_lea.vmem %s126_s27, 4096  ;;  %p3937_p0 = scmp.lt.s32.totalorder %s126_s27, %s126_s27 }
  0xb5   :  { %p3933_p13 = scmp.ne.s32.totalorder %s126_s27, %s3932_s6  ;;  %p3938_p1 = scmp.lt.s32.totalorder %s3932_s6, %s3932_s6 }
  0xb7   :  { %p3939_p2 = por %p3938_p1, %p3937_p0 }
  0xb9   :  { %p3940_p3 = pnand %p3939_p2, %p3933_p13 }
  0xbb   :  { %3943 = shalt.err (!%p3940_p3)
}
  0xbc   :  { %131 = dma.hbm_to_vmem [thread:$0]  %s5198_s8, 4096, %s126_s27, [#allocation17], %s5264_s11, %s5264_s11, %s4029_s21  }
  0xbd   :  { %s3944_s9 = scalar_lea.hbm %s5200_s10, 48 }
  0xbe   :  { %p3945_p4 = scmp.ne.s32.totalorder %s5200_s10, %s3944_s9  ;;  %p3948_p5 = scmp.lt.u32.totalorder %s3944_s9, %s5200_s10 }
  0xc0   :  { %p3950_p6 = pnand %p3948_p5, %p3945_p4 }
  0xc2   :  { %3953 = shalt.err (!%p3950_p6)
}
  0xc3   :  { %s3954_s15 = scalar_lea.vmem %s151_s29, 48  ;;  %s3958_s18 = scalar_lea.vmem %s151_s29, 64 }
  0xc4   :  { %p3955_p7 = scmp.ne.s32.totalorder %s151_s29, %s3954_s15  ;;  %p3959_p8 = scmp.lt.s32.totalorder %s151_s29, %s151_s29 }
  0xc5   :  { %p3960_p9 = scmp.lt.s32.totalorder %s3958_s18, %s3954_s15 }
  0xc7   :  { %p3961_p10 = por %p3960_p9, %p3959_p8 }
  0xc9   :  { %p3962_p11 = pnand %p3961_p10, %p3955_p7 }
  0xcb   :  { %3965 = shalt.err (!%p3962_p11)
}
  0xcc   :  { %153 = dma.hbm_to_vmem [thread:$0]  %s5200_s10, 48, %s151_s29, [#allocation20]  }
  0xcd   :  { %s4046_s23 = smov [#allocation24]   ;;  %s3966_s14 = scalar_lea.hbm %s5202_s12, 16 }
  0xce   :  { %s170_s25 = sshll.u32 %s4046_s23, 4  ;;  %p3967_p12 = scmp.ne.s32.totalorder %s5202_s12, %s3966_s14  ;;  %s171_s25 = int_to_ptr.vmem [resolvable:$true] %s170_s25 }
  0xcf   :  { %p3970_p13 = scmp.lt.u32.totalorder %s3966_s14, %s5202_s12 }
  0xd1   :  { %p3972_p0 = pnand %p3970_p13, %p3967_p12 }
  0xd3   :  { %3975 = shalt.err (!%p3972_p0)
}
  0xd4   :  { %s3976_s20 = scalar_lea.vmem %s171_s25, 16  ;;  %s3980_s10 = scalar_lea.vmem %s171_s25, 32 }
  0xd5   :  { %p3977_p1 = scmp.ne.s32.totalorder %s171_s25, %s3976_s20  ;;  %p3981_p2 = scmp.lt.s32.totalorder %s171_s25, %s171_s25 }
  0xd6   :  { %p3982_p3 = scmp.lt.s32.totalorder %s3980_s10, %s3976_s20 }
  0xd8   :  { %p3983_p4 = por %p3982_p3, %p3981_p2 }
  0xda   :  { %p3984_p5 = pnand %p3983_p4, %p3977_p1 }
  0xdc   :  { %3987 = shalt.err (!%p3984_p5)
}
  0xdd   :  { %173 = dma.hbm_to_vmem [thread:$0]  %s5202_s12, 16, %s171_s25, [#allocation23]  }
  0xde   :  { %4010 = dma.done.wait [#allocation5], 256  }
  0xdf   :  { %4011 = vsyncadd [#allocation5], 4294967040 }
  0xe0   :  { %4012 = dma.done.wait [#allocation8], 320  }
  0xe1   :  { %4013 = vsyncadd [#allocation8], 4294966976 }
  0xe2   :  { %4014 = dma.done.wait [#allocation11], 3072  }
  0xe3   :  { %4015 = vsyncadd [#allocation11], 4294964224 }
  0xe4   :  { %4016 = dma.done.wait [#allocation14], 6528  }
  0xe5   :  { %4017 = vsyncadd [#allocation14], 4294960768 }
  0xe6   :  { %4018 = dma.done.wait [#allocation17], 5120  }
  0xe7   :  { %4019 = vsyncadd [#allocation17], 4294962176 }
  0xe8   :  { %4020 = dma.done.wait [#allocation20], 3120  }
  0xe9   :  { %4021 = vsyncadd [#allocation20], 4294964176 }
  0xea   :  { %4022 = dma.done.wait [#allocation23], 64  }
  0xeb   :  { %4023 = vsyncadd [#allocation23], 4294967232  ;;  %v4047_v0 = vmov 0   ;;  %v231_v1 = vld [vmem:[#allocation15 + $0x8] sm:$0xff]  ;;  %vm252_vm0 = vcmask 1043456   ;;  %v228_v3 = vld [vmem:[#allocation7 + $0x8] sm:$0xff]  ;;  %v524_v23 = vlaneseq }
  0xec   :  { %346 = vmatprep.mubr.bf16.mxu1 %v4047_v0  ;;  %303 = vmatprep.mubr.bf16.mxu0 %v4047_v0  ;;  %v227_v2 = vld [vmem:[#allocation7] sm:$0xff]  ;;  %v3206_v4 = vcombine.high %v231_v1, %v231_v1  ;;  %v3205_v5 = vcombine.low %v231_v1, %v231_v1  ;;  %vm248_vm1 = vcmask 64512   ;;  %v3516_v8 = vld [vmem:[#allocation10] sm:$0xff]   ;;  %v5206_v9 = vmov 0.0   ;;  %v3355_v16 = vld [vmem:[#allocation9] sm:$0xf]  }
  0xed   :  { %v4309_v7 = vpack.c.bf16 %v228_v3, %v227_v2  ;;  %v230_v10 = vld [vmem:[#allocation15] sm:$0xff]  ;;  %v3517_v11 = vld [vmem:[#allocation10 + $0x8] sm:$0xff]   ;;  %vm4049_vm2 = vmmov 0   ;;  %v3518_v14 = vld [vmem:[#allocation10 + $0x10] sm:$0xff]   ;;  %v3356_v17 = vunpack.c.0.s8 %v3355_v16  ;;  %v3357_v18 = vunpack.c.1.s8 %v3355_v16  ;;  %s4050_s12 = smov [#allocation25]  }
  0xee   :  { %3211 = vmatprep.subr.msk.bf16.mxu1 %vm252_vm0, %v3206_v4  ;;  %v260_v6 = vsel %vm252_vm0, %v3205_v5, 0  ;;  %v3204_v12 = vcombine.high %v230_v10, %v230_v10  ;;  %v3203_v13 = vcombine.low %v230_v10, %v230_v10  ;;  %v3519_v21 = vld [vmem:[#allocation10 + $0x18] sm:$0xff]   ;;  %vm224_vm3 = vcmask 130048   ;;  %v3520_v27 = vld [vmem:[#allocation10 + $0x20] sm:$0xff]   ;;  %v3521_v29 = vld [vmem:[#allocation10 + $0x28] sm:$0xff]   ;;  %s3182_s6 = sshll.u32 %s4050_s12, 4  ;;  %s3183_s6 = int_to_ptr.vmem [resolvable:$true] %s3182_s6 }
  0xef   :  { %315 = vmatpush1.bf16.msra.mxu1 %v260_v6  ;;  %v218_v19 = vcvt.s32.f32 %v3356_v17  ;;  %v219_v20 = vcvt.s32.f32 %v3357_v18  ;;  %v525_v28 = vshrl.u32 %v524_v23, 7  ;;  %v3523_v32 = vld [vmem:[#allocation10 + $0x30] sm:$0xff]   ;;  %v3525_v37 = vld [vmem:[#allocation10 + $0x38] sm:$0xff]   ;;  %v410_v39 = vld [vmem:[#allocation4 + $0x8] sm:$0xff]  ;;  %s3988_s19 = scalar_lea.vmem %s3183_s6, 256  ;;  %p3993_p7 = scmp.lt.s32.totalorder %s3183_s6, %s3183_s6 }
  0xf0   :  { %3429 = vmatprep.subr.bf16.mxu1 %v5206_v9  ;;  %3209 = vmatprep.subr.msk.bf16.mxu0 %vm252_vm0, %v3204_v12  ;;  %v254_v15 = vsel %vm252_vm0, %v3203_v13, 0  ;;  %v409_v38 = vld [vmem:[#allocation4] sm:$0xff]  ;;  %v232_v61 = vld [vmem:[#allocation15 + $0x10] sm:$0xff]  ;;  %v3530_v3 = vld [vmem:[#allocation16 + $0x10] sm:$0xff]   ;;  %p3989_p6 = scmp.ne.s32.totalorder %s3183_s6, %s3988_s19  ;;  %p3994_p8 = scmp.lt.s32.totalorder %s3988_s19, %s3988_s19 }
  0xf1   :  { %272 = vmatpush1.bf16.msra.mxu0 %v254_v15  ;;  %v3201_v22 = vadd.f32 -1.0, %v218_v19  ;;  %v3202_v24 = vadd.f32 -1.0, %v219_v20  ;;  %v4325_v30 = vsub.s32 1, %v525_v28  ;;  %v4327_v31 = vsub.s32 0, %v525_v28  ;;  %v3528_v1 = vld [vmem:[#allocation16] sm:$0xff]   ;;  %v3529_v2 = vld [vmem:[#allocation16 + $0x8] sm:$0xff]  }
  0xf2   :  { %3212 = vmatmul.mubr.msk.bf16.vlgmr.msra.gmra.mrb[0].mxu1 %vm248_vm1, %v4309_v7  ;;  %v4338_v36 = vsub.s32 2, %v525_v28  ;;  %v4344_v41 = vsub.s32 3, %v525_v28  ;;  %v411_v42 = vpack.c.bf16 %v410_v39, %v409_v38  ;;  %v4348_v44 = vsub.s32 4, %v525_v28  ;;  %v3531_v4 = vld [vmem:[#allocation16 + $0x18] sm:$0xff]   ;;  %v3532_v5 = vld [vmem:[#allocation16 + $0x20] sm:$0xff]   ;;  %v3533_v6 = vld [vmem:[#allocation16 + $0x28] sm:$0xff]   ;;  %p3995_p9 = por %p3994_p8, %p3993_p7 }
  0xf3   :  { %3430 = vmatpush3.bf16.msra.mxu1 %v3516_v8  ;;  %3445 = vmatprep.mubr.msk.bf16.mxu1 %vm4049_vm2, %v5206_v9  ;;  %v222_v25 = vmul.f32 1e+30, %v3201_v22  ;;  %v223_v26 = vmul.f32 1e+30, %v3202_v24  ;;  %v4350_v45 = vsub.s32 5, %v525_v28  ;;  %v4354_v47 = vsub.s32 6, %v525_v28 }
  0xf4   :  { %3431 = vmatprep.subr.bf16.mxu1 %v5206_v9  ;;  %3210 = vmatmul.mubr.msk.bf16.vlgmr.msra.gmra.mrb[0].mxu0 %vm248_vm1, %v4309_v7  ;;  %5265 = vst [vmem:[#allocation34_spill] sm:$0xff] %v4344_v41  ;;  %v4357_v49 = vsub.s32 7, %v525_v28  ;;  %v3208_v62 = vcombine.high %v232_v61, %v232_v61  ;;  %v3207_v63 = vcombine.low %v232_v61, %v232_v61  ;;  %v3535_v8 = vld [vmem:[#allocation16 + $0x38] sm:$0xff]   ;;  %p3996_p10 = pnand %p3995_p9, %p3989_p6 }
  0xf5   :  { %389 = vmatprep.mubr.bf16.mxu0 %v4047_v0  ;;  %225 = vst.msk [vmem:[#allocation2] sm:$0xff] %vm224_vm3, %v222_v25  ;;  %226 = vst.msk [vmem:[#allocation2 + $0x8] sm:$0xff] %vm224_vm3, %v223_v26 }
  0xf6   :  { %3213 = vmatprep.subr.msk.bf16.mxu0 %vm252_vm0, %v3208_v62 }
  0xf7   :  { %3432 = vmatpush3.bf16.msra.mxu1 %v3517_v11 }
  0xf8   :  { %3433 = vmatprep.subr.bf16.mxu1 %v5206_v9 }
  0xfb   :  { %3434 = vmatpush3.bf16.msra.mxu1 %v3518_v14 }
  0xfc   :  { %3435 = vmatprep.subr.bf16.mxu1 %v5206_v9  ;;  %v523_v33 = vld [vmem:[#allocation2] sm:$0xff]  ;;  %v681_v52 = vld [vmem:[#allocation2 + $0x8] sm:$0xff] }
  0xfd   :  { %v4331_v34 = vrot.slane %v523_v33, %v4325_v30  ;;  %v4334_v35 = vrot.slane %v523_v33, %v4327_v31  ;;  %v549_v40 = vrot.slane %v523_v33, %v4338_v36  ;;  %v560_v43 = vrot.slane %v523_v33, %v4344_v41 }
  0xfe   :  { %v571_v46 = vrot.slane %v523_v33, %v4348_v44  ;;  %v582_v48 = vrot.slane %v523_v33, %v4350_v45  ;;  %v593_v50 = vrot.slane %v523_v33, %v4354_v47  ;;  %v604_v51 = vrot.slane %v523_v33, %v4357_v49 }
  0xff   :  { %3436 = vmatpush3.bf16.msra.mxu1 %v3519_v21  ;;  %540 = vbcast.lane.b32.xlu1 %v4331_v34, 256  ;;  %v685_v53 = vrot.slane %v681_v52, %v4327_v31  ;;  %v696_v54 = vrot.slane %v681_v52, %v4325_v30  ;;  %v707_v55 = vrot.slane %v681_v52, %v4338_v36 }
 0x100   :  { %3437 = vmatprep.subr.bf16.mxu1 %v5206_v9  ;;  %529 = vbcast.lane.b32.xlu0 %v4334_v35, 256  ;;  %v718_v56 = vrot.slane %v681_v52, %v4344_v41  ;;  %v729_v57 = vrot.slane %v681_v52, %v4348_v44  ;;  %v740_v58 = vrot.slane %v681_v52, %v4350_v45 }
 0x101   :  { %v751_v59 = vrot.slane %v681_v52, %v4354_v47  ;;  %v762_v60 = vrot.slane %v681_v52, %v4357_v49 }
 0x103   :  { %3438 = vmatpush3.bf16.msra.mxu1 %v3520_v27  ;;  %544 = vbcast.lane.b32.xlu1 %v4331_v34, 264 }
 0x104   :  { %3439 = vmatprep.subr.bf16.mxu1 %v5206_v9  ;;  %533 = vbcast.lane.b32.xlu0 %v4334_v35, 264 }
 0x107   :  { %3440 = vmatpush3.bf16.msra.mxu1 %v3521_v29  ;;  %555 = vbcast.lane.b32.xlu1 %v549_v40, 264 }
 0x108   :  { %3441 = vmatprep.subr.bf16.mxu1 %v5206_v9  ;;  %551 = vbcast.lane.b32.xlu0 %v549_v40, 256 }
 0x10b   :  { %3442 = vmatpush3.bf16.msra.mxu1 %v3523_v32  ;;  %566 = vbcast.lane.b32.xlu1 %v560_v43, 264 }
 0x10c   :  { %3443 = vmatprep.subr.bf16.mxu1 %v5206_v9  ;;  %562 = vbcast.lane.b32.xlu0 %v560_v43, 256 }
 0x10f   :  { %3444 = vmatpush3.bf16.msra.mxu1 %v3525_v37  ;;  %577 = vbcast.lane.b32.xlu1 %v571_v46, 264 }
 0x110   :  { %573 = vbcast.lane.b32.xlu0 %v571_v46, 256 }
 0x112   :  { %3446 = vmatmul.mubr.bf16.vlgmr.msra.gmra.mrb[4].mxu1 %v411_v42 }
 0x113   :  { %1119 = vmatprep.mubr.bf16.mxu1 %v4047_v0  ;;  %588 = vbcast.lane.b32.xlu1 %v582_v48, 264  ;;  %v266_v0 = vsel %vm252_vm0, %v3207_v63, 0 }
 0x114   :  { %584 = vbcast.lane.b32.xlu0 %v582_v48, 256  ;;  %358 = vmatpush1.bf16.msra.mxu0 %v266_v0 }
 0x115   :  { %3449 = vmatprep.subr.bf16.mxu0 %v5206_v9 }
 0x117   :  { %599 = vbcast.lane.b32.xlu1 %v593_v50, 264  ;;  %3214 = vmatmul.mubr.msk.bf16.vlgmr.msra.gmra.mrb[4].mxu0 %vm248_vm1, %v4309_v7  ;;  %v3534_v7 = vld [vmem:[#allocation16 + $0x30] sm:$0xff]  }
 0x118   :  { %595 = vbcast.lane.b32.xlu0 %v593_v50, 256  ;;  %3465 = vmatprep.mubr.msk.bf16.mxu0 %vm4049_vm2, %v5206_v9 }
 0x119   :  { %3450 = vmatpush3.bf16.msra.mxu0 %v3528_v1 }
 0x11a   :  { %3451 = vmatprep.subr.bf16.mxu0 %v5206_v9 }
 0x11b   :  { %610 = vbcast.lane.b32.xlu1 %v604_v51, 264 }
 0x11c   :  { %606 = vbcast.lane.b32.xlu0 %v604_v51, 256 }
 0x11d   :  { %3452 = vmatpush3.bf16.msra.mxu0 %v3529_v2 }
 0x11e   :  { %3453 = vmatprep.subr.bf16.mxu0 %v5206_v9 }
 0x11f   :  { %691 = vbcast.lane.b32.xlu1 %v685_v53, 264 }
 0x120   :  { %687 = vbcast.lane.b32.xlu0 %v685_v53, 256 }
 0x121   :  { %3454 = vmatpush3.bf16.msra.mxu0 %v3530_v3 }
 0x122   :  { %3455 = vmatprep.subr.bf16.mxu0 %v5206_v9 }
 0x123   :  { %702 = vbcast.lane.b32.xlu1 %v696_v54, 264 }
 0x124   :  { %698 = vbcast.lane.b32.xlu0 %v696_v54, 256 }
 0x125   :  { %3456 = vmatpush3.bf16.msra.mxu0 %v3531_v4 }
 0x126   :  { %3457 = vmatprep.subr.bf16.mxu0 %v5206_v9 }
 0x127   :  { %713 = vbcast.lane.b32.xlu1 %v707_v55, 264 }
 0x128   :  { %709 = vbcast.lane.b32.xlu0 %v707_v55, 256 }
 0x129   :  { %3458 = vmatpush3.bf16.msra.mxu0 %v3532_v5 }
 0x12a   :  { %3459 = vmatprep.subr.bf16.mxu0 %v5206_v9 }
 0x12b   :  { %724 = vbcast.lane.b32.xlu1 %v718_v56, 264 }
 0x12c   :  { %720 = vbcast.lane.b32.xlu0 %v718_v56, 256 }
 0x12d   :  { %3460 = vmatpush3.bf16.msra.mxu0 %v3533_v6 }
 0x12e   :  { %3461 = vmatprep.subr.bf16.mxu0 %v5206_v9 }
 0x12f   :  { %735 = vbcast.lane.b32.xlu1 %v729_v57, 264 }
 0x130   :  { %731 = vbcast.lane.b32.xlu0 %v729_v57, 256 }
 0x131   :  { %3462 = vmatpush3.bf16.msra.mxu0 %v3534_v7 }
 0x132   :  { %3463 = vmatprep.subr.bf16.mxu0 %v5206_v9 }
 0x133   :  { %746 = vbcast.lane.b32.xlu1 %v740_v58, 264 }
 0x134   :  { %742 = vbcast.lane.b32.xlu0 %v740_v58, 256 }
 0x135   :  { %3464 = vmatpush3.bf16.msra.mxu0 %v3535_v8 }
 0x137   :  { %757 = vbcast.lane.b32.xlu1 %v751_v59, 264 }
 0x138   :  { %753 = vbcast.lane.b32.xlu0 %v751_v59, 256 }
 0x13b   :  { %768 = vbcast.lane.b32.xlu1 %v762_v60, 264 }
 0x13c   :  { %764 = vbcast.lane.b32.xlu0 %v762_v60, 256 }
 0x13f   :  { %1146 = vbcast.lane.b32.xlu1 %v4334_v35, 264 }
 0x140   :  { %1142 = vbcast.lane.b32.xlu0 %v4334_v35, 256 }
 0x143   :  { %1157 = vbcast.lane.b32.xlu1 %v4331_v34, 264 }
 0x144   :  { %1153 = vbcast.lane.b32.xlu0 %v4331_v34, 256 }
 0x147   :  { %1168 = vbcast.lane.b32.xlu1 %v549_v40, 264 }
 0x148   :  { %1164 = vbcast.lane.b32.xlu0 %v549_v40, 256 }
 0x14b   :  { %1179 = vbcast.lane.b32.xlu1 %v560_v43, 264 }
 0x14c   :  { %1175 = vbcast.lane.b32.xlu0 %v560_v43, 256 }
 0x14f   :  { %1190 = vbcast.lane.b32.xlu1 %v571_v46, 264 }
 0x150   :  { %1186 = vbcast.lane.b32.xlu0 %v571_v46, 256 }
 0x153   :  { %1201 = vbcast.lane.b32.xlu1 %v582_v48, 264 }
 0x154   :  { %1197 = vbcast.lane.b32.xlu0 %v582_v48, 256 }
 0x157   :  { %1212 = vbcast.lane.b32.xlu1 %v593_v50, 264 }
 0x158   :  { %1208 = vbcast.lane.b32.xlu0 %v593_v50, 256 }
 0x15b   :  { %1223 = vbcast.lane.b32.xlu1 %v604_v51, 264 }
 0x15c   :  { %1219 = vbcast.lane.b32.xlu0 %v604_v51, 256 }
 0x15f   :  { %1365 = vbcast.lane.b32.xlu1 %v685_v53, 264 }
 0x160   :  { %1361 = vbcast.lane.b32.xlu0 %v685_v53, 256 }
 0x163   :  { %1376 = vbcast.lane.b32.xlu1 %v696_v54, 264 }
 0x164   :  { %1372 = vbcast.lane.b32.xlu0 %v696_v54, 256 }
 0x167   :  { %1387 = vbcast.lane.b32.xlu1 %v707_v55, 264 }
 0x168   :  { %1383 = vbcast.lane.b32.xlu0 %v707_v55, 256 }
 0x16b   :  { %1398 = vbcast.lane.b32.xlu1 %v718_v56, 264 }
 0x16c   :  { %1394 = vbcast.lane.b32.xlu0 %v718_v56, 256 }
 0x16f   :  { %1409 = vbcast.lane.b32.xlu1 %v729_v57, 264 }
 0x170   :  { %1405 = vbcast.lane.b32.xlu0 %v729_v57, 256 }
 0x171   :  { %v541_v10 = vpop.permute.xlu1 %540 }
 0x172   :  { %v530_v11 = vpop.permute.xlu0 %529 }
 0x173   :  { %1420 = vbcast.lane.b32.xlu1 %v740_v58, 264 }
 0x174   :  { %1416 = vbcast.lane.b32.xlu0 %v740_v58, 256 }
 0x175   :  { %v545_v12 = vpop.permute.xlu1 %544 }
 0x176   :  { %v534_v13 = vpop.permute.xlu0 %533 }
 0x177   :  { %1431 = vbcast.lane.b32.xlu1 %v751_v59, 264 }
 0x178   :  { %1427 = vbcast.lane.b32.xlu0 %v751_v59, 256 }
 0x179   :  { %v556_v14 = vpop.permute.xlu1 %555 }
 0x17a   :  { %v552_v15 = vpop.permute.xlu0 %551 }
 0x17b   :  { %1442 = vbcast.lane.b32.xlu1 %v762_v60, 264 }
 0x17c   :  { %1438 = vbcast.lane.b32.xlu0 %v762_v60, 256 }
 0x17d   :  { %v567_v16 = vpop.permute.xlu1 %566 }
 0x17e   :  { %v563_v17 = vpop.permute.xlu0 %562 }
 0x181   :  { %v578_v19 = vpop.permute.xlu1 %577 }
 0x182   :  { %v574_v21 = vpop.permute.xlu0 %573 }
 0x185   :  { %v589_v24 = vpop.permute.xlu1 %588 }
 0x186   :  { %v585_v26 = vpop.permute.xlu0 %584 }
 0x189   :  { %v600_v32 = vpop.permute.xlu1 %599 }
 0x18a   :  { %v596_v33 = vpop.permute.xlu0 %595 }
 0x18d   :  { %v611_v34 = vpop.permute.xlu1 %610 }
 0x18e   :  { %v607_v35 = vpop.permute.xlu0 %606 }
 0x191   :  { %v692_v37 = vpop.permute.xlu1 %691 }
 0x192   :  { %v688_v38 = vpop.permute.xlu0 %687 }
 0x195   :  { %v703_v39 = vpop.permute.xlu1 %702 }
 0x196   :  { %v4403_v40 = vpop.permute.xlu0 %698 }
 0x199   :  { %v714_v53 = vpop.permute.xlu1 %713 }
 0x19a   :  { %v710_v54 = vpop.permute.xlu0 %709 }
 0x19d   :  { %v725_v0 = vpop.permute.xlu1 %724 }
 0x19e   :  { %v721_v1 = vpop.permute.xlu0 %720 }
 0x1c5   :  { %v4387_v18 = vpop.f32.mrb[0].mxu1 }
 0x1c6   :  { %5266 = vst [vmem:[#allocation35_spill] sm:$0xff] %v4387_v18  ;;  %v4389_v20 = vpop.f32.mrb[1].mxu1 }
 0x1c7   :  { %5267 = vst [vmem:[#allocation36_spill] sm:$0xff] %v4389_v20  ;;  %v4391_v22 = vpop.f32.mrb[2].mxu1  ;;  %v4395_v25 = vpop.f32.mrb[0].mxu0 }
 0x1c8   :  { %5268 = vst [vmem:[#allocation37_spill] sm:$0xff] %v4391_v22  ;;  %v4393_v23 = vpop.f32.mrb[3].mxu1  ;;  %v4397_v27 = vpop.f32.mrb[1].mxu0 }
 0x1c9   :  { %5269 = vst [vmem:[#allocation38_spill] sm:$0xff] %v4393_v23  ;;  %5270 = vst [vmem:[#allocation39_spill] sm:$0xff] %v4397_v27  ;;  %v4399_v28 = vpop.f32.mrb[2].mxu0 }
 0x1ca   :  { %v4401_v29 = vpop.f32.mrb[3].mxu0 }
 0x1cb   :  { %5271 = vst [vmem:[#allocation40_spill] sm:$0xff] %v4401_v29 }
 0x1e5   :  { %v510_v42 = vpop.f32.mrb[4].mxu1 }
 0x1e6   :  { %v511_v43 = vadd.f32 %v510_v42, %v4395_v25  ;;  %v3447_v46 = vpop.f32.mrb[5].mxu1 }
 0x1e7   :  { %v513_v48 = vpop.f32.mrb[6].mxu1 }
 0x1e8   :  { %v4407_v50 = vadd.f32 %v513_v48, %v4399_v28  ;;  %v3448_v51 = vpop.f32.mrb[7].mxu1  ;;  %v615_v52 = vrot.slane %v511_v43, %v4327_v31  ;;  %v623_v55 = vrot.slane %v511_v43, %v4325_v30  ;;  %v631_v56 = vrot.slane %v511_v43, %v4338_v36 }
 0x1e9   :  { %v639_v59 = vrot.slane %v511_v43, %v4344_v41  ;;  %v647_v2 = vrot.slane %v511_v43, %v4348_v44  ;;  %v655_v7 = vrot.slane %v511_v43, %v4350_v45  ;;  %v663_v46 = vrot.slane %v511_v43, %v4354_v47 }
 0x1ea   :  { %v617_v57 = vadd.f32 %v615_v52, %v534_v13  ;;  %v616_v58 = vadd.f32 %v615_v52, %v530_v11  ;;  %v625_v60 = vadd.f32 %v623_v55, %v545_v12  ;;  %v624_v63 = vadd.f32 %v623_v55, %v541_v10  ;;  %v736_v52 = vpop.permute.xlu1 %735  ;;  %v732_v55 = vpop.permute.xlu0 %731 }
 0x1eb   :  { %v633_v3 = vadd.f32 %v631_v56, %v556_v14  ;;  %v632_v6 = vadd.f32 %v631_v56, %v552_v15  ;;  %v641_v8 = vadd.f32 %v639_v59, %v567_v16  ;;  %v640_v11 = vadd.f32 %v639_v59, %v563_v17 }
 0x1ec   :  { %v619_v61 = vmax.f32 %v617_v57, -1e+30  ;;  %v618_v62 = vmax.f32 %v616_v58, -1e+30  ;;  %v649_v12 = vadd.f32 %v647_v2, %v578_v19  ;;  %v648_v10 = vadd.f32 %v647_v2, %v574_v21 }
 0x1ed   :  { %v671_v57 = vrot.slane %v511_v43, %v4357_v49  ;;  %v657_v14 = vadd.f32 %v655_v7, %v589_v24  ;;  %v656_v15 = vadd.f32 %v655_v7, %v585_v26  ;;  %v773_v16 = vrot.slane %v4407_v50, %v4327_v31 }
 0x1ee   :  { %v627_v4 = vmax.f32 %v619_v61, %v625_v60  ;;  %v626_v5 = vmax.f32 %v618_v62, %v624_v63  ;;  %v665_v56 = vadd.f32 %v663_v46, %v600_v32  ;;  %v664_v59 = vadd.f32 %v663_v46, %v596_v33  ;;  %v743_v43 = vpop.permute.xlu0 %742 }
 0x1ef   :  { %v673_v62 = vadd.f32 %v671_v57, %v611_v34  ;;  %v781_v19 = vrot.slane %v4407_v50, %v4325_v30  ;;  %v672_v2 = vadd.f32 %v671_v57, %v607_v35  ;;  %v775_v24 = vadd.f32 %v773_v16, %v692_v37 }
 0x1f0   :  { %v635_v42 = vmax.f32 %v627_v4, %v633_v3  ;;  %v634_v13 = vmax.f32 %v626_v5, %v632_v6  ;;  %v747_v3 = vpop.permute.xlu1 %746  ;;  %v789_v26 = vrot.slane %v4407_v50, %v4338_v36  ;;  %v774_v6 = vadd.f32 %v773_v16, %v688_v38 }
 0x1f1   :  { %v797_v32 = vrot.slane %v4407_v50, %v4344_v41  ;;  %v783_v33 = vadd.f32 %v781_v19, %v703_v39  ;;  %v805_v35 = vrot.slane %v4407_v50, %v4348_v44  ;;  %v813_v46 = vrot.slane %v4407_v50, %v4350_v45 }
 0x1f2   :  { %v643_v48 = vmax.f32 %v635_v42, %v641_v8  ;;  %v642_v51 = vmax.f32 %v634_v13, %v640_v11  ;;  %v782_v8 = vadd.f32 %v781_v19, %v4403_v40  ;;  %v791_v42 = vadd.f32 %v789_v26, %v714_v53  ;;  %v754_v38 = vpop.permute.xlu0 %753 }
 0x1f3   :  { %v790_v11 = vadd.f32 %v789_v26, %v710_v54  ;;  %v798_v39 = vadd.f32 %v797_v32, %v721_v1  ;;  %v821_v57 = vrot.slane %v4407_v50, %v4354_v47  ;;  %v807_v40 = vadd.f32 %v805_v35, %v736_v52  ;;  %v4436_v26 = vpop.f32.mrb[4].mxu0 }
 0x1f4   :  { %v651_v58 = vmax.f32 %v643_v48, %v649_v12  ;;  %v650_v60 = vmax.f32 %v642_v51, %v648_v10  ;;  %v758_v12 = vpop.permute.xlu1 %757  ;;  %v799_v48 = vadd.f32 %v797_v32, %v725_v0  ;;  %v815_v53 = vadd.f32 %v813_v46, %v747_v3  ;;  %5272 = vst [vmem:[#allocation41_spill] sm:$0xff] %v4436_v26  ;;  %v3536_v32 = vld [vmem:[#allocation12] ss:$8 sps:$4 sm:$0xff]  }
 0x1f5   :  { %v814_v54 = vadd.f32 %v813_v46, %v743_v43  ;;  %v822_v1 = vadd.f32 %v821_v57, %v754_v38  ;;  %v3556_v46 = vld [vmem:[#allocation12 + $0x64] ss:$8 sps:$4 sm:$0xff]   ;;  %v3557_v38 = vld [vmem:[#allocation12 + $0x70] ss:$8 sps:$4 sm:$0xff]  }
 0x1f6   :  { %v659_v61 = vmax.f32 %v651_v58, %v657_v14  ;;  %v658_v17 = vmax.f32 %v650_v60, %v656_v15  ;;  %v806_v60 = vadd.f32 %v805_v35, %v732_v55  ;;  %v3550_v35 = vld [vmem:[#allocation12 + $0x44] ss:$8 sps:$4 sm:$0xff]  }
 0x1f8   :  { %v667_v21 = vmax.f32 %v659_v61, %v665_v56  ;;  %v666_v63 = vmax.f32 %v658_v17, %v664_v59  ;;  %v829_v56 = vrot.slane %v4407_v50, %v4357_v49  ;;  %v769_v61 = vpop.permute.xlu1 %768  ;;  %v765_v17 = vpop.permute.xlu0 %764  ;;  %v823_v59 = vadd.f32 %v821_v57, %v758_v12  ;;  %v3559_v12 = vld [vmem:[#allocation12 + $0x74] ss:$8 sps:$4 sm:$0xff]  }
 0x1f9   :  { %v4438_v50 = vpop.f32.mrb[5].mxu0  ;;  %v3568_v57 = vld [vmem:[#allocation18 + $0x24] ss:$8 sps:$4 sm:$0xff]  }
 0x1fa   :  { %v675_v4 = vmax.f32 %v667_v21, %v673_v62  ;;  %v674_v5 = vmax.f32 %v666_v63, %v672_v2  ;;  %v831_v63 = vadd.f32 %v829_v56, %v769_v61  ;;  %v830_v52 = vadd.f32 %v829_v56, %v765_v17  ;;  %5273 = vst [vmem:[#allocation42_spill] sm:$0xff] %v4438_v50 }
 0x1fc   :  { %v777_v34 = vmax.f32 %v675_v4, %v775_v24  ;;  %v776_v7 = vmax.f32 %v674_v5, %v774_v6  ;;  %v4440_v4 = vpop.f32.mrb[6].mxu0  ;;  %v3538_v6 = vld [vmem:[#allocation12 + $0x4] ss:$8 sps:$4 sm:$0xff]  }
 0x1fd   :  { %5274 = vst [vmem:[#allocation43_spill] sm:$0xff] %v4440_v4  ;;  %v4442_v5 = vpop.f32.mrb[7].mxu0  ;;  %1087 = vmatprep.subr.bf16.mxu1 %v3538_v6 }
 0x1fe   :  { %v785_v13 = vmax.f32 %v777_v34, %v783_v33  ;;  %v784_v37 = vmax.f32 %v776_v7, %v782_v8  ;;  %5275 = vst [vmem:[#allocation44_spill] sm:$0xff] %v4442_v5  ;;  %1088 = vmatpush1.bf16.msra.mxu1 %v3536_v32  ;;  %v3541_v33 = vld [vmem:[#allocation12 + $0x14] ss:$8 sps:$4 sm:$0xff]   ;;  %v3539_v34 = vld [vmem:[#allocation12 + $0x10] ss:$8 sps:$4 sm:$0xff]  }
 0x1ff   :  { %1089 = vmatprep.subr.bf16.mxu1 %v3541_v33  ;;  %v3547_v7 = vld [vmem:[#allocation12 + $0x34] ss:$8 sps:$4 sm:$0xff]   ;;  %v3545_v8 = vld [vmem:[#allocation12 + $0x30] ss:$8 sps:$4 sm:$0xff]  }
 0x200   :  { %v793_v51 = vmax.f32 %v785_v13, %v791_v42  ;;  %v792_v10 = vmax.f32 %v784_v37, %v790_v11  ;;  %v3548_v42 = vld [vmem:[#allocation12 + $0x40] ss:$8 sps:$4 sm:$0xff]   ;;  %v3553_v13 = vld [vmem:[#allocation12 + $0x54] ss:$8 sps:$4 sm:$0xff]   ;;  %v3551_v37 = vld [vmem:[#allocation12 + $0x50] ss:$8 sps:$4 sm:$0xff]  }
 0x201   :  { %v3554_v11 = vld [vmem:[#allocation12 + $0x60] ss:$8 sps:$4 sm:$0xff]  }
 0x202   :  { %v801_v14 = vmax.f32 %v793_v51, %v799_v48  ;;  %v800_v58 = vmax.f32 %v792_v10, %v798_v39  ;;  %1090 = vmatpush1.bf16.msra.mxu1 %v3539_v34  ;;  %v3560_v48 = vld [vmem:[#allocation18] ss:$8 sps:$4 sm:$0xff]   ;;  %v3562_v51 = vld [vmem:[#allocation18 + $0x4] ss:$8 sps:$4 sm:$0xff]   ;;  %v3565_v10 = vld [vmem:[#allocation18 + $0x14] ss:$8 sps:$4 sm:$0xff]  }
 0x203   :  { %1770 = vmatprep.subr.bf16.mxu0 %v3562_v51  ;;  %v3563_v39 = vld [vmem:[#allocation18 + $0x10] ss:$8 sps:$4 sm:$0xff]  }
 0x204   :  { %v809_v15 = vmax.f32 %v801_v14, %v807_v40  ;;  %v808_v16 = vmax.f32 %v800_v58, %v806_v60  ;;  %v3566_v40 = vld [vmem:[#allocation18 + $0x20] ss:$8 sps:$4 sm:$0xff]   ;;  %v3571_v14 = vld [vmem:[#allocation18 + $0x34] ss:$8 sps:$4 sm:$0xff]   ;;  %v3569_v58 = vld [vmem:[#allocation18 + $0x30] ss:$8 sps:$4 sm:$0xff]  }
 0x205   :  { %v3574_v60 = vld [vmem:[#allocation18 + $0x44] ss:$8 sps:$4 sm:$0xff]  }
 0x206   :  { %v817_v0 = vmax.f32 %v809_v15, %v815_v53  ;;  %v816_v62 = vmax.f32 %v808_v16, %v814_v54  ;;  %v3572_v53 = vld [vmem:[#allocation18 + $0x40] ss:$8 sps:$4 sm:$0xff]  }
 0x208   :  { %v825_v19 = vmax.f32 %v817_v0, %v823_v59  ;;  %v824_v21 = vmax.f32 %v816_v62, %v822_v1 }
 0x20a   :  { %v833_v2 = vmax.f32 %v825_v19, %v831_v63  ;;  %v832_v24 = vmax.f32 %v824_v21, %v830_v52 }
 0x20c   :  { %v835_v55 = vsub.f32 %v833_v2, %v4399_v28  ;;  %v834_v3 = vsub.f32 %v832_v24, %v4395_v25  ;;  %v3544_v28 = vld [vmem:[#allocation12 + $0x24] ss:$8 sps:$4 sm:$0xff]   ;;  %v3542_v25 = vld [vmem:[#allocation12 + $0x20] ss:$8 sps:$4 sm:$0xff]  }
 0x20d   :  { %1091 = vmatprep.subr.bf16.mxu1 %v3544_v28 }
 0x20e   :  { %v836_v43 = vpack.c.bf16 %v835_v55, %v834_v3  ;;  %1092 = vmatpush1.bf16.msra.mxu1 %v3542_v25 }
 0x20f   :  { %1093 = vmatprep.subr.bf16.mxu1 %v3547_v7 }
 0x210   :  { %3466 = vmatmul.mubr.bf16.vlgmr.msra.gmra.mrb[8].mxu0 %v836_v43 }
 0x211   :  { %1771 = vmatpush1.bf16.msra.mxu0 %v3560_v48 }
 0x212   :  { %1094 = vmatpush1.bf16.msra.mxu1 %v3545_v8  ;;  %1772 = vmatprep.subr.bf16.mxu0 %v3565_v10  ;;  %v3231_v8 = vld [vmem:[#allocation21] ss:$0 sm:$0xff]  ;;  %v3575_v10 = vld [vmem:[#allocation18 + $0x50] ss:$8 sps:$4 sm:$0xff]  }
 0x213   :  { %1095 = vmatprep.subr.bf16.mxu1 %v3550_v35 }
 0x215   :  { %1773 = vmatpush1.bf16.msra.mxu0 %v3563_v39  ;;  %v3577_v39 = vld [vmem:[#allocation18 + $0x54] ss:$8 sps:$4 sm:$0xff]  }
 0x216   :  { %1096 = vmatpush1.bf16.msra.mxu1 %v3548_v42  ;;  %1774 = vmatprep.subr.bf16.mxu0 %v3568_v57  ;;  %v3580_v57 = vld [vmem:[#allocation18 + $0x64] ss:$8 sps:$4 sm:$0xff]  }
 0x217   :  { %1097 = vmatprep.subr.bf16.mxu1 %v3553_v13  ;;  %v3232_v13 = vld [vmem:[#allocation22] ss:$0 sm:$0xff] }
 0x219   :  { %1775 = vmatpush1.bf16.msra.mxu0 %v3566_v40  ;;  %v3578_v40 = vld [vmem:[#allocation18 + $0x60] ss:$8 sps:$4 sm:$0xff]  }
 0x21a   :  { %1098 = vmatpush1.bf16.msra.mxu1 %v3551_v37  ;;  %1776 = vmatprep.subr.bf16.mxu0 %v3571_v14  ;;  %v3583_v14 = vld [vmem:[#allocation18 + $0x74] ss:$8 sps:$4 sm:$0xff]  }
 0x21b   :  { %1099 = vmatprep.subr.bf16.mxu1 %v3556_v46 }
 0x21d   :  { %1777 = vmatpush1.bf16.msra.mxu0 %v3569_v58  ;;  %v3581_v58 = vld [vmem:[#allocation18 + $0x70] ss:$8 sps:$4 sm:$0xff]  }
 0x21e   :  { %1100 = vmatpush1.bf16.msra.mxu1 %v3554_v11  ;;  %1778 = vmatprep.subr.bf16.mxu0 %v3574_v60  ;;  %v3586_v60 = vld [vmem:[#allocation18 + $0x84] ss:$8 sps:$4 sm:$0xff]  }
 0x21f   :  { %1101 = vmatprep.subr.bf16.mxu1 %v3559_v12 }
 0x221   :  { %1779 = vmatpush1.bf16.msra.mxu0 %v3572_v53  ;;  %v3584_v53 = vld [vmem:[#allocation18 + $0x80] ss:$8 sps:$4 sm:$0xff]  }
 0x222   :  { %1102 = vmatpush1.bf16.msra.mxu1 %v3557_v38  ;;  %1780 = vmatprep.subr.bf16.mxu0 %v3577_v39 }
 0x225   :  { %1781 = vmatpush1.bf16.msra.mxu0 %v3575_v10 }
 0x226   :  { %1782 = vmatprep.subr.bf16.mxu0 %v3580_v57 }
 0x229   :  { %1783 = vmatpush1.bf16.msra.mxu0 %v3578_v40 }
 0x22a   :  { %1784 = vmatprep.subr.bf16.mxu0 %v3583_v14 }
 0x22d   :  { %1785 = vmatpush1.bf16.msra.mxu0 %v3581_v58 }
 0x22e   :  { %1786 = vmatprep.subr.bf16.mxu0 %v3586_v60 }
 0x231   :  { %1787 = vmatpush1.bf16.msra.mxu0 %v3584_v53 }
 0x2e3   :  { %v935_v15 = vpop.f32.mrb[8].mxu0 }
 0x2e4   :  { %v3467_v16 = vpop.f32.mrb[9].mxu0 }
 0x2e5   :  { %v938_v54 = vpop.f32.mrb[10].mxu0  ;;  %v3587_v16 = vld [vmem:[#allocation18 + $0x90] ss:$8 sps:$4 sm:$0xff]  }
 0x2e6   :  { %v946_v56 = vadd.f32 %v938_v54, %v935_v15  ;;  %v3468_v61 = vpop.f32.mrb[11].mxu0 }
 0x2e7   :  { %v3595_v61 = vld [vmem:[#allocation18 + $0xb4] ss:$8 sps:$4 sm:$0xff]  }
 0x2e8   :  { %v947_v17 = vrot.slane %v946_v56, 4 }
 0x2ea   :  { %v948_v0 = vadd.f32 %v947_v17, %v946_v56  ;;  %v3590_v56 = vld [vmem:[#allocation18 + $0xa0] ss:$8 sps:$4 sm:$0xff]   ;;  %v3593_v17 = vld [vmem:[#allocation18 + $0xb0] ss:$8 sps:$4 sm:$0xff]  }
 0x2ec   :  { %v949_v59 = vrot.slane %v948_v0, 2 }
 0x2ee   :  { %v950_v62 = vadd.f32 %v949_v59, %v948_v0  ;;  %v3598_v0 = vld [vmem:[#allocation18 + $0xc4] ss:$8 sps:$4 sm:$0xff]   ;;  %v3596_v59 = vld [vmem:[#allocation18 + $0xc0] ss:$8 sps:$4 sm:$0xff]  }
 0x2f0   :  { %v951_v1 = vrot.slane %v950_v62, 1 }
 0x2f2   :  { %v952_v19 = vadd.f32 %v951_v1, %v950_v62  ;;  %v3601_v62 = vld [vmem:[#allocation18 + $0xd4] ss:$8 sps:$4 sm:$0xff]   ;;  %v3599_v1 = vld [vmem:[#allocation18 + $0xd0] ss:$8 sps:$4 sm:$0xff]  }
 0x2f4   :  { %v953_v21 = vmul.f32 0.0625, %v952_v19  ;;  %v3604_v19 = vld [vmem:[#allocation18 + $0xe4] ss:$8 sps:$4 sm:$0xff]  }
 0x2f6   :  { %v954_v63 = vsub.f32 %v935_v15, %v953_v21  ;;  %v955_v52 = vsub.f32 %v938_v54, %v953_v21  ;;  %v3589_v15 = vld [vmem:[#allocation18 + $0x94] ss:$8 sps:$4 sm:$0xff]   ;;  %v3592_v54 = vld [vmem:[#allocation18 + $0xa4] ss:$8 sps:$4 sm:$0xff]   ;;  %v3602_v21 = vld [vmem:[#allocation18 + $0xe0] ss:$8 sps:$4 sm:$0xff]  }
 0x2f7   :  { %1788 = vmatprep.subr.bf16.mxu0 %v3589_v15 }
 0x2f8   :  { %v958_v2 = vmul.f32 %v954_v63, %v954_v63  ;;  %v959_v24 = vmul.f32 %v955_v52, %v955_v52  ;;  %1789 = vmatpush1.bf16.msra.mxu0 %v3587_v16 }
 0x2f9   :  { %1790 = vmatprep.subr.bf16.mxu0 %v3592_v54 }
 0x2fa   :  { %v960_v55 = vadd.f32 %v959_v24, %v958_v2  ;;  %v4444_v2 = vpop.permute.xlu0 %1142  ;;  %v1147_v24 = vpop.permute.xlu1 %1146 }
 0x2fc   :  { %v961_v3 = vrot.slane %v960_v55, 4  ;;  %1791 = vmatpush1.bf16.msra.mxu0 %v3590_v56 }
 0x2fd   :  { %1792 = vmatprep.subr.bf16.mxu0 %v3595_v61 }
 0x2fe   :  { %v962_v43 = vadd.f32 %v961_v3, %v960_v55  ;;  %v4446_v55 = vpop.permute.xlu0 %1153  ;;  %v1158_v3 = vpop.permute.xlu1 %1157 }
 0x300   :  { %v963_v6 = vrot.slane %v962_v43, 2  ;;  %1793 = vmatpush1.bf16.msra.mxu0 %v3593_v17 }
 0x301   :  { %1794 = vmatprep.subr.bf16.mxu0 %v3598_v0 }
 0x302   :  { %v964_v32 = vadd.f32 %v963_v6, %v962_v43  ;;  %v4448_v43 = vpop.permute.xlu0 %1164  ;;  %v4450_v6 = vpop.permute.xlu1 %1168 }
 0x304   :  { %v965_v33 = vrot.slane %v964_v32, 1  ;;  %1795 = vmatpush1.bf16.msra.mxu0 %v3596_v59 }
 0x305   :  { %1796 = vmatprep.subr.bf16.mxu0 %v3601_v62 }
 0x306   :  { %v966_v34 = vadd.f32 %v965_v33, %v964_v32  ;;  %v4452_v32 = vpop.permute.xlu0 %1175  ;;  %v4454_v33 = vpop.permute.xlu1 %1179 }
 0x308   :  { %v967_v28 = vmul.f32 0.0625, %v966_v34  ;;  %1797 = vmatpush1.bf16.msra.mxu0 %v3599_v1 }
 0x309   :  { %1798 = vmatprep.subr.bf16.mxu0 %v3604_v19 }
 0x30a   :  { %v968_v25 = vadd.f32 1e-05, %v967_v28  ;;  %v4456_v34 = vpop.permute.xlu0 %1186  ;;  %v4458_v28 = vpop.permute.xlu1 %1190 }
 0x30c   :  { %3696 = vrsqrt.f32 %v968_v25  ;;  %1799 = vmatpush1.bf16.msra.mxu0 %v3602_v21 }
 0x30e   :  { %v4460_v25 = vpop.permute.xlu0 %1197 }
 0x316   :  { %v3697_v7 = vpop.eup %3696 }
 0x317   :  { %v970_v35 = vmul.f32 %v3697_v7, %v954_v63  ;;  %v971_v42 = vmul.f32 %v3697_v7, %v955_v52  ;;  %v3607_v63 = vld [vmem:[#allocation18 + $0xf4] ss:$8 sps:$4 sm:$0xff]   ;;  %v3605_v52 = vld [vmem:[#allocation18 + $0xf0] ss:$8 sps:$4 sm:$0xff]   ;;  %v4462_v7 = vpop.permute.xlu1 %1201 }
 0x318   :  { %1800 = vmatprep.subr.bf16.mxu0 %v3607_v63 }
 0x319   :  { %v978_v37 = vmul.f32 %v3231_v8, %v970_v35  ;;  %v979_v11 = vmul.f32 %v3231_v8, %v971_v42  ;;  %1801 = vmatpush1.bf16.msra.mxu0 %v3605_v52  ;;  %v4464_v8 = vpop.permute.xlu0 %1208 }
 0x31a   :  { %5276 = vst [vmem:[#allocation45_spill] sm:$0xff] %v4464_v8 }
 0x31b   :  { %v986_v46 = vadd.f32 %v3232_v13, %v978_v37  ;;  %v987_v12 = vadd.f32 %v3232_v13, %v979_v11  ;;  %v4466_v35 = vpop.permute.xlu1 %1212 }
 0x31d   :  { %v989_v38 = vmax.f32 %v987_v12, 0.0  ;;  %v988_v48 = vmax.f32 %v986_v46, 0.0  ;;  %v4468_v42 = vpop.permute.xlu0 %1219 }
 0x31e   :  { %5277 = vst [vmem:[#allocation46_spill] sm:$0xff] %v4468_v42 }
 0x31f   :  { %v990_v51 = vpack.c.bf16 %v989_v38, %v988_v48  ;;  %v4470_v13 = vpop.permute.xlu1 %1223 }
 0x321   :  { %1120 = vmatmul.mubr.bf16.vlgmr.msra.gmra.mrb[8].mxu1 %v990_v51  ;;  %v4472_v37 = vpop.permute.xlu0 %1361 }
 0x322   :  { %5278 = vst [vmem:[#allocation47_spill] sm:$0xff] %v4472_v37 }
 0x323   :  { %v4474_v11 = vpop.permute.xlu1 %1365 }
 0x325   :  { %v4476_v46 = vpop.permute.xlu0 %1372 }
 0x326   :  { %5279 = vst [vmem:[#allocation48_spill] sm:$0xff] %v4476_v46 }
 0x327   :  { %v4478_v38 = vpop.permute.xlu1 %1376 }
 0x329   :  { %v4484_v57 = vpop.permute.xlu0 %1383 }
 0x32b   :  { %v4493_v16 = vpop.permute.xlu1 %1387 }
 0x32d   :  { %v4499_v59 = vpop.permute.xlu0 %1394 }
 0x3f4   :  { %v1121_v12 = vpop.f32.mrb[8].mxu1 }
 0x3f5   :  { %v1122_v48 = vadd.f32 %v1121_v12, %v4397_v27  ;;  %v1123_v51 = vpop.f32.mrb[9].mxu1 }
 0x3f6   :  { %v4482_v10 = vadd.f32 %v1123_v51, %v4387_v18  ;;  %v1125_v39 = vpop.f32.mrb[10].mxu1  ;;  %v4541_v18 = vpop.permute.xlu0 %1405 }
 0x3f7   :  { %v1228_v40 = vrot.slane %v1122_v48, %v4327_v31  ;;  %v1244_v14 = vrot.slane %v1122_v48, %v4325_v30  ;;  %v4489_v58 = vadd.f32 %v1125_v39, %v4401_v29  ;;  %v1127_v60 = vpop.f32.mrb[11].mxu1  ;;  %v1260_v15 = vrot.slane %v1122_v48, %v4338_v36 }
 0x3f8   :  { %v1276_v61 = vrot.slane %v1122_v48, %v4344_v41  ;;  %v1292_v17 = vrot.slane %v1122_v48, %v4348_v44  ;;  %v1308_v0 = vrot.slane %v1122_v48, %v4350_v45  ;;  %v4503_v62 = vrot.slane %v4482_v10, %v4327_v31 }
 0x3f9   :  { %v1233_v53 = vadd.f32 %v1228_v40, %v4444_v2  ;;  %v1249_v56 = vadd.f32 %v1244_v14, %v4446_v55  ;;  %v1265_v19 = vadd.f32 %v1260_v15, %v4448_v43  ;;  %v4508_v21 = vrot.slane %v4482_v10, %v4325_v30 }
 0x3fa   :  { %v4512_v63 = vrot.slane %v4482_v10, %v4338_v36  ;;  %v1324_v52 = vrot.slane %v1122_v48, %v4354_v47  ;;  %v4516_v12 = vrot.slane %v1122_v48, %v4357_v49  ;;  %v1281_v39 = vadd.f32 %v1276_v61, %v4452_v32  ;;  %v4530_v48 = vpop.permute.xlu1 %1398 }
 0x3fb   :  { %v1237_v54 = vmax.f32 %v1233_v53, -1e+30  ;;  %v4520_v53 = vadd.f32 %v1127_v60, %v4391_v22  ;;  %v1313_v9 = vadd.f32 %v1308_v0, %v4460_v25  ;;  %v1447_v5 = vrot.slane %v4489_v58, %v4327_v31 }
 0x3fc   :  { %v4528_v4 = vrot.slane %v4489_v58, %v4325_v30  ;;  %v1251_v60 = vadd.f32 %v1244_v14, %v1158_v3  ;;  %v1345_v23 = vadd.f32 %v4516_v12, %v4468_v42  ;;  %v1252_v26 = vadd.f32 %v4508_v21, %v1158_v3 }
 0x3fd   :  { %v1253_v1 = vmax.f32 %v1237_v54, %v1249_v56  ;;  %v1235_v54 = vadd.f32 %v1228_v40, %v1147_v24  ;;  %v1297_v56 = vadd.f32 %v1292_v17, %v4456_v34  ;;  %v1329_v40 = vadd.f32 %v1324_v52, %v4464_v8 }
 0x3fe   :  { %v4539_v20 = vrot.slane %v4482_v10, %v4344_v41  ;;  %v1452_v14 = vadd.f32 %v1447_v5, %v4472_v37  ;;  %v1283_v3 = vadd.f32 %v1276_v61, %v4454_v33  ;;  %v1299_v61 = vadd.f32 %v1292_v17, %v4458_v28 }
 0x3ff   :  { %v1269_v51 = vmax.f32 %v1253_v1, %v1265_v19  ;;  %v1236_v19 = vadd.f32 %v4503_v62, %v1147_v24  ;;  %v1239_v50 = vmax.f32 %v1235_v54, -1e+30  ;;  %v1267_v24 = vadd.f32 %v1260_v15, %v4450_v6 }
 0x400   :  { %v1268_v54 = vadd.f32 %v4512_v63, %v4450_v6  ;;  %v1495_v15 = vrot.slane %v4489_v58, %v4344_v41  ;;  %v4562_v6 = vrot.slane %v4482_v10, %v4350_v45  ;;  %v4583_v17 = vrot.slane %v4489_v58, %v4354_v47 }
 0x401   :  { %v1285_v1 = vmax.f32 %v1269_v51, %v1281_v39  ;;  %v1240_v29 = vmax.f32 %v1236_v19, -1e+30  ;;  %v1255_v51 = vmax.f32 %v1239_v50, %v1251_v60  ;;  %v1479_v39 = vrot.slane %v4489_v58, %v4338_v36 }
 0x402   :  { %v1468_v50 = vadd.f32 %v4528_v4, %v4476_v46  ;;  %v1511_v60 = vrot.slane %v4489_v58, %v4348_v44 }
 0x403   :  { %v1301_v22 = vmax.f32 %v1285_v1, %v1297_v56  ;;  %v1256_v27 = vmax.f32 %v1240_v29, %v1252_v26  ;;  %v1271_v8 = vmax.f32 %v1255_v51, %v1267_v24  ;;  %v4552_v56 = vrot.slane %v4482_v10, %v4348_v44  ;;  %v4575_v24 = vpop.permute.xlu0 %1416 }
 0x404   :  { %v1284_v1 = vadd.f32 %v4539_v20, %v4454_v33  ;;  %v1484_v19 = vadd.f32 %v1479_v39, %v4484_v57  ;;  %v1315_v51 = vadd.f32 %v1308_v0, %v4462_v7  ;;  %v4573_v33 = vrot.slane %v4482_v10, %v4354_v47 }
 0x405   :  { %v1317_v42 = vmax.f32 %v1301_v22, %v1313_v9  ;;  %v4564_v9 = vpop.permute.xlu1 %1409  ;;  %v1272_v29 = vmax.f32 %v1256_v27, %v1268_v54  ;;  %v1287_v26 = vmax.f32 %v1271_v8, %v1283_v3  ;;  %v1300_v27 = vadd.f32 %v4552_v56, %v4458_v28 }
 0x406   :  { %v1316_v0 = vadd.f32 %v4562_v6, %v4462_v7  ;;  %v1500_v28 = vadd.f32 %v1495_v15, %v4499_v59 }
 0x407   :  { %v1333_v22 = vmax.f32 %v1317_v42, %v1329_v40  ;;  %v1288_v37 = vmax.f32 %v1272_v29, %v1284_v1  ;;  %v1303_v8 = vmax.f32 %v1287_v26, %v1299_v61  ;;  %v1527_v42 = vrot.slane %v4489_v58, %v4350_v45 }
 0x408   :  { %v1331_v40 = vadd.f32 %v1324_v52, %v4466_v35  ;;  %v4590_v1 = vrot.slane %v4482_v10, %v4357_v49  ;;  %v1332_v29 = vadd.f32 %v4573_v33, %v4466_v35  ;;  %v4598_v26 = vrot.slane %v4520_v53, %v4327_v31 }
 0x409   :  { %v1349_v46 = vmax.f32 %v1333_v22, %v1345_v23  ;;  %v1304_v3 = vmax.f32 %v1288_v37, %v1300_v27  ;;  %v1319_v23 = vmax.f32 %v1303_v8, %v1315_v51  ;;  %v1516_v22 = vadd.f32 %v1511_v60, %v4541_v18  ;;  %v1421_v7 = vpop.permute.xlu1 %1420  ;;  %v4612_v8 = vpop.permute.xlu0 %1427 }
 0x40a   :  { %v1532_v10 = vadd.f32 %v1527_v42, %v4575_v24  ;;  %v1454_v61 = vadd.f32 %v1447_v5, %v4474_v11  ;;  %v4606_v51 = vrot.slane %v4520_v53, %v4325_v30  ;;  %v4610_v35 = vrot.slane %v4520_v53, %v4338_v36 }
 0x40b   :  { %v1456_v54 = vmax.f32 %v1349_v46, %v1452_v14  ;;  %v1320_v46 = vmax.f32 %v1304_v3, %v1316_v0  ;;  %v1335_v37 = vmax.f32 %v1319_v23, %v1331_v40  ;;  %v1347_v14 = vadd.f32 %v4516_v12, %v4470_v13 }
 0x40c   :  { %v1348_v0 = vadd.f32 %v4590_v1, %v4470_v13  ;;  %v1548_v40 = vadd.f32 %v4583_v17, %v4612_v8  ;;  %v1455_v5 = vadd.f32 %v4598_v26, %v4474_v11  ;;  %v4624_v3 = vrot.slane %v4520_v53, %v4344_v41 }
 0x40d   :  { %v1472_v52 = vmax.f32 %v1456_v54, %v1468_v50  ;;  %v1336_v50 = vmax.f32 %v1320_v46, %v1332_v29  ;;  %v1351_v12 = vmax.f32 %v1335_v37, %v1347_v14  ;;  %v1470_v54 = vadd.f32 %v4528_v4, %v4478_v38  ;;  %v1432_v37 = vpop.permute.xlu1 %1431 }
 0x40e   :  { %v1234_v13 = vadd.f32 %v4503_v62, %v4444_v2  ;;  %v1486_v46 = vadd.f32 %v1479_v39, %v4493_v16  ;;  %v1487_v11 = vadd.f32 %v4610_v35, %v4493_v16  ;;  %v1250_v4 = vadd.f32 %v4508_v21, %v4446_v55 }
 0x40f   :  { %v1488_v27 = vmax.f32 %v1472_v52, %v1484_v19  ;;  %v1352_v23 = vmax.f32 %v1336_v50, %v1348_v0  ;;  %v1458_v29 = vmax.f32 %v1351_v12, %v1454_v61  ;;  %v1471_v52 = vadd.f32 %v4606_v51, %v4478_v38 }
 0x410   :  { %v1502_v61 = vadd.f32 %v1495_v15, %v4530_v48  ;;  %v1503_v2 = vadd.f32 %v4624_v3, %v4530_v48  ;;  %v1515_v38 = vrot.slane %v4520_v53, %v4348_v44  ;;  %v1266_v62 = vadd.f32 %v4512_v63, %v4448_v43  ;;  %v1439_v43 = vpop.permute.xlu0 %1438 }
 0x411   :  { %v1504_v19 = vmax.f32 %v1488_v27, %v1500_v28  ;;  %v1459_v41 = vmax.f32 %v1352_v23, %v1455_v5  ;;  %v1474_v28 = vmax.f32 %v1458_v29, %v1470_v54  ;;  %v1238_v27 = vmax.f32 %v1234_v13, -1e+30 }
 0x412   :  { %v1518_v21 = vadd.f32 %v1511_v60, %v4564_v9  ;;  %v1559_v15 = vrot.slane %v4489_v58, %v4357_v49  ;;  %v1282_v48 = vadd.f32 %v4539_v20, %v4452_v32  ;;  %v1534_v63 = vadd.f32 %v1527_v42, %v1421_v7 }
 0x413   :  { %v1520_v14 = vmax.f32 %v1504_v19, %v1516_v22  ;;  %v1475_v39 = vmax.f32 %v1459_v41, %v1471_v52  ;;  %v1490_v50 = vmax.f32 %v1474_v28, %v1486_v46  ;;  %v1254_v55 = vmax.f32 %v1238_v27, %v1250_v4 }
 0x414   :  { %v1531_v22 = vrot.slane %v4520_v53, %v4350_v45  ;;  %v1519_v41 = vadd.f32 %v1515_v38, %v4564_v9  ;;  %v1547_v60 = vrot.slane %v4520_v53, %v4354_v47  ;;  %v1298_v58 = vadd.f32 %v4552_v56, %v4456_v34  ;;  %v5280_v34 = vld [vmem:[#allocation45_spill] sm:$0xff] }
 0x415   :  { %v1536_v16 = vmax.f32 %v1520_v14, %v1532_v10  ;;  %v1491_v12 = vmax.f32 %v1475_v39, %v1487_v11  ;;  %v1506_v5 = vmax.f32 %v1490_v50, %v1502_v61  ;;  %v1270_v54 = vmax.f32 %v1254_v55, %v1266_v62  ;;  %v1443_v10 = vpop.permute.xlu1 %1442  ;;  %v5282_v39 = vld [vmem:[#allocation46_spill] sm:$0xff] }
 0x416   :  { %v1550_v20 = vadd.f32 %v4583_v17, %v1432_v37  ;;  %v1535_v32 = vadd.f32 %v1531_v22, %v1421_v7  ;;  %v1564_v13 = vadd.f32 %v1559_v15, %v1439_v43  ;;  %v1314_v46 = vadd.f32 %v4562_v6, %v4460_v25  ;;  %v5281_v7 = vld [vmem:[#allocation39_spill] sm:$0xff]  ;;  %v5283_v25 = vld [vmem:[#allocation40_spill] sm:$0xff] }
 0x417   :  { %v1552_v0 = vmax.f32 %v1536_v16, %v1548_v40  ;;  %v1507_v19 = vmax.f32 %v1491_v12, %v1503_v2  ;;  %v1522_v23 = vmax.f32 %v1506_v5, %v1518_v21  ;;  %v1286_v29 = vmax.f32 %v1270_v54, %v1282_v48  ;;  %v5284_v21 = vld [vmem:[#allocation47_spill] sm:$0xff]  ;;  %v5285_v48 = vld [vmem:[#allocation37_spill] sm:$0xff] }
 0x418   :  { %v1563_v40 = vrot.slane %v4520_v53, %v4357_v49  ;;  %v1551_v11 = vadd.f32 %v1547_v60, %v1432_v37  ;;  %v1566_v4 = vadd.f32 %v1559_v15, %v1443_v10  ;;  %v1330_v56 = vadd.f32 %v4573_v33, %v5280_v34  ;;  %v5286_v33 = vld [vmem:[#allocation48_spill] sm:$0xff] }
 0x419   :  { %v1523_v52 = vmax.f32 %v1507_v19, %v1519_v41  ;;  %v1538_v9 = vmax.f32 %v1522_v23, %v1534_v63  ;;  %v1302_v42 = vmax.f32 %v1286_v29, %v1298_v58  ;;  %v1568_v14 = vmax.f32 %v1552_v0, %v1564_v13  ;;  %v3636_v34 = vld [vmem:[#allocation13 + $0x8] ss:$12 sps:$4 sm:$0xff]  }
 0x41a   :  { %v1567_v17 = vadd.f32 %v1563_v40, %v1443_v10  ;;  %v1346_v50 = vadd.f32 %v4590_v1, %v5282_v39  ;;  %v1453_v15 = vadd.f32 %v4598_v26, %v5284_v21  ;;  %v1469_v5 = vadd.f32 %v4606_v51, %v5286_v33  ;;  %v3646_v39 = vld [vmem:[#allocation13 + $0x38] ss:$12 sps:$4 sm:$0xff]   ;;  %v3655_v21 = vld [vmem:[#allocation13 + $0x128] ss:$12 sps:$4 sm:$0xff]   ;;  %v3660_v33 = vld [vmem:[#allocation13 + $0x140] ss:$12 sps:$4 sm:$0xff]  }
 0x41b   :  { %v1539_v28 = vmax.f32 %v1523_v52, %v1535_v32  ;;  %v1554_v27 = vmax.f32 %v1538_v9, %v1550_v20  ;;  %v1318_v61 = vmax.f32 %v1302_v42, %v1314_v46  ;;  %v1572_v2 = vsub.f32 %v1568_v14, %v5281_v7  ;;  %v5287_v52 = vld [vmem:[#allocation35_spill] sm:$0xff]  ;;  %v3629_v14 = vld [vmem:[#allocation13 + $0xa8] ss:$12 sps:$4 sm:$0xff]  }
 0x41c   :  { %v1485_v63 = vadd.f32 %v4610_v35, %v4484_v57  ;;  %v1501_v1 = vadd.f32 %v4624_v3, %v4499_v59  ;;  %v1517_v23 = vadd.f32 %v1515_v38, %v4541_v18  ;;  %v1533_v26 = vadd.f32 %v1531_v22, %v4575_v24  ;;  %v3608_v57 = vld [vmem:[#allocation13] ss:$12 sps:$4 sm:$0xff]   ;;  %v3610_v35 = vld [vmem:[#allocation13 + $0x4] ss:$12 sps:$4 sm:$0xff]   ;;  %v3613_v59 = vld [vmem:[#allocation13 + $0x1c] ss:$12 sps:$4 sm:$0xff]  }
 0x41d   :  { %v1555_v53 = vmax.f32 %v1539_v28, %v1551_v11  ;;  %v1570_v62 = vmax.f32 %v1554_v27, %v1566_v4  ;;  %v1334_v16 = vmax.f32 %v1318_v61, %v1330_v56  ;;  %v1549_v20 = vadd.f32 %v1547_v60, %v4612_v8  ;;  %2227 = vmatprep.subr.bf16.mxu1 %v3610_v35  ;;  %v3611_v18 = vld [vmem:[#allocation13 + $0x18] ss:$12 sps:$4 sm:$0xff]   ;;  %v3616_v24 = vld [vmem:[#allocation13 + $0x34] ss:$12 sps:$4 sm:$0xff]   ;;  %v3614_v3 = vld [vmem:[#allocation13 + $0x30] ss:$12 sps:$4 sm:$0xff]  }
 0x41e   :  { %v1565_v51 = vadd.f32 %v1563_v40, %v1439_v43  ;;  %2228 = vmatpush1.bf16.msra.mxu1 %v3608_v57  ;;  %v3619_v8 = vld [vmem:[#allocation13 + $0x4c] ss:$12 sps:$4 sm:$0xff]   ;;  %v3617_v38 = vld [vmem:[#allocation13 + $0x48] ss:$12 sps:$4 sm:$0xff]   ;;  %v3622_v22 = vld [vmem:[#allocation13 + $0x64] ss:$12 sps:$4 sm:$0xff]  }
 0x41f   :  { %v1571_v55 = vmax.f32 %v1555_v53, %v1567_v17  ;;  %v1574_v6 = vsub.f32 %v1570_v62, %v5283_v25  ;;  %v1350_v37 = vmax.f32 %v1334_v16, %v1346_v50  ;;  %2229 = vmatprep.subr.bf16.mxu1 %v3613_v59  ;;  %v3620_v43 = vld [vmem:[#allocation13 + $0x60] ss:$12 sps:$4 sm:$0xff]   ;;  %v3625_v60 = vld [vmem:[#allocation13 + $0x7c] ss:$12 sps:$4 sm:$0xff]   ;;  %v3623_v40 = vld [vmem:[#allocation13 + $0x78] ss:$12 sps:$4 sm:$0xff]  }
 0x420   :  { %v3628_v46 = vld [vmem:[#allocation13 + $0x94] ss:$12 sps:$4 sm:$0xff]   ;;  %v3626_v11 = vld [vmem:[#allocation13 + $0x90] ss:$12 sps:$4 sm:$0xff]   ;;  %v3631_v4 = vld [vmem:[#allocation13 + $0xac] ss:$12 sps:$4 sm:$0xff]  }
 0x421   :  { %v1575_v0 = vsub.f32 %v1571_v55, %v5285_v48  ;;  %v1457_v12 = vmax.f32 %v1350_v37, %v1453_v15  ;;  %v1576_v54 = vpack.c.bf16 %v1574_v6, %v1572_v2  ;;  %v3634_v28 = vld [vmem:[#allocation13 + $0xc4] ss:$12 sps:$4 sm:$0xff]   ;;  %v3635_v27 = vld [vmem:[#allocation13 + $0xc8] ss:$12 sps:$4 sm:$0xff]   ;;  %v3632_v61 = vld [vmem:[#allocation13 + $0xc0] ss:$12 sps:$4 sm:$0xff]  }
 0x422   :  { %2230 = vmatpush1.bf16.msra.mxu1 %v3611_v18  ;;  %3376 = vmatprep.subr.bf16.mxu0 %v3635_v27  ;;  %v3639_v56 = vld [vmem:[#allocation13 + $0xdc] ss:$12 sps:$4 sm:$0xff]   ;;  %v3640_v17 = vld [vmem:[#allocation13 + $0xe0] ss:$12 sps:$4 sm:$0xff]   ;;  %v3637_v7 = vld [vmem:[#allocation13 + $0xd8] ss:$12 sps:$4 sm:$0xff]  }
 0x423   :  { %v1473_v41 = vmax.f32 %v1457_v12, %v1469_v5  ;;  %2231 = vmatprep.subr.bf16.mxu1 %v3616_v24  ;;  %v3641_v2 = vld [vmem:[#allocation13 + $0x20] ss:$12 sps:$4 sm:$0xff]   ;;  %v3645_v62 = vld [vmem:[#allocation13 + $0xf8] ss:$12 sps:$4 sm:$0xff]   ;;  %v3642_v16 = vld [vmem:[#allocation13 + $0xf0] ss:$12 sps:$4 sm:$0xff]  }
 0x424   :  { %v3644_v53 = vld [vmem:[#allocation13 + $0xf4] ss:$12 sps:$4 sm:$0xff]   ;;  %v3649_v50 = vld [vmem:[#allocation13 + $0x10c] ss:$12 sps:$4 sm:$0xff]   ;;  %v3650_v55 = vld [vmem:[#allocation13 + $0x110] ss:$12 sps:$4 sm:$0xff]  }
 0x425   :  { %v1489_v10 = vmax.f32 %v1473_v41, %v1485_v63  ;;  %v3647_v25 = vld [vmem:[#allocation13 + $0x108] ss:$12 sps:$4 sm:$0xff]   ;;  %v3651_v6 = vld [vmem:[#allocation13 + $0x50] ss:$12 sps:$4 sm:$0xff]   ;;  %v3652_v15 = vld [vmem:[#allocation13 + $0x120] ss:$12 sps:$4 sm:$0xff]  }
 0x426   :  { %2232 = vmatpush1.bf16.msra.mxu1 %v3614_v3  ;;  %v3654_v37 = vld [vmem:[#allocation13 + $0x124] ss:$12 sps:$4 sm:$0xff]   ;;  %v3656_v48 = vld [vmem:[#allocation13 + $0x68] ss:$12 sps:$4 sm:$0xff]   ;;  %v3661_v5 = vld [vmem:[#allocation13 + $0x80] ss:$12 sps:$4 sm:$0xff]  }
 0x427   :  { %v1505_v19 = vmax.f32 %v1489_v10, %v1501_v1  ;;  %2233 = vmatprep.subr.bf16.mxu1 %v3619_v8  ;;  %v3659_v12 = vld [vmem:[#allocation13 + $0x13c] ss:$12 sps:$4 sm:$0xff]   ;;  %v3665_v41 = vld [vmem:[#allocation13 + $0x158] ss:$12 sps:$4 sm:$0xff]  }
 0x428   :  { %v3662_v63 = vld [vmem:[#allocation13 + $0x150] ss:$12 sps:$4 sm:$0xff]   ;;  %v3666_v10 = vld [vmem:[#allocation13 + $0x98] ss:$12 sps:$4 sm:$0xff]  }
 0x429   :  { %v1521_v29 = vmax.f32 %v1505_v19, %v1517_v23  ;;  %v3669_v1 = vld [vmem:[#allocation13 + $0x16c] ss:$12 sps:$4 sm:$0xff]   ;;  %v3670_v19 = vld [vmem:[#allocation13 + $0x170] ss:$12 sps:$4 sm:$0xff]  }
 0x42a   :  { %2234 = vmatpush1.bf16.msra.mxu1 %v3617_v38  ;;  %v2320_v23 = vld [vmem:[#allocation2] sm:$0xff]  ;;  %v2604_v59 = vld [vmem:[#allocation2 + $0x8] sm:$0xff] }
 0x42b   :  { %v1537_v58 = vmax.f32 %v1521_v29, %v1533_v26  ;;  %2235 = vmatprep.subr.bf16.mxu1 %v3622_v22  ;;  %v3667_v29 = vld [vmem:[#allocation13 + $0x168] ss:$12 sps:$4 sm:$0xff]   ;;  %v3671_v26 = vld [vmem:[#allocation13 + $0xb0] ss:$12 sps:$4 sm:$0xff]   ;;  %v2390_v57 = vrot.slane %v2320_v23, %v4354_v47  ;;  %v2401_v35 = vrot.slane %v2320_v23, %v4357_v49  ;;  %v2608_v18 = vrot.slane %v2604_v59, %v4327_v31 }
 0x42c   :  { %v2619_v24 = vrot.slane %v2604_v59, %v4325_v30  ;;  %v2630_v3 = vrot.slane %v2604_v59, %v4338_v36  ;;  %v2652_v38 = vrot.slane %v2604_v59, %v4348_v44  ;;  %v2663_v22 = vrot.slane %v2604_v59, %v4350_v45 }
 0x42d   :  { %v1553_v32 = vmax.f32 %v1537_v58, %v1549_v20  ;;  %v2324_v58 = vrot.slane %v2320_v23, %v4327_v31  ;;  %v2335_v20 = vrot.slane %v2320_v23, %v4325_v30 }
 0x42e   :  { %2236 = vmatpush1.bf16.msra.mxu1 %v3620_v43  ;;  %v2674_v43 = vrot.slane %v2604_v59, %v4354_v47 }
 0x42f   :  { %v1569_v13 = vmax.f32 %v1553_v32, %v1565_v51  ;;  %2237 = vmatprep.subr.bf16.mxu1 %v3625_v60  ;;  %2330 = vbcast.lane.b32.xlu1 %v2324_v58, 264  ;;  %v5288_v32 = vmov 0.0   ;;  %v2346_v51 = vrot.slane %v2320_v23, %v4338_v36  ;;  %v2685_v60 = vrot.slane %v2604_v59, %v4357_v49 }
 0x430   :  { %2326 = vbcast.lane.b32.xlu0 %v2324_v58, 256 }
 0x431   :  { %v1573_v9 = vsub.f32 %v1569_v13, %v5287_v52  ;;  %v5289_v13 = vld [vmem:[#allocation34_spill] sm:$0xff] }
 0x432   :  { %2238 = vmatpush1.bf16.msra.mxu1 %v3623_v40  ;;  %v2357_v52 = vrot.slane %v2320_v23, %v5289_v13  ;;  %v2641_v8 = vrot.slane %v2604_v59, %v5289_v13  ;;  %v1813_v59 = vld [vmem:[#allocation21 + $0x1] sm:$0x3] }
 0x433   :  { %v1577_v42 = vpack.c.bf16 %v1575_v0, %v1573_v9  ;;  %2239 = vmatprep.subr.bf16.mxu1 %v3628_v46  ;;  %v3657_v0 = vld [vmem:[#allocation13 + $0x138] ss:$12 sps:$4 sm:$0xff]   ;;  %2341 = vbcast.lane.b32.xlu1 %v2335_v20, 264  ;;  %v2368_v9 = vrot.slane %v2320_v23, %v4348_v44 }
 0x434   :  { %2337 = vbcast.lane.b32.xlu0 %v2335_v20, 256 }
 0x435   :  { %1802 = vmatprep.mubr.bf16.mxu0 %v1577_v42  ;;  %v2379_v42 = vrot.slane %v2320_v23, %v4350_v45 }
 0x436   :  { %1803 = vmatmul.mubr.bf16.vlgmr.msra.gmra.mrb[12].mxu0 %v1576_v54  ;;  %2240 = vmatpush1.bf16.msra.mxu1 %v3626_v11  ;;  %v3664_v54 = vld [vmem:[#allocation13 + $0x154] ss:$12 sps:$4 sm:$0xff]  }
 0x437   :  { %2241 = vmatprep.subr.bf16.mxu1 %v3631_v4  ;;  %3377 = vmatpush3.bf16.msra.mxu0 %v3636_v34 }
 0x438   :  { %3378 = vmatprep.subr.bf16.mxu0 %v3640_v17  ;;  %2352 = vbcast.lane.b32.xlu1 %v2346_v51, 264 }
 0x439   :  { %2348 = vbcast.lane.b32.xlu0 %v2346_v51, 256 }
 0x43a   :  { %2242 = vmatpush1.bf16.msra.mxu1 %v3629_v14 }
 0x43b   :  { %2243 = vmatprep.subr.bf16.mxu1 %v3634_v28  ;;  %3379 = vmatpush3.bf16.msra.mxu0 %v3641_v2 }
 0x43c   :  { %3380 = vmatprep.subr.bf16.mxu0 %v3645_v62  ;;  %2363 = vbcast.lane.b32.xlu1 %v2357_v52, 264 }
 0x43d   :  { %2359 = vbcast.lane.b32.xlu0 %v2357_v52, 256 }
 0x43e   :  { %2244 = vmatpush1.bf16.msra.mxu1 %v3632_v61 }
 0x43f   :  { %2245 = vmatprep.subr.bf16.mxu1 %v3639_v56  ;;  %3381 = vmatpush3.bf16.msra.mxu0 %v3646_v39 }
 0x440   :  { %3382 = vmatprep.subr.bf16.mxu0 %v3650_v55  ;;  %2374 = vbcast.lane.b32.xlu1 %v2368_v9, 264 }
 0x441   :  { %2370 = vbcast.lane.b32.xlu0 %v2368_v9, 256 }
 0x442   :  { %2246 = vmatpush1.bf16.msra.mxu1 %v3637_v7 }
 0x443   :  { %2247 = vmatprep.subr.bf16.mxu1 %v3644_v53  ;;  %3383 = vmatpush3.bf16.msra.mxu0 %v3651_v6 }
 0x444   :  { %3384 = vmatprep.subr.bf16.mxu0 %v3655_v21  ;;  %2385 = vbcast.lane.b32.xlu1 %v2379_v42, 264 }
 0x445   :  { %2381 = vbcast.lane.b32.xlu0 %v2379_v42, 256 }
 0x446   :  { %2248 = vmatpush1.bf16.msra.mxu1 %v3642_v16 }
 0x447   :  { %2249 = vmatprep.subr.bf16.mxu1 %v3649_v50  ;;  %3385 = vmatpush3.bf16.msra.mxu0 %v3656_v48 }
 0x448   :  { %3386 = vmatprep.subr.bf16.mxu0 %v3660_v33  ;;  %2396 = vbcast.lane.b32.xlu1 %v2390_v57, 264 }
 0x449   :  { %2392 = vbcast.lane.b32.xlu0 %v2390_v57, 256 }
 0x44a   :  { %2250 = vmatpush1.bf16.msra.mxu1 %v3647_v25 }
 0x44b   :  { %2251 = vmatprep.subr.bf16.mxu1 %v3654_v37  ;;  %3387 = vmatpush3.bf16.msra.mxu0 %v3661_v5 }
 0x44c   :  { %3388 = vmatprep.subr.bf16.mxu0 %v3665_v41  ;;  %2407 = vbcast.lane.b32.xlu1 %v2401_v35, 264 }
 0x44d   :  { %2403 = vbcast.lane.b32.xlu0 %v2401_v35, 256 }
 0x44e   :  { %2252 = vmatpush1.bf16.msra.mxu1 %v3652_v15 }
 0x44f   :  { %2253 = vmatprep.subr.bf16.mxu1 %v3659_v12  ;;  %3389 = vmatpush3.bf16.msra.mxu0 %v3666_v10 }
 0x450   :  { %3390 = vmatprep.subr.bf16.mxu0 %v3670_v19  ;;  %2614 = vbcast.lane.b32.xlu1 %v2608_v18, 264 }
 0x451   :  { %2610 = vbcast.lane.b32.xlu0 %v2608_v18, 256  ;;  %v1814_v18 = vld [vmem:[#allocation22 + $0x1] sm:$0x3] }
 0x452   :  { %2254 = vmatpush1.bf16.msra.mxu1 %v3657_v0 }
 0x453   :  { %2255 = vmatprep.subr.bf16.mxu1 %v3664_v54  ;;  %3391 = vmatpush3.bf16.msra.mxu0 %v3671_v26 }
 0x454   :  { %3469 = vmatprep.subr.bf16.mxu0 %v5288_v32  ;;  %2625 = vbcast.lane.b32.xlu1 %v2619_v24, 264 }
 0x455   :  { %2621 = vbcast.lane.b32.xlu0 %v2619_v24, 256  ;;  %v1875_v24 = vrot.slane %v1813_v59, %v4327_v31 }
 0x456   :  { %2256 = vmatpush1.bf16.msra.mxu1 %v3662_v63 }
 0x457   :  { %2257 = vmatprep.subr.bf16.mxu1 %v3669_v1 }
 0x458   :  { %2636 = vbcast.lane.b32.xlu1 %v2630_v3, 264 }
 0x459   :  { %2632 = vbcast.lane.b32.xlu0 %v2630_v3, 256 }
 0x45a   :  { %2258 = vmatpush1.bf16.msra.mxu1 %v3667_v29 }
 0x45c   :  { %2647 = vbcast.lane.b32.xlu1 %v2641_v8, 264 }
 0x45d   :  { %2643 = vbcast.lane.b32.xlu0 %v2641_v8, 256  ;;  %v1879_v8 = vrot.slane %v1813_v59, %v4325_v30 }
 0x460   :  { %2658 = vbcast.lane.b32.xlu1 %v2652_v38, 264 }
 0x461   :  { %2654 = vbcast.lane.b32.xlu0 %v2652_v38, 256 }
 0x464   :  { %2669 = vbcast.lane.b32.xlu1 %v2663_v22, 264 }
 0x465   :  { %2665 = vbcast.lane.b32.xlu0 %v2663_v22, 256 }
 0x468   :  { %2680 = vbcast.lane.b32.xlu1 %v2674_v43, 264 }
 0x469   :  { %2676 = vbcast.lane.b32.xlu0 %v2674_v43, 256 }
 0x46c   :  { %2691 = vbcast.lane.b32.xlu1 %v2685_v60, 264 }
 0x46d   :  { %2687 = vbcast.lane.b32.xlu0 %v2685_v60, 256  ;;  %v1890_v60 = vrot.slane %v1814_v18, %v4327_v31 }
 0x509   :  { %v1804_v40 = vpop.f32.mrb[12].mxu0 }
 0x50a   :  { %v1806_v46 = vpop.f32.mrb[13].mxu0 }
 0x50b   :  { %v1808_v11 = vpop.f32.mrb[14].mxu0 }
 0x50c   :  { %v1819_v4 = vadd.f32 %v1808_v11, %v1804_v40  ;;  %v1810_v14 = vpop.f32.mrb[15].mxu0 }
 0x50d   :  { %v1826_v28 = vadd.f32 %v1810_v14, %v1806_v46 }
 0x50e   :  { %v1820_v27 = vrot.slane %v1819_v4, 4 }
 0x50f   :  { %v1827_v61 = vrot.slane %v1826_v28, 4 }
 0x510   :  { %v1821_v34 = vadd.f32 %v1820_v27, %v1819_v4 }
 0x511   :  { %v1828_v56 = vadd.f32 %v1827_v61, %v1826_v28 }
 0x512   :  { %v1822_v17 = vrot.slane %v1821_v34, 2 }
 0x513   :  { %v1829_v7 = vrot.slane %v1828_v56, 2 }
 0x514   :  { %v1823_v2 = vadd.f32 %v1822_v17, %v1821_v34 }
 0x515   :  { %v1830_v53 = vadd.f32 %v1829_v7, %v1828_v56 }
 0x516   :  { %v1824_v62 = vrot.slane %v1823_v2, 1 }
 0x517   :  { %v1831_v16 = vrot.slane %v1830_v53, 1 }
 0x518   :  { %v1825_v39 = vadd.f32 %v1824_v62, %v1823_v2 }
 0x519   :  { %v1832_v50 = vadd.f32 %v1831_v16, %v1830_v53 }
 0x51a   :  { %v1833_v55 = vmul.f32 0.0625, %v1825_v39 }
 0x51b   :  { %v1834_v25 = vmul.f32 0.0625, %v1832_v50  ;;  %v4701_v50 = vpop.permute.xlu1 %2330 }
 0x51c   :  { %v1835_v6 = vsub.f32 %v1804_v40, %v1833_v55  ;;  %v1837_v37 = vsub.f32 %v1808_v11, %v1833_v55  ;;  %v1894_v11 = vrot.slane %v1814_v18, %v4325_v30  ;;  %v4703_v55 = vpop.permute.xlu0 %2326 }
 0x51d   :  { %v1836_v21 = vsub.f32 %v1806_v46, %v1834_v25  ;;  %v1838_v15 = vsub.f32 %v1810_v14, %v1834_v25  ;;  %5290 = vst [vmem:[#allocation45_spill] sm:$0xff] %v4703_v55 }
 0x51e   :  { %v1843_v48 = vmul.f32 %v1835_v6, %v1835_v6  ;;  %v1845_v0 = vmul.f32 %v1837_v37, %v1837_v37 }
 0x51f   :  { %v1844_v12 = vmul.f32 %v1836_v21, %v1836_v21  ;;  %v1846_v33 = vmul.f32 %v1838_v15, %v1838_v15  ;;  %v4705_v25 = vpop.permute.xlu1 %2341 }
 0x520   :  { %v1847_v5 = vadd.f32 %v1845_v0, %v1843_v48 }
 0x521   :  { %v1854_v54 = vadd.f32 %v1846_v33, %v1844_v12  ;;  %v3675_v12 = vld [vmem:[#allocation19 + $0x48] sm:$0xff]  }
 0x522   :  { %v1848_v41 = vrot.slane %v1847_v5, 4  ;;  %v3676_v33 = vld [vmem:[#allocation19 + $0x8] sm:$0xff]  }
 0x523   :  { %v1855_v63 = vrot.slane %v1854_v54, 4  ;;  %v4709_v48 = vpop.permute.xlu1 %2352 }
 0x524   :  { %v1849_v10 = vadd.f32 %v1848_v41, %v1847_v5  ;;  %v3677_v5 = vld [vmem:[#allocation19 + $0x88] sm:$0xff]   ;;  %v3679_v41 = vld [vmem:[#allocation19 + $0x10] sm:$0xff]  }
 0x525   :  { %v1856_v1 = vadd.f32 %v1855_v63, %v1854_v54  ;;  %v3678_v54 = vld [vmem:[#allocation19 + $0x50] sm:$0xff]  }
 0x526   :  { %v1850_v19 = vrot.slane %v1849_v10, 2 }
 0x527   :  { %v1857_v23 = vrot.slane %v1856_v1, 2  ;;  %v4715_v63 = vpop.permute.xlu1 %2363 }
 0x528   :  { %v1851_v29 = vadd.f32 %v1850_v19, %v1849_v10  ;;  %v3681_v19 = vld [vmem:[#allocation19 + $0x58] sm:$0xff]  }
 0x529   :  { %v1858_v26 = vadd.f32 %v1857_v23, %v1856_v1  ;;  %v3680_v1 = vld [vmem:[#allocation19 + $0x90] sm:$0xff]   ;;  %v3682_v23 = vld [vmem:[#allocation19 + $0x18] sm:$0xff]  }
 0x52a   :  { %v1852_v58 = vrot.slane %v1851_v29, 1 }
 0x52b   :  { %v1859_v20 = vrot.slane %v1858_v26, 1 }
 0x52c   :  { %v1853_v51 = vadd.f32 %v1852_v58, %v1851_v29  ;;  %v3683_v29 = vld [vmem:[#allocation19 + $0x98] sm:$0xff]  }
 0x52d   :  { %v1860_v52 = vadd.f32 %v1859_v20, %v1858_v26  ;;  %v4720_v26 = vpop.permute.xlu1 %2374  ;;  %v3684_v20 = vld [vmem:[#allocation19 + $0x60] sm:$0xff]  }
 0x52e   :  { %v1861_v9 = vmul.f32 0.0625, %v1853_v51  ;;  %v3685_v51 = vld [vmem:[#allocation19 + $0x20] sm:$0xff]  }
 0x52f   :  { %v1862_v42 = vmul.f32 0.0625, %v1860_v52  ;;  %v3686_v52 = vld [vmem:[#allocation19 + $0xa0] sm:$0xff]  }
 0x530   :  { %v1863_v57 = vadd.f32 1e-05, %v1861_v9  ;;  %v3687_v9 = vld [vmem:[#allocation19 + $0x68] sm:$0xff]  }
 0x531   :  { %v1864_v35 = vadd.f32 1e-05, %v1862_v42  ;;  %v3688_v42 = vld [vmem:[#allocation19 + $0x28] sm:$0xff]   ;;  %v4726_v59 = vpop.permute.xlu1 %2385 }
 0x532   :  { %3698 = vrsqrt.f32 %v1863_v57  ;;  %v3689_v57 = vld [vmem:[#allocation19 + $0xa8] sm:$0xff]  }
 0x533   :  { %3700 = vrsqrt.f32 %v1864_v35  ;;  %v3690_v35 = vld [vmem:[#allocation19 + $0x70] sm:$0xff]  }
 0x53c   :  { %v3699_v3 = vpop.eup %3698 }
 0x53d   :  { %v3701_v38 = vpop.eup %3700  ;;  %v1867_v22 = vmul.f32 %v3699_v3, %v1835_v6  ;;  %v1869_v43 = vmul.f32 %v3699_v3, %v1837_v37  ;;  %v4707_v6 = vpop.permute.xlu0 %2337  ;;  %v3672_v37 = vld [vmem:[#allocation19 + $0x40] sm:$0xff]   ;;  %v3692_v3 = vld [vmem:[#allocation19 + $0xb0] sm:$0xff]  }
 0x53e   :  { %v1868_v40 = vmul.f32 %v3701_v38, %v1836_v21  ;;  %v1870_v46 = vmul.f32 %v3701_v38, %v1838_v15  ;;  %5291 = vst [vmem:[#allocation39_spill] sm:$0xff] %v4707_v6  ;;  %v3673_v21 = vld [vmem:[#allocation19] sm:$0xff]   ;;  %3398 = vmatprep.subr.bf16.mxu1 %v3672_v37  ;;  %v3694_v38 = vld [vmem:[#allocation19 + $0x38] sm:$0xff]  }
 0x53f   :  { %v1882_v4 = vmul.f32 %v1875_v24, %v1867_v22  ;;  %v1884_v14 = vmul.f32 %v1875_v24, %v1869_v43  ;;  %v3674_v15 = vld [vmem:[#allocation19 + $0x80] sm:$0xff]   ;;  %v3691_v24 = vld [vmem:[#allocation19 + $0x30] sm:$0xff]   ;;  %v4731_v22 = vpop.permute.xlu1 %2396 }
 0x540   :  { %v1885_v28 = vmul.f32 %v1879_v8, %v1870_v46  ;;  %v1883_v27 = vmul.f32 %v1879_v8, %v1868_v40  ;;  %v3693_v8 = vld [vmem:[#allocation19 + $0x78] sm:$0xff]  }
 0x541   :  { %v1899_v61 = vadd.f32 %v1890_v60, %v1884_v14  ;;  %v1897_v34 = vadd.f32 %v1890_v60, %v1882_v4  ;;  %v4711_v0 = vpop.permute.xlu0 %2348  ;;  %v3695_v60 = vld [vmem:[#allocation19 + $0xb8] sm:$0xff]  }
 0x542   :  { %v1898_v56 = vadd.f32 %v1894_v11, %v1883_v27  ;;  %v1900_v17 = vadd.f32 %v1894_v11, %v1885_v28  ;;  %5292 = vst [vmem:[#allocation46_spill] sm:$0xff] %v4711_v0  ;;  %v5307_v37 = vld [vmem:[#allocation41_spill] sm:$0xff] }
 0x543   :  { %v1903_v7 = vmax.f32 %v1899_v61, 0.0  ;;  %v1901_v2 = vmax.f32 %v1897_v34, 0.0  ;;  %v4736_v40 = vpop.permute.xlu1 %2407 }
 0x544   :  { %v1902_v53 = vmax.f32 %v1898_v56, 0.0  ;;  %v1904_v62 = vmax.f32 %v1900_v17, 0.0 }
 0x545   :  { %v1905_v16 = vpack.c.bf16 %v1903_v7, %v1901_v2  ;;  %v4717_v10 = vpop.permute.xlu0 %2359 }
 0x546   :  { %v1906_v39 = vpack.c.bf16 %v1904_v62, %v1902_v53  ;;  %5293 = vst [vmem:[#allocation40_spill] sm:$0xff] %v4717_v10  ;;  %v5306_v53 = vld [vmem:[#allocation36_spill] sm:$0xff] }
 0x547   :  { %v4740_v11 = vpop.permute.xlu1 %2614 }
 0x548   :  { %2259 = vmatprep.mubr.bf16.mxu1 %v1906_v39  ;;  %2302 = vmatprep.mubr.bf16.mxu0 %v1906_v39 }
 0x549   :  { %2260 = vmatmul.mubr.bf16.vlgmr.msra.gmra.mrb[12].mxu1 %v1905_v16  ;;  %2303 = vmatmul.mubr.bf16.vlgmr.msra.gmra.mrb[16].mxu0 %v1905_v16  ;;  %v4722_v58 = vpop.permute.xlu0 %2370 }
 0x54a   :  { %3485 = vmatprep.mubr.msk.bf16.mxu0 %vm4049_vm2, %v5288_v32  ;;  %3399 = vmatpush3.bf16.msra.mxu1 %v3673_v21  ;;  %5294 = vst [vmem:[#allocation47_spill] sm:$0xff] %v4722_v58 }
 0x54b   :  { %3470 = vmatpush3.bf16.msra.mxu0 %v3674_v15  ;;  %3400 = vmatprep.subr.bf16.mxu1 %v3675_v12  ;;  %v4744_v14 = vpop.permute.xlu1 %2625 }
 0x54c   :  { %3471 = vmatprep.subr.bf16.mxu0 %v5288_v32 }
 0x54d   :  { %v4728_v18 = vpop.permute.xlu0 %2381 }
 0x54e   :  { %3401 = vmatpush3.bf16.msra.mxu1 %v3676_v33  ;;  %5295 = vst [vmem:[#allocation37_spill] sm:$0xff] %v4728_v18 }
 0x54f   :  { %3472 = vmatpush3.bf16.msra.mxu0 %v3677_v5  ;;  %3402 = vmatprep.subr.bf16.mxu1 %v3678_v54  ;;  %v4748_v27 = vpop.permute.xlu1 %2636 }
 0x550   :  { %3473 = vmatprep.subr.bf16.mxu0 %v5288_v32  ;;  %5300 = vst [vmem:[#allocation50_spill] sm:$0xff] %v4748_v27 }
 0x551   :  { %v4733_v43 = vpop.permute.xlu0 %2392 }
 0x552   :  { %3403 = vmatpush3.bf16.msra.mxu1 %v3679_v41  ;;  %5296 = vst [vmem:[#allocation48_spill] sm:$0xff] %v4733_v43 }
 0x553   :  { %3474 = vmatpush3.bf16.msra.mxu0 %v3680_v1  ;;  %3404 = vmatprep.subr.bf16.mxu1 %v3681_v19  ;;  %v4752_v34 = vpop.permute.xlu1 %2647  ;;  %v5308_v1 = vld [vmem:[#allocation38_spill] sm:$0xff] }
 0x554   :  { %3475 = vmatprep.subr.bf16.mxu0 %v5288_v32  ;;  %5302 = vst [vmem:[#allocation52_spill] sm:$0xff] %v4752_v34 }
 0x555   :  { %v4738_v46 = vpop.permute.xlu0 %2403 }
 0x556   :  { %3405 = vmatpush3.bf16.msra.mxu1 %v3682_v23  ;;  %5297 = vst [vmem:[#allocation35_spill] sm:$0xff] %v4738_v46 }
 0x557   :  { %3476 = vmatpush3.bf16.msra.mxu0 %v3683_v29  ;;  %3406 = vmatprep.subr.bf16.mxu1 %v3684_v20  ;;  %v4756_v56 = vpop.permute.xlu1 %2658 }
 0x558   :  { %3477 = vmatprep.subr.bf16.mxu0 %v5288_v32  ;;  %5304 = vst [vmem:[#allocation54_spill] sm:$0xff] %v4756_v56 }
 0x559   :  { %v4742_v4 = vpop.permute.xlu0 %2610 }
 0x55a   :  { %3407 = vmatpush3.bf16.msra.mxu1 %v3685_v51  ;;  %5298 = vst [vmem:[#allocation34_spill] sm:$0xff] %v4742_v4 }
 0x55b   :  { %3478 = vmatpush3.bf16.msra.mxu0 %v3686_v52  ;;  %3408 = vmatprep.subr.bf16.mxu1 %v3687_v9  ;;  %v5311_v9 = vld [vmem:[#allocation42_spill] sm:$0xff] }
 0x55c   :  { %3479 = vmatprep.subr.bf16.mxu0 %v5288_v32 }
 0x55d   :  { %v4746_v28 = vpop.permute.xlu0 %2621 }
 0x55e   :  { %3409 = vmatpush3.bf16.msra.mxu1 %v3688_v42  ;;  %5299 = vst [vmem:[#allocation49_spill] sm:$0xff] %v4746_v28 }
 0x55f   :  { %3480 = vmatpush3.bf16.msra.mxu0 %v3689_v57  ;;  %3410 = vmatprep.subr.bf16.mxu1 %v3690_v35 }
 0x560   :  { %3481 = vmatprep.subr.bf16.mxu0 %v5288_v32 }
 0x561   :  { %v4750_v61 = vpop.permute.xlu0 %2632 }
 0x562   :  { %3411 = vmatpush3.bf16.msra.mxu1 %v3691_v24  ;;  %5301 = vst [vmem:[#allocation51_spill] sm:$0xff] %v4750_v61 }
 0x563   :  { %3482 = vmatpush3.bf16.msra.mxu0 %v3692_v3  ;;  %3412 = vmatprep.subr.bf16.mxu1 %v3693_v8  ;;  %v4789_v8 = vpop.permute.xlu1 %2669 }
 0x564   :  { %3483 = vmatprep.subr.bf16.mxu0 %v5288_v32  ;;  %5312 = vst [vmem:[#allocation58_spill] sm:$0xff] %v4789_v8 }
 0x565   :  { %v4754_v32 = vpop.permute.xlu0 %2643 }
 0x566   :  { %3413 = vmatpush3.bf16.msra.mxu1 %v3694_v38  ;;  %5303 = vst [vmem:[#allocation53_spill] sm:$0xff] %v4754_v32 }
 0x567   :  { %3484 = vmatpush3.bf16.msra.mxu0 %v3695_v60 }
 0x569   :  { %v4758_v17 = vpop.permute.xlu0 %2654 }
 0x56a   :  { %5305 = vst [vmem:[#allocation55_spill] sm:$0xff] %v4758_v17 }
 0x56d   :  { %v4791_v38 = vpop.permute.xlu0 %2665 }
 0x56e   :  { %5313 = vst [vmem:[#allocation59_spill] sm:$0xff] %v4791_v38 }
 0x61c   :  { %v2261_v7 = vpop.f32.mrb[12].mxu1  ;;  %v3392_v2 = vpop.f32.mrb[16].mxu0 }
 0x61d   :  { %v2262_v62 = vadd.f32 %v2261_v7, %v5306_v53  ;;  %v2263_v16 = vpop.f32.mrb[13].mxu1  ;;  %v3393_v39 = vpop.f32.mrb[17].mxu0 }
 0x61e   :  { %v4762_v21 = vadd.f32 %v2263_v16, %v5307_v37  ;;  %v3394_v15 = vadd.f32 %v3393_v39, %v3392_v2  ;;  %v2265_v12 = vpop.f32.mrb[14].mxu1  ;;  %v3395_v33 = vpop.f32.mrb[18].mxu0 }
 0x61f   :  { %v2412_v5 = vrot.slane %v2262_v62, %v4327_v31  ;;  %v2436_v54 = vrot.slane %v2262_v62, %v4325_v30  ;;  %v2460_v41 = vrot.slane %v2262_v62, %v4338_v36  ;;  %v4768_v19 = vadd.f32 %v2265_v12, %v5308_v1  ;;  %v2267_v23 = vpop.f32.mrb[15].mxu1  ;;  %v3396_v29 = vpop.f32.mrb[19].mxu0 }
 0x620   :  { %v4772_v20 = vrot.slane %v4762_v21, %v4327_v31  ;;  %v4776_v51 = vrot.slane %v4762_v21, %v4325_v30  ;;  %v4780_v52 = vrot.slane %v4762_v21, %v4338_v36  ;;  %v4783_v42 = vadd.f32 %v3394_v15, %v5311_v9 }
 0x621   :  { %5309 = vst [vmem:[#allocation56_spill] sm:$0xff] %v4768_v19  ;;  %v2421_v57 = vadd.f32 %v2412_v5, %v4703_v55  ;;  %v2445_v35 = vadd.f32 %v2436_v54, %v4707_v6  ;;  %v2469_v24 = vadd.f32 %v2460_v41, %v4711_v0  ;;  %v2484_v3 = vrot.slane %v2262_v62, %v5289_v13  ;;  %v4858_v55 = vpop.permute.xlu1 %2680 }
 0x622   :  { %5310 = vst [vmem:[#allocation57_spill] sm:$0xff] %v4780_v52  ;;  %v4795_v60 = vrot.slane %v4783_v42, %v4327_v31  ;;  %v4799_v7 = vrot.slane %v4783_v42, %v4325_v30  ;;  %v4802_v2 = vrot.slane %v2262_v62, %v4348_v44  ;;  %v4805_v16 = vrot.slane %v2262_v62, %v4350_v45 }
 0x623   :  { %v2427_v39 = vmax.f32 %v2421_v57, -1e+30  ;;  %v2493_v15 = vadd.f32 %v2484_v3, %v4717_v10  ;;  %v4809_v12 = vrot.slane %v2262_v62, %v4354_v47  ;;  %v4812_v9 = vrot.slane %v2262_v62, %v4357_v49 }
 0x624   :  { %5314 = vst [vmem:[#allocation60_spill] sm:$0xff] %v4799_v7  ;;  %v2517_v37 = vadd.f32 %v4802_v2, %v4722_v58  ;;  %v2541_v53 = vadd.f32 %v4805_v16, %v4728_v18  ;;  %v4820_v0 = vrot.slane %v4768_v19, %v4327_v31  ;;  %v4824_v57 = vrot.slane %v4768_v19, %v4325_v30 }
 0x625   :  { %v2451_v10 = vmax.f32 %v2427_v39, %v2445_v35  ;;  %v2565_v1 = vadd.f32 %v4809_v12, %v4733_v43  ;;  %v2589_v62 = vadd.f32 %v4812_v9, %v4738_v46  ;;  %v4832_v58 = vrot.slane %v4768_v19, %v4338_v36 }
 0x626   :  { %v4836_v18 = vadd.f32 %v4820_v0, %v4742_v4  ;;  %v2729_v6 = vadd.f32 %v4824_v57, %v4746_v28  ;;  %v4842_v35 = vrot.slane %v4768_v19, %v5289_v13  ;;  %v4846_v39 = vrot.slane %v4768_v19, %v4348_v44 }
 0x627   :  { %5315 = vst [vmem:[#allocation61_spill] sm:$0xff] %v4832_v58  ;;  %v2475_v46 = vmax.f32 %v2451_v10, %v2469_v24  ;;  %v4850_v43 = vadd.f32 %v4832_v58, %v4750_v61  ;;  %v4854_v4 = vrot.slane %v4768_v19, %v4350_v45  ;;  %v2840_v28 = vrot.slane %v4768_v19, %v4354_v47  ;;  %v4868_v24 = vpop.permute.xlu0 %2676  ;;  %v5319_v61 = vld [vmem:[#allocation43_spill] sm:$0xff] }
 0x628   :  { %5316 = vst [vmem:[#allocation62_spill] sm:$0xff] %v4842_v35  ;;  %5317 = vst [vmem:[#allocation63_spill] sm:$0xff] %v4846_v39  ;;  %v4862_v8 = vadd.f32 %v4842_v35, %v4754_v32  ;;  %v4866_v10 = vadd.f32 %v4846_v39, %v4758_v17  ;;  %v4871_v56 = vadd.f32 %v2267_v23, %v5319_v61  ;;  %v5320_v35 = vld [vmem:[#allocation44_spill] sm:$0xff] }
 0x629   :  { %5318 = vst [vmem:[#allocation64_spill] sm:$0xff] %v4868_v24  ;;  %v3397_v34 = vadd.f32 %v3396_v29, %v3395_v33  ;;  %v2499_v58 = vmax.f32 %v2475_v46, %v2493_v15  ;;  %v4875_v19 = vadd.f32 %v4854_v4, %v4791_v38  ;;  %v4878_v27 = vadd.f32 %v2840_v28, %v4858_v55 }
 0x62a   :  { %v4881_v32 = vadd.f32 %v2840_v28, %v4868_v24  ;;  %v2424_v39 = vadd.f32 %v2412_v5, %v4701_v50  ;;  %v2425_v23 = vadd.f32 %v4772_v20, %v4701_v50  ;;  %v2426_v46 = vadd.f32 %v4795_v60, %v4701_v50 }
 0x62b   :  { %v4884_v17 = vadd.f32 %v3397_v34, %v5320_v35  ;;  %v2523_v33 = vmax.f32 %v2499_v58, %v2517_v37  ;;  %v2448_v29 = vadd.f32 %v2436_v54, %v4705_v25  ;;  %v2449_v15 = vadd.f32 %v4776_v51, %v4705_v25 }
 0x62c   :  { %v2450_v28 = vadd.f32 %v4799_v7, %v4705_v25  ;;  %v2430_v24 = vmax.f32 %v2424_v39, -1e+30  ;;  %v2431_v34 = vmax.f32 %v2425_v23, -1e+30  ;;  %v2432_v38 = vmax.f32 %v2426_v46, -1e+30 }
 0x62d   :  { %v4898_v5 = vrot.slane %v4783_v42, %v4338_v36  ;;  %v2547_v35 = vmax.f32 %v2523_v33, %v2541_v53  ;;  %v2472_v61 = vadd.f32 %v2460_v41, %v4709_v48  ;;  %v2473_v50 = vadd.f32 %v4780_v52, %v4709_v48 }
 0x62e   :  { %v4905_v58 = vrot.slane %v4762_v21, %v5289_v13  ;;  %v2454_v37 = vmax.f32 %v2430_v24, %v2448_v29  ;;  %v2455_v54 = vmax.f32 %v2431_v34, %v2449_v15  ;;  %v2456_v25 = vmax.f32 %v2432_v38, %v2450_v28 }
 0x62f   :  { %v2474_v39 = vadd.f32 %v4898_v5, %v4709_v48  ;;  %v2571_v23 = vmax.f32 %v2547_v35, %v2565_v1  ;;  %v4911_v46 = vrot.slane %v4783_v42, %v5289_v13  ;;  %v2496_v53 = vadd.f32 %v2484_v3, %v4715_v63 }
 0x630   :  { %v2497_v41 = vadd.f32 %v4905_v58, %v4715_v63  ;;  %v2478_v33 = vmax.f32 %v2454_v37, %v2472_v61  ;;  %v2479_v52 = vmax.f32 %v2455_v54, %v2473_v50  ;;  %v4918_v24 = vrot.slane %v4762_v21, %v4348_v44 }
 0x631   :  { %v2480_v7 = vmax.f32 %v2456_v25, %v2474_v39  ;;  %v2595_v38 = vmax.f32 %v2571_v23, %v2589_v62  ;;  %v2498_v48 = vadd.f32 %v4911_v46, %v4715_v63  ;;  %v4924_v1 = vrot.slane %v4783_v42, %v4348_v44 }
 0x632   :  { %v2520_v3 = vadd.f32 %v4802_v2, %v4720_v26  ;;  %v2502_v35 = vmax.f32 %v2478_v33, %v2496_v53  ;;  %v2503_v29 = vmax.f32 %v2479_v52, %v2497_v41  ;;  %v2521_v61 = vadd.f32 %v4918_v24, %v4720_v26 }
 0x633   :  { %v4932_v15 = vrot.slane %v4762_v21, %v4350_v45  ;;  %v2711_v62 = vmax.f32 %v2595_v38, %v4836_v18  ;;  %v2504_v28 = vmax.f32 %v2480_v7, %v2498_v48  ;;  %v2522_v63 = vadd.f32 %v4924_v1, %v4720_v26 }
 0x634   :  { %v4939_v34 = vrot.slane %v4783_v42, %v4350_v45  ;;  %v2526_v2 = vmax.f32 %v2502_v35, %v2520_v3  ;;  %v2527_v50 = vmax.f32 %v2503_v29, %v2521_v61  ;;  %v2544_v52 = vadd.f32 %v4805_v16, %v4726_v59 }
 0x635   :  { %v2545_v37 = vadd.f32 %v4932_v15, %v4726_v59  ;;  %v2735_v54 = vmax.f32 %v2711_v62, %v2729_v6  ;;  %v2528_v25 = vmax.f32 %v2504_v28, %v2522_v63  ;;  %v4949_v26 = vrot.slane %v4762_v21, %v4354_v47 }
 0x636   :  { %v2546_v18 = vadd.f32 %v4939_v34, %v4726_v59  ;;  %v2550_v7 = vmax.f32 %v2526_v2, %v2544_v52  ;;  %v4953_v23 = vrot.slane %v4783_v42, %v4354_v47  ;;  %v2568_v16 = vadd.f32 %v4809_v12, %v4731_v22 }
 0x637   :  { %v2551_v39 = vmax.f32 %v2527_v50, %v2545_v37  ;;  %v2759_v53 = vmax.f32 %v2735_v54, %v4850_v43  ;;  %v2569_v41 = vadd.f32 %v4949_v26, %v4731_v22  ;;  %v4962_v59 = vrot.slane %v4762_v21, %v4357_v49 }
 0x638   :  { %v2552_v6 = vmax.f32 %v2528_v25, %v2546_v18  ;;  %v2570_v33 = vadd.f32 %v4953_v23, %v4731_v22  ;;  %v2574_v38 = vmax.f32 %v2550_v7, %v2568_v16  ;;  %v4968_v48 = vrot.slane %v4783_v42, %v4357_v49  ;;  %v5322_v7 = vld [vmem:[#allocation61_spill] sm:$0xff] }
 0x639   :  { %v2592_v12 = vadd.f32 %v4812_v9, %v4736_v40  ;;  %v2783_v43 = vmax.f32 %v2759_v53, %v4862_v8  ;;  %v2575_v3 = vmax.f32 %v2551_v39, %v2569_v41  ;;  %v2593_v35 = vadd.f32 %v4962_v59, %v4736_v40 }
 0x63a   :  { %v4977_v21 = vrot.slane %v4871_v56, %v4327_v31  ;;  %v2576_v29 = vmax.f32 %v2552_v6, %v2570_v33  ;;  %v2594_v22 = vadd.f32 %v4968_v48, %v4736_v40  ;;  %v4983_v42 = vrot.slane %v4884_v17, %v4327_v31 }
 0x63b   :  { %v2598_v61 = vmax.f32 %v2574_v38, %v2592_v12  ;;  %v2807_v9 = vmax.f32 %v2783_v43, %v4866_v10  ;;  %v2599_v8 = vmax.f32 %v2575_v3, %v2593_v35  ;;  %v2708_v62 = vadd.f32 %v4820_v0, %v4740_v11  ;;  %v5323_v38 = vld [vmem:[#allocation52_spill] sm:$0xff]  ;;  %v5324_v12 = vld [vmem:[#allocation62_spill] sm:$0xff] }
 0x63c   :  { %v2709_v28 = vadd.f32 %v4977_v21, %v4740_v11  ;;  %v2600_v63 = vmax.f32 %v2576_v29, %v2594_v22  ;;  %v2710_v2 = vadd.f32 %v4983_v42, %v4740_v11  ;;  %v4994_v40 = vrot.slane %v4871_v56, %v4325_v30 }
 0x63d   :  { %v4998_v31 = vrot.slane %v4884_v17, %v4325_v30  ;;  %v5001_v10 = vmax.f32 %v2807_v9, %v4875_v19  ;;  %v2714_v50 = vmax.f32 %v2598_v61, %v2708_v62  ;;  %v2732_v52 = vadd.f32 %v4824_v57, %v4744_v14  ;;  %v5321_v57 = vld [vmem:[#allocation50_spill] sm:$0xff]  ;;  %v5326_v62 = vld [vmem:[#allocation63_spill] sm:$0xff] }
 0x63e   :  { %v2715_v0 = vmax.f32 %v2599_v8, %v2709_v28  ;;  %v2716_v37 = vmax.f32 %v2600_v63, %v2710_v2  ;;  %v2733_v11 = vadd.f32 %v4994_v40, %v4744_v14  ;;  %v5011_v25 = vrot.slane %v4871_v56, %v4338_v36  ;;  %v5325_v8 = vld [vmem:[#allocation54_spill] sm:$0xff] }
 0x63f   :  { %v2734_v54 = vadd.f32 %v4998_v31, %v4744_v14  ;;  %v2855_v30 = vmax.f32 %v5001_v10, %v4881_v32  ;;  %v2738_v19 = vmax.f32 %v2714_v50, %v2732_v52  ;;  %v5017_v18 = vrot.slane %v4884_v17, %v4338_v36 }
 0x640   :  { %v2756_v39 = vadd.f32 %v5322_v7, %v5321_v57  ;;  %v2739_v16 = vmax.f32 %v2715_v0, %v2733_v11  ;;  %v2757_v14 = vadd.f32 %v5011_v25, %v5321_v57  ;;  %v5025_v6 = vrot.slane %v4871_v56, %v5289_v13  ;;  %v5327_v11 = vld [vmem:[#allocation58_spill] sm:$0xff] }
 0x641   :  { %v2740_v53 = vmax.f32 %v2716_v37, %v2734_v54  ;;  %v2758_v41 = vadd.f32 %v5017_v18, %v5321_v57  ;;  %v5031_v36 = vrot.slane %v4884_v17, %v5289_v13  ;;  %v2780_v43 = vadd.f32 %v5324_v12, %v5323_v38 }
 0x642   :  { %v2762_v33 = vmax.f32 %v2738_v19, %v2756_v39  ;;  %v2763_v3 = vmax.f32 %v2739_v16, %v2757_v14  ;;  %v2781_v35 = vadd.f32 %v5025_v6, %v5323_v38  ;;  %v5039_v29 = vrot.slane %v4871_v56, %v4348_v44  ;;  %v2692_v19 = vpop.permute.xlu1 %2691 }
 0x643   :  { %v5043_v22 = vrot.slane %v4884_v17, %v4348_v44  ;;  %v2764_v61 = vmax.f32 %v2740_v53, %v2758_v41  ;;  %v2782_v13 = vadd.f32 %v5031_v36, %v5323_v38  ;;  %v2804_v28 = vadd.f32 %v5326_v62, %v5325_v8 }
 0x644   :  { %v2786_v9 = vmax.f32 %v2762_v33, %v2780_v43  ;;  %v2787_v63 = vmax.f32 %v2763_v3, %v2781_v35  ;;  %v2805_v2 = vadd.f32 %v5039_v29, %v5325_v8  ;;  %v5055_v0 = vrot.slane %v4871_v56, %v4350_v45 }
 0x645   :  { %v2806_v50 = vadd.f32 %v5043_v22, %v5325_v8  ;;  %v2788_v44 = vmax.f32 %v2764_v61, %v2782_v13  ;;  %v5059_v37 = vrot.slane %v4884_v17, %v4350_v45  ;;  %v2828_v54 = vadd.f32 %v4854_v4, %v5327_v11  ;;  %v5328_v4 = vld [vmem:[#allocation56_spill] sm:$0xff]  ;;  %v5329_v8 = vld [vmem:[#allocation45_spill] sm:$0xff] }
 0x646   :  { %v2810_v52 = vmax.f32 %v2786_v9, %v2804_v28  ;;  %v2811_v57 = vmax.f32 %v2787_v63, %v2805_v2  ;;  %v2829_v7 = vadd.f32 %v5055_v0, %v5327_v11  ;;  %v5067_v39 = vrot.slane %v4871_v56, %v4354_v47  ;;  %v5330_v2 = vld [vmem:[#allocation39_spill] sm:$0xff] }
 0x647   :  { %v5071_v16 = vrot.slane %v4884_v17, %v4354_v47  ;;  %v2812_v53 = vmax.f32 %v2788_v44, %v2806_v50  ;;  %v2830_v45 = vadd.f32 %v5059_v37, %v5327_v11  ;;  %v2864_v41 = vrot.slane %v5328_v4, %v4357_v49  ;;  %v5331_v44 = vld [vmem:[#allocation60_spill] sm:$0xff] }
 0x648   :  { %v2834_v14 = vmax.f32 %v2810_v52, %v2828_v54  ;;  %v2835_v33 = vmax.f32 %v2811_v57, %v2829_v7  ;;  %v2853_v38 = vadd.f32 %v5067_v39, %v4858_v55  ;;  %v5083_v43 = vrot.slane %v4871_v56, %v4357_v49  ;;  %v5333_v57 = vld [vmem:[#allocation46_spill] sm:$0xff]  ;;  %v5336_v4 = vld [vmem:[#allocation44_spill] sm:$0xff] }
 0x649   :  { %v2854_v12 = vadd.f32 %v5071_v16, %v4858_v55  ;;  %v2836_v47 = vmax.f32 %v2812_v53, %v2830_v45  ;;  %v5088_v35 = vrot.slane %v4884_v17, %v4357_v49  ;;  %v2876_v61 = vadd.f32 %v2864_v41, %v2692_v19  ;;  %v5335_v53 = vld [vmem:[#allocation43_spill] sm:$0xff] }
 0x64a   :  { %v2858_v3 = vmax.f32 %v2834_v14, %v4878_v27  ;;  %v2859_v13 = vmax.f32 %v2835_v33, %v2853_v38  ;;  %v2877_v9 = vadd.f32 %v5083_v43, %v2692_v19  ;;  %v2422_v62 = vadd.f32 %v4772_v20, %v5329_v8  ;;  %v5332_v20 = vld [vmem:[#allocation38_spill] sm:$0xff] }
 0x64b   :  { %v2423_v55 = vadd.f32 %v4795_v60, %v5329_v8  ;;  %v2860_v28 = vmax.f32 %v2836_v47, %v2854_v12  ;;  %v2878_v56 = vadd.f32 %v5088_v35, %v2692_v19  ;;  %v2446_v27 = vadd.f32 %v4776_v51, %v5330_v2  ;;  %v5334_v60 = vld [vmem:[#allocation57_spill] sm:$0xff]  ;;  %v5337_v47 = vld [vmem:[#allocation40_spill] sm:$0xff]  ;;  %v5338_v8 = vld [vmem:[#allocation47_spill] sm:$0xff] }
 0x64c   :  { %v2882_v63 = vmax.f32 %v2858_v3, %v2876_v61  ;;  %v5098_v50 = vmax.f32 %v2859_v13, %v2877_v9  ;;  %v2428_v49 = vmax.f32 %v2422_v62, -1e+30  ;;  %v2447_v52 = vadd.f32 %v5331_v44, %v5330_v2 }
 0x64d   :  { %v2429_v17 = vmax.f32 %v2423_v55, -1e+30  ;;  %v5102_v11 = vmax.f32 %v2860_v28, %v2878_v56  ;;  %v2470_v7 = vadd.f32 %v5334_v60, %v5333_v57  ;;  %v2471_v51 = vadd.f32 %v4898_v5, %v5333_v57  ;;  %v5339_v56 = vld [vmem:[#allocation37_spill] sm:$0xff] }
 0x64e   :  { %v2888_v54 = vsub.f32 %v2882_v63, %v5332_v20  ;;  %v2889_v19 = vsub.f32 %v5098_v50, %v5335_v53  ;;  %v2452_v45 = vmax.f32 %v2428_v49, %v2446_v27  ;;  %v2494_v3 = vadd.f32 %v4905_v58, %v5337_v47  ;;  %v2688_v58 = vpop.permute.xlu0 %2687  ;;  %v5341_v20 = vld [vmem:[#allocation35_spill] sm:$0xff] }
 0x64f   :  { %v2453_v14 = vmax.f32 %v2429_v17, %v2447_v52  ;;  %v2890_v33 = vsub.f32 %v5102_v11, %v5336_v4  ;;  %v2495_v61 = vadd.f32 %v4911_v46, %v5337_v47  ;;  %v2518_v62 = vadd.f32 %v4918_v24, %v5338_v8  ;;  %v5340_v46 = vld [vmem:[#allocation48_spill] sm:$0xff]  ;;  %v5345_v47 = vld [vmem:[#allocation51_spill] sm:$0xff] }
 0x650   :  { %v2476_v38 = vmax.f32 %v2452_v45, %v2470_v7  ;;  %v2519_v55 = vadd.f32 %v4924_v1, %v5338_v8  ;;  %v2542_v63 = vadd.f32 %v4932_v15, %v5339_v56  ;;  %v2543_v2 = vadd.f32 %v4939_v34, %v5339_v56  ;;  %v5342_v45 = vld [vmem:[#allocation34_spill] sm:$0xff] }
 0x651   :  { %v2477_v12 = vmax.f32 %v2453_v14, %v2471_v51  ;;  %v2566_v17 = vadd.f32 %v4949_v26, %v5340_v46  ;;  %v2567_v24 = vadd.f32 %v4953_v23, %v5340_v46  ;;  %v2873_v44 = vadd.f32 %v2864_v41, %v2688_v58  ;;  %v5343_v41 = vld [vmem:[#allocation36_spill] sm:$0xff] }
 0x652   :  { %v2500_v13 = vmax.f32 %v2476_v38, %v2494_v3  ;;  %v2590_v57 = vadd.f32 %v4962_v59, %v5341_v20  ;;  %v2591_v15 = vadd.f32 %v4968_v48, %v5341_v20  ;;  %v2706_v26 = vadd.f32 %v4977_v21, %v5342_v45  ;;  %v5344_v59 = vld [vmem:[#allocation49_spill] sm:$0xff]  ;;  %v3329_v20 = vld [vmem:[#allocation24] ss:$0 sm:$0xff] }
 0x653   :  { %v2501_v9 = vmax.f32 %v2477_v12, %v2495_v61  ;;  %v2879_v34 = vmax.f32 %v2855_v30, %v2873_v44  ;;  %v2707_v23 = vadd.f32 %v4983_v42, %v5342_v45  ;;  %v2730_v12 = vadd.f32 %v4994_v40, %v5344_v59 }
 0x654   :  { %v2524_v5 = vmax.f32 %v2500_v13, %v2518_v62  ;;  %v2731_v48 = vadd.f32 %v4998_v31, %v5344_v59  ;;  %v2754_v3 = vadd.f32 %v5011_v25, %v5345_v47  ;;  %v2755_v21 = vadd.f32 %v5017_v18, %v5345_v47  ;;  %v5346_v13 = vld [vmem:[#allocation53_spill] sm:$0xff]  ;;  %v5347_v31 = vld [vmem:[#allocation55_spill] sm:$0xff] }
 0x655   :  { %v2525_v28 = vmax.f32 %v2501_v9, %v2519_v55  ;;  %v2885_v14 = vsub.f32 %v2879_v34, %v5343_v41  ;;  %v2778_v9 = vadd.f32 %v5025_v6, %v5346_v13  ;;  %v2779_v40 = vadd.f32 %v5031_v36, %v5346_v13 }
 0x656   :  { %v2548_v27 = vmax.f32 %v2524_v5, %v2542_v63  ;;  %v2803_v55 = vadd.f32 %v5043_v22, %v5347_v31  ;;  %v2874_v22 = vadd.f32 %v5083_v43, %v2688_v58  ;;  %v2875_v46 = vadd.f32 %v5088_v35, %v2688_v58 }
 0x657   :  { %v2549_v49 = vmax.f32 %v2525_v28, %v2543_v2  ;;  %v2891_v32 = vpack.c.bf16 %v2888_v54, %v2885_v14  ;;  %v2802_v54 = vadd.f32 %v5039_v29, %v5347_v31  ;;  %v5348_v28 = vld [vmem:[#allocation59_spill] sm:$0xff]  ;;  %v5349_v2 = vld [vmem:[#allocation64_spill] sm:$0xff] }
 0x658   :  { %v2572_v52 = vmax.f32 %v2548_v27, %v2566_v17  ;;  %v2826_v18 = vadd.f32 %v5055_v0, %v5348_v28  ;;  %v2827_v56 = vadd.f32 %v5059_v37, %v5348_v28  ;;  %v2850_v36 = vadd.f32 %v5067_v39, %v5349_v2  ;;  %v5350_v0 = vld [vmem:[#allocation41_spill] sm:$0xff] }
 0x659   :  { %v2573_v1 = vmax.f32 %v2549_v49, %v2567_v24  ;;  %v2851_v27 = vadd.f32 %v5071_v16, %v5349_v2 }
 0x65a   :  { %v2596_v60 = vmax.f32 %v2572_v52, %v2590_v57  ;;  %v5351_v52 = vld [vmem:[#allocation42_spill] sm:$0xff] }
 0x65b   :  { %v2597_v7 = vmax.f32 %v2573_v1, %v2591_v15 }
 0x65c   :  { %v2712_v51 = vmax.f32 %v2596_v60, %v2706_v26 }
 0x65d   :  { %v2713_v38 = vmax.f32 %v2597_v7, %v2707_v23 }
 0x65e   :  { %v2736_v10 = vmax.f32 %v2712_v51, %v2730_v12 }
 0x65f   :  { %v2737_v30 = vmax.f32 %v2713_v38, %v2731_v48 }
 0x660   :  { %v2760_v42 = vmax.f32 %v2736_v10, %v2754_v3 }
 0x661   :  { %v2761_v61 = vmax.f32 %v2737_v30, %v2755_v21 }
 0x662   :  { %v2784_v8 = vmax.f32 %v2760_v42, %v2778_v9 }
 0x663   :  { %v2785_v62 = vmax.f32 %v2761_v61, %v2779_v40 }
 0x664   :  { %v2808_v25 = vmax.f32 %v2784_v8, %v2802_v54 }
 0x665   :  { %v2809_v5 = vmax.f32 %v2785_v62, %v2803_v55 }
 0x666   :  { %v2832_v6 = vmax.f32 %v2808_v25, %v2826_v18 }
 0x667   :  { %v2833_v63 = vmax.f32 %v2809_v5, %v2827_v56 }
 0x668   :  { %v2856_v29 = vmax.f32 %v2832_v6, %v2850_v36 }
 0x669   :  { %v2857_v49 = vmax.f32 %v2833_v63, %v2851_v27 }
 0x66a   :  { %v2880_v17 = vmax.f32 %v2856_v29, %v2874_v22 }
 0x66b   :  { %v2881_v24 = vmax.f32 %v2857_v49, %v2875_v46 }
 0x66c   :  { %v2886_v44 = vsub.f32 %v2880_v17, %v5350_v0 }
 0x66d   :  { %v2887_v37 = vsub.f32 %v2881_v24, %v5351_v52 }
 0x66e   :  { %v2892_v1 = vpack.c.bf16 %v2889_v19, %v2886_v44 }
 0x66f   :  { %v2893_v39 = vpack.c.bf16 %v2890_v33, %v2887_v37 }
 0x670   :  { %3125 = vmatprep.mubr.bf16.mxu1 %v2892_v1 }
 0x671   :  { %3486 = vmatmul.mubr.bf16.vlgmr.msra.gmra.mrb[20].mxu0 %v2893_v39  ;;  %3126 = vmatmul.mubr.bf16.vlgmr.msra.gmra.mrb[16].mxu1 %v2891_v32 }
 0x744   :  { %v3168_v16 = vpop.f32.mrb[20].mxu0  ;;  %v3414_v43 = vpop.f32.mrb[16].mxu1 }
 0x745   :  { %v3487_v35 = vpop.f32.mrb[21].mxu0  ;;  %v3415_v58 = vpop.f32.mrb[17].mxu1 }
 0x746   :  { %v3171_v57 = vpop.f32.mrb[22].mxu0  ;;  %v3416_v15 = vadd.f32 %v3415_v58, %v3414_v43  ;;  %v3417_v34 = vpop.f32.mrb[18].mxu1 }
 0x747   :  { %v3488_v60 = vpop.f32.mrb[23].mxu0  ;;  %v3418_v7 = vpop.f32.mrb[19].mxu1 }
 0x748   :  { %v3128_v45 = vadd.f32 %v3416_v15, %v3329_v20  ;;  %v3419_v50 = vadd.f32 %v3418_v7, %v3417_v34 }
 0x74a   :  { %v3169_v53 = vadd.f32 %v3168_v16, %v3128_v45  ;;  %v3131_v11 = vadd.f32 %v3419_v50, %v3329_v20 }
 0x74c   :  { %3175 = vst [vmem:[#allocation25] sm:$0xff] %v3169_v53  ;;  %v3172_v19 = vadd.f32 %v3171_v57, %v3131_v11 }
 0x74e   :  { %3176 = vst [vmem:[#allocation25 + $0x8] sm:$0xff] %v3172_v19 }
 0x74f   :  { %3999 = shalt.err (!%p3996_p10)
}
 0x750   :  { %s4000_s17 = scalar_lea.hbm %s5203_s13, 256 }
 0x751   :  { %p4001_p11 = scmp.ne.s32.totalorder %s5203_s13, %s4000_s17  ;;  %p4004_p12 = scmp.lt.u32.totalorder %s4000_s17, %s5203_s13 }
 0x753   :  { %p4006_p13 = pnand %p4004_p12, %p4001_p11 }
 0x755   :  { %4009 = shalt.err (!%p4006_p13)
}
 0x756   :  { %3188 = dma.vmem_to_hbm [thread:$0]  %s3183_s6, 256, %s5203_s13, [#allocation6], %s5264_s11, %s5264_s11, %s4029_s21  }
 0x757   :  { %4024 = dma.done.wait [#allocation6], 256  }
 0x758   :  { %4025 = vsyncadd [#allocation6], 4294967040 }
 0x759   :  { %3192 = vsyncpa [#allocation5], 1 }
 0x75a   :  { %3193 = vsyncpa [#allocation8], 1 }
 0x75b   :  { %3194 = vsyncpa [#allocation11], 1 }
 0x75c   :  { %3195 = vsyncpa [#allocation14], 1 }
 0x75d   :  { %3196 = vsyncpa [#allocation17], 1 }
 0x75e   :  { %3197 = vsyncpa [#allocation20], 1 }
 0x75f   :  { %3198 = vsyncpa [#allocation23], 1 }
 0x760   :  { %3199 = vsyncpa [#allocation6], 1 }

</bundles_post_ra>
